<compile_context>
chip_gen: v5e
topology: v5e:2x2
jax: 0.10.0
libtpu: 0.0.40
codegen_flags: <defaults>
</compile_context>

<pallas_src>
import functools

import jax
import jax.numpy as jnp
from jax import lax
from jax.experimental import pallas as pl
from jax.experimental.pallas import tpu as pltpu


def _silu(v):
    # numerically stable SiLU: sigmoid via tanh (EUP-native, no overflow).
    return v * (0.5 * (jnp.tanh(0.5 * v) + 1.0))


def _softplus(v):
    return jnp.maximum(v, 0.0) + jnp.log(1.0 + jnp.exp(-jnp.abs(v)))


# ----------------------------------------------------------------------------
# adaLN modulation in plain XLA (a few-KiB matmul; a separate pallas_call is
# pure launch overhead).
# ----------------------------------------------------------------------------

def adaln_modulation(c, w, b):
    return jnp.dot(jax.nn.silu(c), w) + b[None, :]


# ----------------------------------------------------------------------------
# Fused Mamba branch kernel.
# One grid step = G sequences of length L, rows time-major (row = t*G + s).
# ----------------------------------------------------------------------------

def _fused_mamba_kernel(x_ref, sh_ref, sc_ref, g_ref, ln_g_ref, ln_b_ref,
                        w_in_ref, conv_w_ref, conv_b_ref, w_fold_ref,
                        apack_ref, dvec_ref, dtb_ref, w_out_ref,
                        o_ref,
                        dap_scr, dbp_scr, y2_scr, cm_scr,
                        *, G: int, L: int, CH: int, eps: float):
    K, ED = conv_w_ref.shape
    N2, E2 = apack_ref.shape              # pair-packed states: E2 == 2*ED
    assert E2 == 2 * ED
    N = 2 * N2
    T = G * L                             # rows per block
    R = CH * G                            # rows per scan chunk (multiple of 8)
    n_chunks = L // CH

    x_in = x_ref[0]                                              # (T, D)

    # ---- fused LayerNorm + adaLN modulate (f32) ------------------------------
    mu = jnp.mean(x_in, axis=-1, keepdims=True)
    xc = x_in - mu
    var = jnp.mean(xc * xc, axis=-1, keepdims=True)
    xn = xc * lax.rsqrt(var + eps)
    xn = xn * ln_g_ref[...] + ln_b_ref[...]
    xn = xn * (1.0 + sc_ref[0]) + sh_ref[0]

    # ---- in_proj (bf16 MXU, f32 accumulate); output 2*ED = 128 lanes ----------
    xz = jnp.dot(xn.astype(jnp.bfloat16), w_in_ref[...],
                 preferred_element_type=jnp.float32)             # (T, 2*ED)
    u = xz[:, :ED]
    z = xz[:, ED:]

    # ---- causal depthwise conv (taps at stride G) in registers + SiLU --------
    acc = u * conv_w_ref[K - 1:K, :]                   # delay-0 tap
    for d in range(1, K):                              # static unroll
        shifted = jnp.concatenate(
            [jnp.zeros((d * G, ED), jnp.float32), u[:T - d * G, :]], axis=0)
        acc = acc + shifted * conv_w_ref[K - 1 - d:K - d, :]
    uc = _silu(acc + conv_b_ref[...])

    # ---- folded x_proj / dt_proj (bf16 MXU; 128-lane padded output) ----------
    xdbl = jnp.dot(uc.astype(jnp.bfloat16), w_fold_ref[...],
                   preferred_element_type=jnp.float32)           # (T, >=128)
    dt = _softplus(xdbl[:, :ED] + dtb_ref[...])                  # (T, ED)
    bm = xdbl[:, ED:ED + N]                                      # (T, N)
    cm = xdbl[:, ED + N:ED + 2 * N]                              # (T, N)
    du = dt * uc

    # ---- precompute exp(dt*A) and dt*u*B, two state channels per 128 lanes ---
    dt2 = jnp.concatenate([dt, dt], axis=1)                      # (T, 2*ED)
    du2 = jnp.concatenate([du, du], axis=1)
    for p in range(N2):                                          # static, small
        dap_scr[p] = jnp.exp(dt2 * apack_ref[p:p + 1, :])        # (T, 2*ED)
        bp = jnp.concatenate(
            [jnp.broadcast_to(bm[:, 2 * p:2 * p + 1], (T, ED)),
             jnp.broadcast_to(bm[:, 2 * p + 1:2 * p + 2], (T, ED))], axis=1)
        dbp_scr[p] = du2 * bp
    cm_scr[...] = cm

    # ---- serial scan over sublane-aligned chunks; y accumulated in-loop ------
    def chunk_body(c, hs):
        r0 = pl.multiple_of(c * R, R)
        cm_c = cm_scr[pl.ds(r0, R), :]                           # (R, N)
        da_c = [dap_scr[p, pl.ds(r0, R), :] for p in range(N2)]  # (R, 2*ED)
        db_c = [dbp_scr[p, pl.ds(r0, R), :] for p in range(N2)]
        cpk_c = [jnp.concatenate(
            [jnp.broadcast_to(cm_c[:, 2 * p:2 * p + 1], (R, ED)),
             jnp.broadcast_to(cm_c[:, 2 * p + 1:2 * p + 2], (R, ED))], axis=1)
            for p in range(N2)]
        hs = list(hs)
        ys = []
        for j in range(CH):                                      # static unroll
            lo, hi = j * G, (j + 1) * G
            yj = None
            for p in range(N2):
                hs[p] = da_c[p][lo:hi] * hs[p] + db_c[p][lo:hi]  # (G, 2*ED)
                t = hs[p] * cpk_c[p][lo:hi]
                yj = t if yj is None else yj + t
            ys.append(yj)
        y2_scr[pl.ds(r0, R), :] = (ys[0] if CH == 1
                                   else jnp.concatenate(ys, axis=0))
        return tuple(hs)

    h0 = tuple(jnp.zeros((G, E2), jnp.float32) for _ in range(N2))
    lax.fori_loop(0, n_chunks, chunk_body, h0)

    # ---- y = C.h + D*u, SiLU(z) gate, out_proj, residual + adaLN gate --------
    y2 = y2_scr[...]
    y = y2[:, :ED] + y2[:, ED:] + dvec_ref[...] * uc
    y = y * _silu(z)
    out = jnp.dot(y.astype(jnp.bfloat16), w_out_ref[...],
                  preferred_element_type=jnp.float32)            # (T, D)
    o_ref[0] = x_in + g_ref[0] * out


def fused_mamba_branch(x, shift, scale, gate, ln_g, ln_b, mp, *, G):
    """x: (B, T, D), rows time-major (row = t*G + s); scans G sequences of
    length T//G per batch element, one batch element per (parallel) grid step."""
    Bx, T, D = x.shape
    K, ED = mp["conv_w"].shape
    N = mp["A_t"].shape[0]
    dt_rank = mp["dt_proj_w"].shape[0]
    assert N % 2 == 0, "state-channel pair packing needs an even d_state"
    N2, E2 = N // 2, 2 * ED
    assert T % G == 0
    L = T // G
    if G % 8 == 0:
        CH = 1                                   # one timestep x G rows >= 8
    else:
        assert G == 1 and L % 8 == 0, "unsupported (G, L) combination"
        CH = 8                                   # eight timesteps per chunk
    assert (CH * G) % 8 == 0 and L % CH == 0

    # fold dt_proj into x_proj (exact: x_proj has no bias); pad output width to
    # a multiple of 128 so the MXU result pop stays lane-dense.
    w_fold = jnp.concatenate(
        [mp["x_proj_w"][:, :dt_rank] @ mp["dt_proj_w"],
         mp["x_proj_w"][:, dt_rank:]], axis=1)               # (ED, ED + 2N)
    pad = (-w_fold.shape[1]) % 128
    if pad:
        w_fold = jnp.pad(w_fold, ((0, 0), (0, pad)))
    P = w_fold.shape[1]

    apack = mp["A_t"].reshape(N2, E2)            # row p = [A[:,2p] | A[:,2p+1]]

    sh = shift.reshape(Bx, 1, D).astype(jnp.float32)
    sc = scale.reshape(Bx, 1, D).astype(jnp.float32)
    gt = gate.reshape(Bx, 1, D).astype(jnp.float32)
    gamma = ln_g.reshape(1, D).astype(jnp.float32)
    beta = ln_b.reshape(1, D).astype(jnp.float32)

    x_spec = pl.BlockSpec((1, T, D), lambda b: (b, 0, 0))
    mod_spec = pl.BlockSpec((1, 1, D), lambda b: (b, 0, 0))
    vec_d = pl.BlockSpec((1, D), lambda b: (0, 0))
    vec_ed = pl.BlockSpec((1, ED), lambda b: (0, 0))

    # NOTE(perf): constant-index weight specs would take
    # pipeline_mode=pl.Buffered(1) at production widths; left default here
    # (negligible at these sizes).
    kern = functools.partial(_fused_mamba_kernel, G=G, L=L, CH=CH, eps=1e-5)
    return pl.pallas_call(
        kern,
        out_shape=jax.ShapeDtypeStruct((Bx, T, D), jnp.float32),
        grid=(Bx,),
        in_specs=[
            x_spec, mod_spec, mod_spec, mod_spec, vec_d, vec_d,
            pl.BlockSpec((D, 2 * ED), lambda b: (0, 0)),
            pl.BlockSpec((K, ED), lambda b: (0, 0)),
            vec_ed,
            pl.BlockSpec((ED, P), lambda b: (0, 0)),
            pl.BlockSpec((N2, E2), lambda b: (0, 0)),
            vec_ed, vec_ed,
            pl.BlockSpec((ED, D), lambda b: (0, 0)),
        ],
        out_specs=pl.BlockSpec((1, T, D), lambda b: (b, 0, 0)),
        scratch_shapes=[
            pltpu.VMEM((N2, T, E2), jnp.float32),    # exp(dt*A), pair-packed
            pltpu.VMEM((N2, T, E2), jnp.float32),    # dt*u*B,    pair-packed
            pltpu.VMEM((T, E2), jnp.float32),        # packed y accumulator
            pltpu.VMEM((T, N), jnp.float32),         # C coefficients
        ],
        compiler_params=pltpu.CompilerParams(
            dimension_semantics=("parallel",),
            vmem_limit_bytes=32 * 1024 * 1024),
    )(x.astype(jnp.float32), sh, sc, gt, gamma, beta,
      mp["in_proj_w"].astype(jnp.bfloat16),
      mp["conv_w"].astype(jnp.float32),
      mp["conv_b"].reshape(1, ED).astype(jnp.float32),
      w_fold.astype(jnp.bfloat16),
      apack.astype(jnp.float32),
      mp["D"].reshape(1, ED).astype(jnp.float32),
      mp["dt_bias"].reshape(1, ED).astype(jnp.float32),
      mp["out_proj_w"].astype(jnp.bfloat16))


# ----------------------------------------------------------------------------
# MambaBlock forward (use_local_attention=False)
# ----------------------------------------------------------------------------

def mamba_block_forward(params, x, c, WH, frame_space, use_local_cov):
    """x: (B, F, WH*WH, D); c: (B, D). Returns (x_out, local_x)."""
    del frame_space, WH                       # unused by this forward path
    B, F, HW, D = x.shape

    ada = adaln_modulation(c, params["adaln_w"], params["adaln_b"])   # (B, 9D)
    ch = [ada[:, i * D:(i + 1) * D] for i in range(9)]
    # chunks 0..2 feed the (disabled) local-attention branch
    shift_mamba, scale_mamba, gate_mamba = ch[3], ch[4], ch[5]
    shift_f, scale_f, gate_f = ch[6], ch[7], ch[8]

    # 'B F (H W) D -> B (F H W) D' : flat row = f*HW + s (free reshape).  The
    # same layout serves both branches: spatial = 1 sequence of F*HW tokens,
    # temporal = HW interleaved frame-sequences (rows already time-major).
    x_flat = x.reshape(B, F * HW, D)

    x1 = fused_mamba_branch(x_flat, shift_mamba, scale_mamba, gate_mamba,
                            params["norm2_g"], params["norm2_b"],
                            params["mamba_hw"], G=1)
    local_x = x1.reshape(B, F, HW, D) if use_local_cov else None

    x2 = fused_mamba_branch(x1, shift_f, scale_f, gate_f,
                            params["norm3_g"], params["norm3_b"],
                            params["mamba_f"], G=HW)
    return x2.reshape(B, F, HW, D), local_x


# ----------------------------------------------------------------------------
# Deterministic parameter init (synthetic; mirrors __init__ shapes)
# ----------------------------------------------------------------------------

def _xavier(key, fan_in, fan_out):
    lim = (6.0 / (fan_in + fan_out)) ** 0.5
    return jax.random.uniform(key, (fan_in, fan_out), jnp.float32, -lim, lim)


def init_mamba_params(key, D, ED, N, dt_rank, d_conv):
    ks = jax.random.split(key, 5)
    A_log = jnp.log(jnp.tile(jnp.arange(1, N + 1, dtype=jnp.float32)[None, :],
                             (ED, 1)))                      # (ED, N)
    return {
        "in_proj_w": _xavier(ks[0], D, 2 * ED),
        "conv_w": jax.random.uniform(ks[1], (d_conv, ED), jnp.float32, -0.2, 0.2),
        "conv_b": jnp.zeros((ED,), jnp.float32),
        "x_proj_w": _xavier(ks[2], ED, dt_rank + 2 * N),
        "dt_proj_w": _xavier(ks[3], dt_rank, ED),
        "dt_bias": jnp.zeros((ED,), jnp.float32),
        "A_t": -jnp.exp(A_log).T,                           # (N, ED)
        "D": jnp.ones((ED,), jnp.float32),
        "out_proj_w": _xavier(ks[4], ED, D),
    }


def init_block_params(key, D, ED, N, dt_rank, d_conv=4):
    k1, k2, k3 = jax.random.split(key, 3)
    return {
        "adaln_w": _xavier(k1, D, 9 * D),
        "adaln_b": jnp.zeros((9 * D,), jnp.float32),
        "norm2_g": jnp.ones((D,), jnp.float32),
        "norm2_b": jnp.zeros((D,), jnp.float32),
        "norm3_g": jnp.ones((D,), jnp.float32),
        "norm3_b": jnp.zeros((D,), jnp.float32),
        "mamba_hw": init_mamba_params(k2, D, ED, N, dt_rank, d_conv),
        "mamba_f": init_mamba_params(k3, D, ED, N, dt_rank, d_conv),
    }


# ----------------------------------------------------------------------------
# Main
# ----------------------------------------------------------------------------

if __name__ == "__main__":
    B, F, WH, D = 2, 4, 4, 32           # D_dim = 32
    HW = WH * WH                        # 16 spatial tokens per frame
    d_state = 8
    dt_rank = 4
    expand = 2
    ED = expand * D                     # dim_inner = 64 -> 2*ED = 128 lanes
    d_conv = 4

    key = jax.random.PRNGKey(0)
    kx, kc, kp = jax.random.split(key, 3)
    x = jax.random.normal(kx, (B, F, HW, D), jnp.float32)
    c = jax.random.normal(kc, (B, D), jnp.float32)
    frame_space = jnp.zeros((B, F), jnp.float32)   # unused by the forward pass

    params = init_block_params(kp, D, ED, d_state, dt_rank, d_conv)

    out, local_x = mamba_block_forward(params, x, c, WH, frame_space,
                                       use_local_cov=True)
    jax.block_until_ready(out)
    jax.block_until_ready(local_x)
    assert out.shape == (B, F, HW, D)
    assert local_x.shape == (B, F, HW, D)
    print("KERNEL_OK")
</pallas_src>

<mosaic_0001>
module attributes {stable_mosaic.version = 11 : i64} {
  func.func @_fused_mamba_kernel(%arg0: i32, %arg1: memref<1x64x32xf32, #tpu.memory_space<vmem>>, %arg2: memref<1x1x32xf32, #tpu.memory_space<vmem>>, %arg3: memref<1x1x32xf32, #tpu.memory_space<vmem>>, %arg4: memref<1x1x32xf32, #tpu.memory_space<vmem>>, %arg5: memref<1x32xf32, #tpu.memory_space<vmem>>, %arg6: memref<1x32xf32, #tpu.memory_space<vmem>>, %arg7: memref<32x128xbf16, #tpu.memory_space<vmem>>, %arg8: memref<4x64xf32, #tpu.memory_space<vmem>>, %arg9: memref<1x64xf32, #tpu.memory_space<vmem>>, %arg10: memref<64x128xbf16, #tpu.memory_space<vmem>>, %arg11: memref<4x128xf32, #tpu.memory_space<vmem>>, %arg12: memref<1x64xf32, #tpu.memory_space<vmem>>, %arg13: memref<1x64xf32, #tpu.memory_space<vmem>>, %arg14: memref<64x32xbf16, #tpu.memory_space<vmem>>, %arg15: memref<1x64x32xf32, #tpu.memory_space<vmem>>, %arg16: memref<4x64x128xf32, #tpu.memory_space<vmem>>, %arg17: memref<4x64x128xf32, #tpu.memory_space<vmem>>, %arg18: memref<64x128xf32, #tpu.memory_space<vmem>>, %arg19: memref<64x8xf32, #tpu.memory_space<vmem>>) attributes {dimension_semantics = [#tpu.dimension_semantics<parallel>], iteration_bounds = array<i64: 2>, scalar_prefetch = 0 : i64, scratch_operands = 4 : i64, tpu.core_type = #tpu.core_type<tc>, window_params = [{transform_indices = @transform_0, window_bounds = array<i64: 1, 64, 32>}, {transform_indices = @transform_1, window_bounds = array<i64: 1, 1, 32>}, {transform_indices = @transform_2, window_bounds = array<i64: 1, 1, 32>}, {transform_indices = @transform_3, window_bounds = array<i64: 1, 1, 32>}, {pipeline_mode = #tpu.pipeline_mode<synchronous>, transform_indices = @transform_4, window_bounds = array<i64: 1, 32>}, {pipeline_mode = #tpu.pipeline_mode<synchronous>, transform_indices = @transform_5, window_bounds = array<i64: 1, 32>}, {pipeline_mode = #tpu.pipeline_mode<synchronous>, transform_indices = @transform_6, window_bounds = array<i64: 32, 128>}, {pipeline_mode = #tpu.pipeline_mode<synchronous>, transform_indices = @transform_7, window_bounds = array<i64: 4, 64>}, {pipeline_mode = #tpu.pipeline_mode<synchronous>, transform_indices = @transform_8, window_bounds = array<i64: 1, 64>}, {pipeline_mode = #tpu.pipeline_mode<synchronous>, transform_indices = @transform_9, window_bounds = array<i64: 64, 128>}, {pipeline_mode = #tpu.pipeline_mode<synchronous>, transform_indices = @transform_10, window_bounds = array<i64: 4, 128>}, {pipeline_mode = #tpu.pipeline_mode<synchronous>, transform_indices = @transform_11, window_bounds = array<i64: 1, 64>}, {pipeline_mode = #tpu.pipeline_mode<synchronous>, transform_indices = @transform_12, window_bounds = array<i64: 1, 64>}, {pipeline_mode = #tpu.pipeline_mode<synchronous>, transform_indices = @transform_13, window_bounds = array<i64: 64, 32>}, {transform_indices = @transform_14, window_bounds = array<i64: 1, 64, 32>}]} {
    %c0 = arith.constant 0 : index
    %c0_0 = arith.constant 0 : index
    %c0_1 = arith.constant 0 : index
    %0 = vector.load %arg1[%c0, %c0_0, %c0_1] : memref<1x64x32xf32, #tpu.memory_space<vmem>>, vector<1x64x32xf32>
    %1 = vector.shape_cast %0 : vector<1x64x32xf32> to vector<64x32xf32>
    %cst = arith.constant dense<0.000000e+00> : vector<64xf32>
    %2 = vector.multi_reduction <add>, %1, %cst [1] : vector<64x32xf32> to vector<64xf32>
    %3 = vector.shape_cast %2 : vector<64xf32> to vector<64x1xf32>
    %cst_2 = arith.constant 3.200000e+01 : f32
    %4 = vector.broadcast %cst_2 : f32 to vector<64x1xf32>
    %5 = arith.divf %3, %4 : vector<64x1xf32>
    %6 = vector.broadcast %5 : vector<64x1xf32> to vector<64x32xf32>
    %7 = arith.subf %1, %6 : vector<64x32xf32>
    %8 = arith.mulf %7, %7 : vector<64x32xf32>
    %cst_3 = arith.constant dense<0.000000e+00> : vector<64xf32>
    %9 = vector.multi_reduction <add>, %8, %cst_3 [1] : vector<64x32xf32> to vector<64xf32>
    %10 = vector.shape_cast %9 : vector<64xf32> to vector<64x1xf32>
    %cst_4 = arith.constant 3.200000e+01 : f32
    %11 = vector.broadcast %cst_4 : f32 to vector<64x1xf32>
    %12 = arith.divf %10, %11 : vector<64x1xf32>
    %cst_5 = arith.constant 9.99999974E-6 : f32
    %13 = vector.broadcast %cst_5 : f32 to vector<64x1xf32>
    %14 = arith.addf %12, %13 : vector<64x1xf32>
    %15 = math.rsqrt %14 : vector<64x1xf32>
    %16 = vector.broadcast %15 : vector<64x1xf32> to vector<64x32xf32>
    %17 = arith.mulf %7, %16 : vector<64x32xf32>
    %c0_6 = arith.constant 0 : index
    %c0_7 = arith.constant 0 : index
    %18 = vector.load %arg5[%c0_6, %c0_7] : memref<1x32xf32, #tpu.memory_space<vmem>>, vector<1x32xf32>
    %19 = vector.broadcast %18 : vector<1x32xf32> to vector<64x32xf32>
    %20 = arith.mulf %17, %19 : vector<64x32xf32>
    %c0_8 = arith.constant 0 : index
    %c0_9 = arith.constant 0 : index
    %21 = vector.load %arg6[%c0_8, %c0_9] : memref<1x32xf32, #tpu.memory_space<vmem>>, vector<1x32xf32>
    %22 = vector.broadcast %21 : vector<1x32xf32> to vector<64x32xf32>
    %23 = arith.addf %20, %22 : vector<64x32xf32>
    %c0_10 = arith.constant 0 : index
    %c0_11 = arith.constant 0 : index
    %c0_12 = arith.constant 0 : index
    %24 = vector.load %arg3[%c0_10, %c0_11, %c0_12] : memref<1x1x32xf32, #tpu.memory_space<vmem>>, vector<1x1x32xf32>
    %25 = vector.shape_cast %24 : vector<1x1x32xf32> to vector<1x32xf32>
    %cst_13 = arith.constant 1.000000e+00 : f32
    %26 = vector.broadcast %cst_13 : f32 to vector<1x32xf32>
    %27 = arith.addf %26, %25 : vector<1x32xf32>
    %28 = vector.broadcast %27 : vector<1x32xf32> to vector<64x32xf32>
    %29 = arith.mulf %23, %28 : vector<64x32xf32>
    %c0_14 = arith.constant 0 : index
    %c0_15 = arith.constant 0 : index
    %c0_16 = arith.constant 0 : index
    %30 = vector.load %arg2[%c0_14, %c0_15, %c0_16] : memref<1x1x32xf32, #tpu.memory_space<vmem>>, vector<1x1x32xf32>
    %31 = vector.shape_cast %30 : vector<1x1x32xf32> to vector<1x32xf32>
    %32 = vector.broadcast %31 : vector<1x32xf32> to vector<64x32xf32>
    %33 = arith.addf %29, %32 : vector<64x32xf32>
    %34 = arith.truncf %33 : vector<64x32xf32> to vector<64x32xbf16>
    %c0_17 = arith.constant 0 : index
    %c0_18 = arith.constant 0 : index
    %35 = vector.load %arg7[%c0_17, %c0_18] : memref<32x128xbf16, #tpu.memory_space<vmem>>, vector<32x128xbf16>
    %cst_19 = arith.constant dense<0.000000e+00> : vector<64x128xf32>
    %36 = tpu.matmul %34, %35, %cst_19 {dimension_numbers = #tpu.dot_dimension_numbers<[1], [0], [0], [1], [0, 0, 1, 1], [], []>} : vector<64x32xbf16>, vector<32x128xbf16>, vector<64x128xf32> -> vector<64x128xf32>
    %37 = vector.extract_strided_slice %36 {offsets = [0, 0], sizes = [64, 64], strides = [1, 1]} : vector<64x128xf32> to vector<64x64xf32>
    %38 = vector.extract_strided_slice %36 {offsets = [0, 64], sizes = [64, 64], strides = [1, 1]} : vector<64x128xf32> to vector<64x64xf32>
    %c3 = arith.constant 3 : index
    %c0_20 = arith.constant 0 : index
    %39 = vector.load %arg8[%c3, %c0_20] : memref<4x64xf32, #tpu.memory_space<vmem>>, vector<1x64xf32>
    %40 = vector.broadcast %39 : vector<1x64xf32> to vector<64x64xf32>
    %41 = arith.mulf %37, %40 : vector<64x64xf32>
    %cst_21 = arith.constant 0.000000e+00 : f32
    %42 = vector.broadcast %cst_21 : f32 to vector<1x64xf32>
    %43 = vector.extract_strided_slice %37 {offsets = [0, 0], sizes = [63, 64], strides = [1, 1]} : vector<64x64xf32> to vector<63x64xf32>
    %44 = tpu.concatenate %42, %43 in 0 : vector<1x64xf32>, vector<63x64xf32> -> vector<64x64xf32>
    %c2 = arith.constant 2 : index
    %c0_22 = arith.constant 0 : index
    %45 = vector.load %arg8[%c2, %c0_22] : memref<4x64xf32, #tpu.memory_space<vmem>>, vector<1x64xf32>
    %46 = vector.broadcast %45 : vector<1x64xf32> to vector<64x64xf32>
    %47 = arith.mulf %44, %46 : vector<64x64xf32>
    %48 = arith.addf %41, %47 : vector<64x64xf32>
    %cst_23 = arith.constant 0.000000e+00 : f32
    %49 = vector.broadcast %cst_23 : f32 to vector<2x64xf32>
    %50 = vector.extract_strided_slice %37 {offsets = [0, 0], sizes = [62, 64], strides = [1, 1]} : vector<64x64xf32> to vector<62x64xf32>
    %51 = tpu.concatenate %49, %50 in 0 : vector<2x64xf32>, vector<62x64xf32> -> vector<64x64xf32>
    %c1 = arith.constant 1 : index
    %c0_24 = arith.constant 0 : index
    %52 = vector.load %arg8[%c1, %c0_24] : memref<4x64xf32, #tpu.memory_space<vmem>>, vector<1x64xf32>
    %53 = vector.broadcast %52 : vector<1x64xf32> to vector<64x64xf32>
    %54 = arith.mulf %51, %53 : vector<64x64xf32>
    %55 = arith.addf %48, %54 : vector<64x64xf32>
    %cst_25 = arith.constant 0.000000e+00 : f32
    %56 = vector.broadcast %cst_25 : f32 to vector<3x64xf32>
    %57 = vector.extract_strided_slice %37 {offsets = [0, 0], sizes = [61, 64], strides = [1, 1]} : vector<64x64xf32> to vector<61x64xf32>
    %58 = tpu.concatenate %56, %57 in 0 : vector<3x64xf32>, vector<61x64xf32> -> vector<64x64xf32>
    %c0_26 = arith.constant 0 : index
    %c0_27 = arith.constant 0 : index
    %59 = vector.load %arg8[%c0_26, %c0_27] : memref<4x64xf32, #tpu.memory_space<vmem>>, vector<1x64xf32>
    %60 = vector.broadcast %59 : vector<1x64xf32> to vector<64x64xf32>
    %61 = arith.mulf %58, %60 : vector<64x64xf32>
    %62 = arith.addf %55, %61 : vector<64x64xf32>
    %c0_28 = arith.constant 0 : index
    %c0_29 = arith.constant 0 : index
    %63 = vector.load %arg9[%c0_28, %c0_29] : memref<1x64xf32, #tpu.memory_space<vmem>>, vector<1x64xf32>
    %64 = vector.broadcast %63 : vector<1x64xf32> to vector<64x64xf32>
    %65 = arith.addf %62, %64 : vector<64x64xf32>
    %cst_30 = arith.constant 5.000000e-01 : f32
    %66 = vector.broadcast %cst_30 : f32 to vector<64x64xf32>
    %67 = arith.mulf %66, %65 : vector<64x64xf32>
    %68 = math.tanh %67 : vector<64x64xf32>
    %cst_31 = arith.constant 1.000000e+00 : f32
    %69 = vector.broadcast %cst_31 : f32 to vector<64x64xf32>
    %70 = arith.addf %68, %69 : vector<64x64xf32>
    %cst_32 = arith.constant 5.000000e-01 : f32
    %71 = vector.broadcast %cst_32 : f32 to vector<64x64xf32>
    %72 = arith.mulf %71, %70 : vector<64x64xf32>
    %73 = arith.mulf %65, %72 : vector<64x64xf32>
    %74 = arith.truncf %73 : vector<64x64xf32> to vector<64x64xbf16>
    %c0_33 = arith.constant 0 : index
    %c0_34 = arith.constant 0 : index
    %75 = vector.load %arg10[%c0_33, %c0_34] : memref<64x128xbf16, #tpu.memory_space<vmem>>, vector<64x128xbf16>
    %cst_35 = arith.constant dense<0.000000e+00> : vector<64x128xf32>
    %76 = tpu.matmul %74, %75, %cst_35 {dimension_numbers = #tpu.dot_dimension_numbers<[1], [0], [0], [1], [0, 0, 1, 1], [], []>} : vector<64x64xbf16>, vector<64x128xbf16>, vector<64x128xf32> -> vector<64x128xf32>
    %77 = vector.extract_strided_slice %76 {offsets = [0, 0], sizes = [64, 64], strides = [1, 1]} : vector<64x128xf32> to vector<64x64xf32>
    %c0_36 = arith.constant 0 : index
    %c0_37 = arith.constant 0 : index
    %78 = vector.load %arg13[%c0_36, %c0_37] : memref<1x64xf32, #tpu.memory_space<vmem>>, vector<1x64xf32>
    %79 = vector.broadcast %78 : vector<1x64xf32> to vector<64x64xf32>
    %80 = arith.addf %77, %79 : vector<64x64xf32>
    %cst_38 = arith.constant 0.000000e+00 : f32
    %81 = vector.broadcast %cst_38 : f32 to vector<64x64xf32>
    %82 = arith.maximumf %80, %81 : vector<64x64xf32>
    %83 = math.absf %80 : vector<64x64xf32>
    %cst_39 = arith.constant 0.000000e+00 : f32
    %84 = vector.broadcast %cst_39 : f32 to vector<64x64xf32>
    %85 = arith.subf %84, %83 : vector<64x64xf32>
    %86 = math.exp %85 : vector<64x64xf32>
    %cst_40 = arith.constant 1.000000e+00 : f32
    %87 = vector.broadcast %cst_40 : f32 to vector<64x64xf32>
    %88 = arith.addf %87, %86 : vector<64x64xf32>
    %89 = math.log %88 : vector<64x64xf32>
    %90 = arith.addf %82, %89 : vector<64x64xf32>
    %91 = vector.extract_strided_slice %76 {offsets = [0, 64], sizes = [64, 8], strides = [1, 1]} : vector<64x128xf32> to vector<64x8xf32>
    %92 = vector.extract_strided_slice %76 {offsets = [0, 72], sizes = [64, 8], strides = [1, 1]} : vector<64x128xf32> to vector<64x8xf32>
    %93 = arith.mulf %90, %73 : vector<64x64xf32>
    %94 = tpu.concatenate %90, %90 in 1 : vector<64x64xf32>, vector<64x64xf32> -> vector<64x128xf32>
    %95 = tpu.concatenate %93, %93 in 1 : vector<64x64xf32>, vector<64x64xf32> -> vector<64x128xf32>
    %c0_41 = arith.constant 0 : index
    %c0_42 = arith.constant 0 : index
    %96 = vector.load %arg11[%c0_41, %c0_42] : memref<4x128xf32, #tpu.memory_space<vmem>>, vector<1x128xf32>
    %97 = vector.broadcast %96 : vector<1x128xf32> to vector<64x128xf32>
    %98 = arith.mulf %94, %97 : vector<64x128xf32>
    %99 = math.exp %98 : vector<64x128xf32>
    %c0_43 = arith.constant 0 : index
    %c0_44 = arith.constant 0 : index
    %c0_45 = arith.constant 0 : index
    %100 = vector.load %arg16[%c0_43, %c0_44, %c0_45] : memref<4x64x128xf32, #tpu.memory_space<vmem>>, vector<1x64x128xf32>
    %101 = vector.shape_cast %100 : vector<1x64x128xf32> to vector<64x128xf32>
    %102 = vector.shape_cast %99 : vector<64x128xf32> to vector<1x64x128xf32>
    tpu.vector_store %arg16[%c0_43, %c0_44, %c0_45], %102 {strides = array<i32>} : memref<4x64x128xf32, #tpu.memory_space<vmem>>, vector<1x64x128xf32>,
    %103 = vector.extract_strided_slice %91 {offsets = [0, 0], sizes = [64, 1], strides = [1, 1]} : vector<64x8xf32> to vector<64x1xf32>
    %104 = vector.shape_cast %103 : vector<64x1xf32> to vector<64x1xf32>
    %105 = vector.broadcast %104 : vector<64x1xf32> to vector<64x64xf32>
    %106 = vector.extract_strided_slice %91 {offsets = [0, 1], sizes = [64, 1], strides = [1, 1]} : vector<64x8xf32> to vector<64x1xf32>
    %107 = vector.shape_cast %106 : vector<64x1xf32> to vector<64x1xf32>
    %108 = vector.broadcast %107 : vector<64x1xf32> to vector<64x64xf32>
    %109 = tpu.concatenate %105, %108 in 1 : vector<64x64xf32>, vector<64x64xf32> -> vector<64x128xf32>
    %110 = arith.mulf %95, %109 : vector<64x128xf32>
    %c0_46 = arith.constant 0 : index
    %c0_47 = arith.constant 0 : index
    %c0_48 = arith.constant 0 : index
    %111 = vector.load %arg17[%c0_46, %c0_47, %c0_48] : memref<4x64x128xf32, #tpu.memory_space<vmem>>, vector<1x64x128xf32>
    %112 = vector.shape_cast %111 : vector<1x64x128xf32> to vector<64x128xf32>
    %113 = vector.shape_cast %110 : vector<64x128xf32> to vector<1x64x128xf32>
    tpu.vector_store %arg17[%c0_46, %c0_47, %c0_48], %113 {strides = array<i32>} : memref<4x64x128xf32, #tpu.memory_space<vmem>>, vector<1x64x128xf32>,
    %c1_49 = arith.constant 1 : index
    %c0_50 = arith.constant 0 : index
    %114 = vector.load %arg11[%c1_49, %c0_50] : memref<4x128xf32, #tpu.memory_space<vmem>>, vector<1x128xf32>
    %115 = vector.broadcast %114 : vector<1x128xf32> to vector<64x128xf32>
    %116 = arith.mulf %94, %115 : vector<64x128xf32>
    %117 = math.exp %116 : vector<64x128xf32>
    %c1_51 = arith.constant 1 : index
    %c0_52 = arith.constant 0 : index
    %c0_53 = arith.constant 0 : index
    %118 = vector.load %arg16[%c1_51, %c0_52, %c0_53] : memref<4x64x128xf32, #tpu.memory_space<vmem>>, vector<1x64x128xf32>
    %119 = vector.shape_cast %118 : vector<1x64x128xf32> to vector<64x128xf32>
    %120 = vector.shape_cast %117 : vector<64x128xf32> to vector<1x64x128xf32>
    tpu.vector_store %arg16[%c1_51, %c0_52, %c0_53], %120 {strides = array<i32>} : memref<4x64x128xf32, #tpu.memory_space<vmem>>, vector<1x64x128xf32>,
    %121 = vector.extract_strided_slice %91 {offsets = [0, 2], sizes = [64, 1], strides = [1, 1]} : vector<64x8xf32> to vector<64x1xf32>
    %122 = vector.shape_cast %121 : vector<64x1xf32> to vector<64x1xf32>
    %123 = vector.broadcast %122 : vector<64x1xf32> to vector<64x64xf32>
    %124 = vector.extract_strided_slice %91 {offsets = [0, 3], sizes = [64, 1], strides = [1, 1]} : vector<64x8xf32> to vector<64x1xf32>
    %125 = vector.shape_cast %124 : vector<64x1xf32> to vector<64x1xf32>
    %126 = vector.broadcast %125 : vector<64x1xf32> to vector<64x64xf32>
    %127 = tpu.concatenate %123, %126 in 1 : vector<64x64xf32>, vector<64x64xf32> -> vector<64x128xf32>
    %128 = arith.mulf %95, %127 : vector<64x128xf32>
    %c1_54 = arith.constant 1 : index
    %c0_55 = arith.constant 0 : index
    %c0_56 = arith.constant 0 : index
    %129 = vector.load %arg17[%c1_54, %c0_55, %c0_56] : memref<4x64x128xf32, #tpu.memory_space<vmem>>, vector<1x64x128xf32>
    %130 = vector.shape_cast %129 : vector<1x64x128xf32> to vector<64x128xf32>
    %131 = vector.shape_cast %128 : vector<64x128xf32> to vector<1x64x128xf32>
    tpu.vector_store %arg17[%c1_54, %c0_55, %c0_56], %131 {strides = array<i32>} : memref<4x64x128xf32, #tpu.memory_space<vmem>>, vector<1x64x128xf32>,
    %c2_57 = arith.constant 2 : index
    %c0_58 = arith.constant 0 : index
    %132 = vector.load %arg11[%c2_57, %c0_58] : memref<4x128xf32, #tpu.memory_space<vmem>>, vector<1x128xf32>
    %133 = vector.broadcast %132 : vector<1x128xf32> to vector<64x128xf32>
    %134 = arith.mulf %94, %133 : vector<64x128xf32>
    %135 = math.exp %134 : vector<64x128xf32>
    %c2_59 = arith.constant 2 : index
    %c0_60 = arith.constant 0 : index
    %c0_61 = arith.constant 0 : index
    %136 = vector.load %arg16[%c2_59, %c0_60, %c0_61] : memref<4x64x128xf32, #tpu.memory_space<vmem>>, vector<1x64x128xf32>
    %137 = vector.shape_cast %136 : vector<1x64x128xf32> to vector<64x128xf32>
    %138 = vector.shape_cast %135 : vector<64x128xf32> to vector<1x64x128xf32>
    tpu.vector_store %arg16[%c2_59, %c0_60, %c0_61], %138 {strides = array<i32>} : memref<4x64x128xf32, #tpu.memory_space<vmem>>, vector<1x64x128xf32>,
    %139 = vector.extract_strided_slice %91 {offsets = [0, 4], sizes = [64, 1], strides = [1, 1]} : vector<64x8xf32> to vector<64x1xf32>
    %140 = vector.shape_cast %139 : vector<64x1xf32> to vector<64x1xf32>
    %141 = vector.broadcast %140 : vector<64x1xf32> to vector<64x64xf32>
    %142 = vector.extract_strided_slice %91 {offsets = [0, 5], sizes = [64, 1], strides = [1, 1]} : vector<64x8xf32> to vector<64x1xf32>
    %143 = vector.shape_cast %142 : vector<64x1xf32> to vector<64x1xf32>
    %144 = vector.broadcast %143 : vector<64x1xf32> to vector<64x64xf32>
    %145 = tpu.concatenate %141, %144 in 1 : vector<64x64xf32>, vector<64x64xf32> -> vector<64x128xf32>
    %146 = arith.mulf %95, %145 : vector<64x128xf32>
    %c2_62 = arith.constant 2 : index
    %c0_63 = arith.constant 0 : index
    %c0_64 = arith.constant 0 : index
    %147 = vector.load %arg17[%c2_62, %c0_63, %c0_64] : memref<4x64x128xf32, #tpu.memory_space<vmem>>, vector<1x64x128xf32>
    %148 = vector.shape_cast %147 : vector<1x64x128xf32> to vector<64x128xf32>
    %149 = vector.shape_cast %146 : vector<64x128xf32> to vector<1x64x128xf32>
    tpu.vector_store %arg17[%c2_62, %c0_63, %c0_64], %149 {strides = array<i32>} : memref<4x64x128xf32, #tpu.memory_space<vmem>>, vector<1x64x128xf32>,
    %c3_65 = arith.constant 3 : index
    %c0_66 = arith.constant 0 : index
    %150 = vector.load %arg11[%c3_65, %c0_66] : memref<4x128xf32, #tpu.memory_space<vmem>>, vector<1x128xf32>
    %151 = vector.broadcast %150 : vector<1x128xf32> to vector<64x128xf32>
    %152 = arith.mulf %94, %151 : vector<64x128xf32>
    %153 = math.exp %152 : vector<64x128xf32>
    %c3_67 = arith.constant 3 : index
    %c0_68 = arith.constant 0 : index
    %c0_69 = arith.constant 0 : index
    %154 = vector.load %arg16[%c3_67, %c0_68, %c0_69] : memref<4x64x128xf32, #tpu.memory_space<vmem>>, vector<1x64x128xf32>
    %155 = vector.shape_cast %154 : vector<1x64x128xf32> to vector<64x128xf32>
    %156 = vector.shape_cast %153 : vector<64x128xf32> to vector<1x64x128xf32>
    tpu.vector_store %arg16[%c3_67, %c0_68, %c0_69], %156 {strides = array<i32>} : memref<4x64x128xf32, #tpu.memory_space<vmem>>, vector<1x64x128xf32>,
    %157 = vector.extract_strided_slice %91 {offsets = [0, 6], sizes = [64, 1], strides = [1, 1]} : vector<64x8xf32> to vector<64x1xf32>
    %158 = vector.shape_cast %157 : vector<64x1xf32> to vector<64x1xf32>
    %159 = vector.broadcast %158 : vector<64x1xf32> to vector<64x64xf32>
    %160 = vector.extract_strided_slice %91 {offsets = [0, 7], sizes = [64, 1], strides = [1, 1]} : vector<64x8xf32> to vector<64x1xf32>
    %161 = vector.shape_cast %160 : vector<64x1xf32> to vector<64x1xf32>
    %162 = vector.broadcast %161 : vector<64x1xf32> to vector<64x64xf32>
    %163 = tpu.concatenate %159, %162 in 1 : vector<64x64xf32>, vector<64x64xf32> -> vector<64x128xf32>
    %164 = arith.mulf %95, %163 : vector<64x128xf32>
    %c3_70 = arith.constant 3 : index
    %c0_71 = arith.constant 0 : index
    %c0_72 = arith.constant 0 : index
    %165 = vector.load %arg17[%c3_70, %c0_71, %c0_72] : memref<4x64x128xf32, #tpu.memory_space<vmem>>, vector<1x64x128xf32>
    %166 = vector.shape_cast %165 : vector<1x64x128xf32> to vector<64x128xf32>
    %167 = vector.shape_cast %164 : vector<64x128xf32> to vector<1x64x128xf32>
    tpu.vector_store %arg17[%c3_70, %c0_71, %c0_72], %167 {strides = array<i32>} : memref<4x64x128xf32, #tpu.memory_space<vmem>>, vector<1x64x128xf32>,
    %c0_73 = arith.constant 0 : index
    %c0_74 = arith.constant 0 : index
    %168 = vector.load %arg19[%c0_73, %c0_74] : memref<64x8xf32, #tpu.memory_space<vmem>>, vector<64x8xf32>
    tpu.vector_store %arg19[%c0_73, %c0_74], %92 {strides = array<i32>} : memref<64x8xf32, #tpu.memory_space<vmem>>, vector<64x8xf32>,
    %cst_75 = arith.constant 0.000000e+00 : f32
    %169 = vector.broadcast %cst_75 : f32 to vector<1x128xf32>
    %cst_76 = arith.constant 0.000000e+00 : f32
    %170 = vector.broadcast %cst_76 : f32 to vector<1x128xf32>
    %cst_77 = arith.constant 0.000000e+00 : f32
    %171 = vector.broadcast %cst_77 : f32 to vector<1x128xf32>
    %cst_78 = arith.constant 0.000000e+00 : f32
    %172 = vector.broadcast %cst_78 : f32 to vector<1x128xf32>
    %c0_i32 = arith.constant 0 : i32
    %c8_i32 = arith.constant 8 : i32
    %173 = arith.addi %c0_i32, %c8_i32 : i32
    %c1_i32 = arith.constant 1 : i32
    %174:4 = scf.for %arg20 = %c0_i32 to %173 step %c1_i32 iter_args(%arg21 = %169, %arg22 = %170, %arg23 = %171, %arg24 = %172) -> (vector<1x128xf32>, vector<1x128xf32>, vector<1x128xf32>, vector<1x128xf32>)  : i32 {
      %c8_i32_96 = arith.constant 8 : i32
      %203 = arith.muli %arg20, %c8_i32_96 : i32
      %204 = tpu.assume_multiple %203, 8 : i32
      %205 = arith.index_cast %204 : i32 to index
      %c0_97 = arith.constant 0 : index
      %206 = vector.load %arg19[%205, %c0_97] : memref<64x8xf32, #tpu.memory_space<vmem>>, vector<8x8xf32>
      %c0_98 = arith.constant 0 : index
      %207 = arith.index_cast %204 : i32 to index
      %c0_99 = arith.constant 0 : index
      %208 = vector.load %arg16[%c0_98, %207, %c0_99] : memref<4x64x128xf32, #tpu.memory_space<vmem>>, vector<1x8x128xf32>
      %209 = vector.shape_cast %208 : vector<1x8x128xf32> to vector<8x128xf32>
      %c1_100 = arith.constant 1 : index
      %210 = arith.index_cast %204 : i32 to index
      %c0_101 = arith.constant 0 : index
      %211 = vector.load %arg16[%c1_100, %210, %c0_101] : memref<4x64x128xf32, #tpu.memory_space<vmem>>, vector<1x8x128xf32>
      %212 = vector.shape_cast %211 : vector<1x8x128xf32> to vector<8x128xf32>
      %c2_102 = arith.constant 2 : index
      %213 = arith.index_cast %204 : i32 to index
      %c0_103 = arith.constant 0 : index
      %214 = vector.load %arg16[%c2_102, %213, %c0_103] : memref<4x64x128xf32, #tpu.memory_space<vmem>>, vector<1x8x128xf32>
      %215 = vector.shape_cast %214 : vector<1x8x128xf32> to vector<8x128xf32>
      %c3_104 = arith.constant 3 : index
      %216 = arith.index_cast %204 : i32 to index
      %c0_105 = arith.constant 0 : index
      %217 = vector.load %arg16[%c3_104, %216, %c0_105] : memref<4x64x128xf32, #tpu.memory_space<vmem>>, vector<1x8x128xf32>
      %218 = vector.shape_cast %217 : vector<1x8x128xf32> to vector<8x128xf32>
      %c0_106 = arith.constant 0 : index
      %219 = arith.index_cast %204 : i32 to index
      %c0_107 = arith.constant 0 : index
      %220 = vector.load %arg17[%c0_106, %219, %c0_107] : memref<4x64x128xf32, #tpu.memory_space<vmem>>, vector<1x8x128xf32>
      %221 = vector.shape_cast %220 : vector<1x8x128xf32> to vector<8x128xf32>
      %c1_108 = arith.constant 1 : index
      %222 = arith.index_cast %204 : i32 to index
      %c0_109 = arith.constant 0 : index
      %223 = vector.load %arg17[%c1_108, %222, %c0_109] : memref<4x64x128xf32, #tpu.memory_space<vmem>>, vector<1x8x128xf32>
      %224 = vector.shape_cast %223 : vector<1x8x128xf32> to vector<8x128xf32>
      %c2_110 = arith.constant 2 : index
      %225 = arith.index_cast %204 : i32 to index
      %c0_111 = arith.constant 0 : index
      %226 = vector.load %arg17[%c2_110, %225, %c0_111] : memref<4x64x128xf32, #tpu.memory_space<vmem>>, vector<1x8x128xf32>
      %227 = vector.shape_cast %226 : vector<1x8x128xf32> to vector<8x128xf32>
      %c3_112 = arith.constant 3 : index
      %228 = arith.index_cast %204 : i32 to index
      %c0_113 = arith.constant 0 : index
      %229 = vector.load %arg17[%c3_112, %228, %c0_113] : memref<4x64x128xf32, #tpu.memory_space<vmem>>, vector<1x8x128xf32>
      %230 = vector.shape_cast %229 : vector<1x8x128xf32> to vector<8x128xf32>
      %231 = vector.extract_strided_slice %206 {offsets = [0, 0], sizes = [8, 1], strides = [1, 1]} : vector<8x8xf32> to vector<8x1xf32>
      %232 = vector.shape_cast %231 : vector<8x1xf32> to vector<8x1xf32>
      %233 = vector.broadcast %232 : vector<8x1xf32> to vector<8x64xf32>
      %234 = vector.extract_strided_slice %206 {offsets = [0, 1], sizes = [8, 1], strides = [1, 1]} : vector<8x8xf32> to vector<8x1xf32>
      %235 = vector.shape_cast %234 : vector<8x1xf32> to vector<8x1xf32>
      %236 = vector.broadcast %235 : vector<8x1xf32> to vector<8x64xf32>
      %237 = tpu.concatenate %233, %236 in 1 : vector<8x64xf32>, vector<8x64xf32> -> vector<8x128xf32>
      %238 = vector.extract_strided_slice %206 {offsets = [0, 2], sizes = [8, 1], strides = [1, 1]} : vector<8x8xf32> to vector<8x1xf32>
      %239 = vector.shape_cast %238 : vector<8x1xf32> to vector<8x1xf32>
      %240 = vector.broadcast %239 : vector<8x1xf32> to vector<8x64xf32>
      %241 = vector.extract_strided_slice %206 {offsets = [0, 3], sizes = [8, 1], strides = [1, 1]} : vector<8x8xf32> to vector<8x1xf32>
      %242 = vector.shape_cast %241 : vector<8x1xf32> to vector<8x1xf32>
      %243 = vector.broadcast %242 : vector<8x1xf32> to vector<8x64xf32>
      %244 = tpu.concatenate %240, %243 in 1 : vector<8x64xf32>, vector<8x64xf32> -> vector<8x128xf32>
      %245 = vector.extract_strided_slice %206 {offsets = [0, 4], sizes = [8, 1], strides = [1, 1]} : vector<8x8xf32> to vector<8x1xf32>
      %246 = vector.shape_cast %245 : vector<8x1xf32> to vector<8x1xf32>
      %247 = vector.broadcast %246 : vector<8x1xf32> to vector<8x64xf32>
      %248 = vector.extract_strided_slice %206 {offsets = [0, 5], sizes = [8, 1], strides = [1, 1]} : vector<8x8xf32> to vector<8x1xf32>
      %249 = vector.shape_cast %248 : vector<8x1xf32> to vector<8x1xf32>
      %250 = vector.broadcast %249 : vector<8x1xf32> to vector<8x64xf32>
      %251 = tpu.concatenate %247, %250 in 1 : vector<8x64xf32>, vector<8x64xf32> -> vector<8x128xf32>
      %252 = vector.extract_strided_slice %206 {offsets = [0, 6], sizes = [8, 1], strides = [1, 1]} : vector<8x8xf32> to vector<8x1xf32>
      %253 = vector.shape_cast %252 : vector<8x1xf32> to vector<8x1xf32>
      %254 = vector.broadcast %253 : vector<8x1xf32> to vector<8x64xf32>
      %255 = vector.extract_strided_slice %206 {offsets = [0, 7], sizes = [8, 1], strides = [1, 1]} : vector<8x8xf32> to vector<8x1xf32>
      %256 = vector.shape_cast %255 : vector<8x1xf32> to vector<8x1xf32>
      %257 = vector.broadcast %256 : vector<8x1xf32> to vector<8x64xf32>
      %258 = tpu.concatenate %254, %257 in 1 : vector<8x64xf32>, vector<8x64xf32> -> vector<8x128xf32>
      %259 = vector.extract_strided_slice %209 {offsets = [0, 0], sizes = [1, 128], strides = [1, 1]} : vector<8x128xf32> to vector<1x128xf32>
      %260 = arith.mulf %259, %arg21 : vector<1x128xf32>
      %261 = vector.extract_strided_slice %221 {offsets = [0, 0], sizes = [1, 128], strides = [1, 1]} : vector<8x128xf32> to vector<1x128xf32>
      %262 = arith.addf %260, %261 : vector<1x128xf32>
      %263 = vector.extract_strided_slice %237 {offsets = [0, 0], sizes = [1, 128], strides = [1, 1]} : vector<8x128xf32> to vector<1x128xf32>
      %264 = arith.mulf %262, %263 : vector<1x128xf32>
      %265 = vector.extract_strided_slice %212 {offsets = [0, 0], sizes = [1, 128], strides = [1, 1]} : vector<8x128xf32> to vector<1x128xf32>
      %266 = arith.mulf %265, %arg22 : vector<1x128xf32>
      %267 = vector.extract_strided_slice %224 {offsets = [0, 0], sizes = [1, 128], strides = [1, 1]} : vector<8x128xf32> to vector<1x128xf32>
      %268 = arith.addf %266, %267 : vector<1x128xf32>
      %269 = vector.extract_strided_slice %244 {offsets = [0, 0], sizes = [1, 128], strides = [1, 1]} : vector<8x128xf32> to vector<1x128xf32>
      %270 = arith.mulf %268, %269 : vector<1x128xf32>
      %271 = arith.addf %264, %270 : vector<1x128xf32>
      %272 = vector.extract_strided_slice %215 {offsets = [0, 0], sizes = [1, 128], strides = [1, 1]} : vector<8x128xf32> to vector<1x128xf32>
      %273 = arith.mulf %272, %arg23 : vector<1x128xf32>
      %274 = vector.extract_strided_slice %227 {offsets = [0, 0], sizes = [1, 128], strides = [1, 1]} : vector<8x128xf32> to vector<1x128xf32>
      %275 = arith.addf %273, %274 : vector<1x128xf32>
      %276 = vector.extract_strided_slice %251 {offsets = [0, 0], sizes = [1, 128], strides = [1, 1]} : vector<8x128xf32> to vector<1x128xf32>
      %277 = arith.mulf %275, %276 : vector<1x128xf32>
      %278 = arith.addf %271, %277 : vector<1x128xf32>
      %279 = vector.extract_strided_slice %218 {offsets = [0, 0], sizes = [1, 128], strides = [1, 1]} : vector<8x128xf32> to vector<1x128xf32>
      %280 = arith.mulf %279, %arg24 : vector<1x128xf32>
      %281 = vector.extract_strided_slice %230 {offsets = [0, 0], sizes = [1, 128], strides = [1, 1]} : vector<8x128xf32> to vector<1x128xf32>
      %282 = arith.addf %280, %281 : vector<1x128xf32>
      %283 = vector.extract_strided_slice %258 {offsets = [0, 0], sizes = [1, 128], strides = [1, 1]} : vector<8x128xf32> to vector<1x128xf32>
      %284 = arith.mulf %282, %283 : vector<1x128xf32>
      %285 = arith.addf %278, %284 : vector<1x128xf32>
      %286 = vector.extract_strided_slice %209 {offsets = [1, 0], sizes = [1, 128], strides = [1, 1]} : vector<8x128xf32> to vector<1x128xf32>
      %287 = arith.mulf %286, %262 : vector<1x128xf32>
      %288 = vector.extract_strided_slice %221 {offsets = [1, 0], sizes = [1, 128], strides = [1, 1]} : vector<8x128xf32> to vector<1x128xf32>
      %289 = arith.addf %287, %288 : vector<1x128xf32>
      %290 = vector.extract_strided_slice %237 {offsets = [1, 0], sizes = [1, 128], strides = [1, 1]} : vector<8x128xf32> to vector<1x128xf32>
      %291 = arith.mulf %289, %290 : vector<1x128xf32>
      %292 = vector.extract_strided_slice %212 {offsets = [1, 0], sizes = [1, 128], strides = [1, 1]} : vector<8x128xf32> to vector<1x128xf32>
      %293 = arith.mulf %292, %268 : vector<1x128xf32>
      %294 = vector.extract_strided_slice %224 {offsets = [1, 0], sizes = [1, 128], strides = [1, 1]} : vector<8x128xf32> to vector<1x128xf32>
      %295 = arith.addf %293, %294 : vector<1x128xf32>
      %296 = vector.extract_strided_slice %244 {offsets = [1, 0], sizes = [1, 128], strides = [1, 1]} : vector<8x128xf32> to vector<1x128xf32>
      %297 = arith.mulf %295, %296 : vector<1x128xf32>
      %298 = arith.addf %291, %297 : vector<1x128xf32>
      %299 = vector.extract_strided_slice %215 {offsets = [1, 0], sizes = [1, 128], strides = [1, 1]} : vector<8x128xf32> to vector<1x128xf32>
      %300 = arith.mulf %299, %275 : vector<1x128xf32>
      %301 = vector.extract_strided_slice %227 {offsets = [1, 0], sizes = [1, 128], strides = [1, 1]} : vector<8x128xf32> to vector<1x128xf32>
      %302 = arith.addf %300, %301 : vector<1x128xf32>
      %303 = vector.extract_strided_slice %251 {offsets = [1, 0], sizes = [1, 128], strides = [1, 1]} : vector<8x128xf32> to vector<1x128xf32>
      %304 = arith.mulf %302, %303 : vector<1x128xf32>
      %305 = arith.addf %298, %304 : vector<1x128xf32>
      %306 = vector.extract_strided_slice %218 {offsets = [1, 0], sizes = [1, 128], strides = [1, 1]} : vector<8x128xf32> to vector<1x128xf32>
      %307 = arith.mulf %306, %282 : vector<1x128xf32>
      %308 = vector.extract_strided_slice %230 {offsets = [1, 0], sizes = [1, 128], strides = [1, 1]} : vector<8x128xf32> to vector<1x128xf32>
      %309 = arith.addf %307, %308 : vector<1x128xf32>
      %310 = vector.extract_strided_slice %258 {offsets = [1, 0], sizes = [1, 128], strides = [1, 1]} : vector<8x128xf32> to vector<1x128xf32>
      %311 = arith.mulf %309, %310 : vector<1x128xf32>
      %312 = arith.addf %305, %311 : vector<1x128xf32>
      %313 = vector.extract_strided_slice %209 {offsets = [2, 0], sizes = [1, 128], strides = [1, 1]} : vector<8x128xf32> to vector<1x128xf32>
      %314 = arith.mulf %313, %289 : vector<1x128xf32>
      %315 = vector.extract_strided_slice %221 {offsets = [2, 0], sizes = [1, 128], strides = [1, 1]} : vector<8x128xf32> to vector<1x128xf32>
      %316 = arith.addf %314, %315 : vector<1x128xf32>
      %317 = vector.extract_strided_slice %237 {offsets = [2, 0], sizes = [1, 128], strides = [1, 1]} : vector<8x128xf32> to vector<1x128xf32>
      %318 = arith.mulf %316, %317 : vector<1x128xf32>
      %319 = vector.extract_strided_slice %212 {offsets = [2, 0], sizes = [1, 128], strides = [1, 1]} : vector<8x128xf32> to vector<1x128xf32>
      %320 = arith.mulf %319, %295 : vector<1x128xf32>
      %321 = vector.extract_strided_slice %224 {offsets = [2, 0], sizes = [1, 128], strides = [1, 1]} : vector<8x128xf32> to vector<1x128xf32>
      %322 = arith.addf %320, %321 : vector<1x128xf32>
      %323 = vector.extract_strided_slice %244 {offsets = [2, 0], sizes = [1, 128], strides = [1, 1]} : vector<8x128xf32> to vector<1x128xf32>
      %324 = arith.mulf %322, %323 : vector<1x128xf32>
      %325 = arith.addf %318, %324 : vector<1x128xf32>
      %326 = vector.extract_strided_slice %215 {offsets = [2, 0], sizes = [1, 128], strides = [1, 1]} : vector<8x128xf32> to vector<1x128xf32>
      %327 = arith.mulf %326, %302 : vector<1x128xf32>
      %328 = vector.extract_strided_slice %227 {offsets = [2, 0], sizes = [1, 128], strides = [1, 1]} : vector<8x128xf32> to vector<1x128xf32>
      %329 = arith.addf %327, %328 : vector<1x128xf32>
      %330 = vector.extract_strided_slice %251 {offsets = [2, 0], sizes = [1, 128], strides = [1, 1]} : vector<8x128xf32> to vector<1x128xf32>
      %331 = arith.mulf %329, %330 : vector<1x128xf32>
      %332 = arith.addf %325, %331 : vector<1x128xf32>
      %333 = vector.extract_strided_slice %218 {offsets = [2, 0], sizes = [1, 128], strides = [1, 1]} : vector<8x128xf32> to vector<1x128xf32>
      %334 = arith.mulf %333, %309 : vector<1x128xf32>
      %335 = vector.extract_strided_slice %230 {offsets = [2, 0], sizes = [1, 128], strides = [1, 1]} : vector<8x128xf32> to vector<1x128xf32>
      %336 = arith.addf %334, %335 : vector<1x128xf32>
      %337 = vector.extract_strided_slice %258 {offsets = [2, 0], sizes = [1, 128], strides = [1, 1]} : vector<8x128xf32> to vector<1x128xf32>
      %338 = arith.mulf %336, %337 : vector<1x128xf32>
      %339 = arith.addf %332, %338 : vector<1x128xf32>
      %340 = vector.extract_strided_slice %209 {offsets = [3, 0], sizes = [1, 128], strides = [1, 1]} : vector<8x128xf32> to vector<1x128xf32>
      %341 = arith.mulf %340, %316 : vector<1x128xf32>
      %342 = vector.extract_strided_slice %221 {offsets = [3, 0], sizes = [1, 128], strides = [1, 1]} : vector<8x128xf32> to vector<1x128xf32>
      %343 = arith.addf %341, %342 : vector<1x128xf32>
      %344 = vector.extract_strided_slice %237 {offsets = [3, 0], sizes = [1, 128], strides = [1, 1]} : vector<8x128xf32> to vector<1x128xf32>
      %345 = arith.mulf %343, %344 : vector<1x128xf32>
      %346 = vector.extract_strided_slice %212 {offsets = [3, 0], sizes = [1, 128], strides = [1, 1]} : vector<8x128xf32> to vector<1x128xf32>
      %347 = arith.mulf %346, %322 : vector<1x128xf32>
      %348 = vector.extract_strided_slice %224 {offsets = [3, 0], sizes = [1, 128], strides = [1, 1]} : vector<8x128xf32> to vector<1x128xf32>
      %349 = arith.addf %347, %348 : vector<1x128xf32>
      %350 = vector.extract_strided_slice %244 {offsets = [3, 0], sizes = [1, 128], strides = [1, 1]} : vector<8x128xf32> to vector<1x128xf32>
      %351 = arith.mulf %349, %350 : vector<1x128xf32>
      %352 = arith.addf %345, %351 : vector<1x128xf32>
      %353 = vector.extract_strided_slice %215 {offsets = [3, 0], sizes = [1, 128], strides = [1, 1]} : vector<8x128xf32> to vector<1x128xf32>
      %354 = arith.mulf %353, %329 : vector<1x128xf32>
      %355 = vector.extract_strided_slice %227 {offsets = [3, 0], sizes = [1, 128], strides = [1, 1]} : vector<8x128xf32> to vector<1x128xf32>
      %356 = arith.addf %354, %355 : vector<1x128xf32>
      %357 = vector.extract_strided_slice %251 {offsets = [3, 0], sizes = [1, 128], strides = [1, 1]} : vector<8x128xf32> to vector<1x128xf32>
      %358 = arith.mulf %356, %357 : vector<1x128xf32>
      %359 = arith.addf %352, %358 : vector<1x128xf32>
      %360 = vector.extract_strided_slice %218 {offsets = [3, 0], sizes = [1, 128], strides = [1, 1]} : vector<8x128xf32> to vector<1x128xf32>
      %361 = arith.mulf %360, %336 : vector<1x128xf32>
      %362 = vector.extract_strided_slice %230 {offsets = [3, 0], sizes = [1, 128], strides = [1, 1]} : vector<8x128xf32> to vector<1x128xf32>
      %363 = arith.addf %361, %362 : vector<1x128xf32>
      %364 = vector.extract_strided_slice %258 {offsets = [3, 0], sizes = [1, 128], strides = [1, 1]} : vector<8x128xf32> to vector<1x128xf32>
      %365 = arith.mulf %363, %364 : vector<1x128xf32>
      %366 = arith.addf %359, %365 : vector<1x128xf32>
      %367 = vector.extract_strided_slice %209 {offsets = [4, 0], sizes = [1, 128], strides = [1, 1]} : vector<8x128xf32> to vector<1x128xf32>
      %368 = arith.mulf %367, %343 : vector<1x128xf32>
      %369 = vector.extract_strided_slice %221 {offsets = [4, 0], sizes = [1, 128], strides = [1, 1]} : vector<8x128xf32> to vector<1x128xf32>
      %370 = arith.addf %368, %369 : vector<1x128xf32>
      %371 = vector.extract_strided_slice %237 {offsets = [4, 0], sizes = [1, 128], strides = [1, 1]} : vector<8x128xf32> to vector<1x128xf32>
      %372 = arith.mulf %370, %371 : vector<1x128xf32>
      %373 = vector.extract_strided_slice %212 {offsets = [4, 0], sizes = [1, 128], strides = [1, 1]} : vector<8x128xf32> to vector<1x128xf32>
      %374 = arith.mulf %373, %349 : vector<1x128xf32>
      %375 = vector.extract_strided_slice %224 {offsets = [4, 0], sizes = [1, 128], strides = [1, 1]} : vector<8x128xf32> to vector<1x128xf32>
      %376 = arith.addf %374, %375 : vector<1x128xf32>
      %377 = vector.extract_strided_slice %244 {offsets = [4, 0], sizes = [1, 128], strides = [1, 1]} : vector<8x128xf32> to vector<1x128xf32>
      %378 = arith.mulf %376, %377 : vector<1x128xf32>
      %379 = arith.addf %372, %378 : vector<1x128xf32>
      %380 = vector.extract_strided_slice %215 {offsets = [4, 0], sizes = [1, 128], strides = [1, 1]} : vector<8x128xf32> to vector<1x128xf32>
      %381 = arith.mulf %380, %356 : vector<1x128xf32>
      %382 = vector.extract_strided_slice %227 {offsets = [4, 0], sizes = [1, 128], strides = [1, 1]} : vector<8x128xf32> to vector<1x128xf32>
      %383 = arith.addf %381, %382 : vector<1x128xf32>
      %384 = vector.extract_strided_slice %251 {offsets = [4, 0], sizes = [1, 128], strides = [1, 1]} : vector<8x128xf32> to vector<1x128xf32>
      %385 = arith.mulf %383, %384 : vector<1x128xf32>
      %386 = arith.addf %379, %385 : vector<1x128xf32>
      %387 = vector.extract_strided_slice %218 {offsets = [4, 0], sizes = [1, 128], strides = [1, 1]} : vector<8x128xf32> to vector<1x128xf32>
      %388 = arith.mulf %387, %363 : vector<1x128xf32>
      %389 = vector.extract_strided_slice %230 {offsets = [4, 0], sizes = [1, 128], strides = [1, 1]} : vector<8x128xf32> to vector<1x128xf32>
      %390 = arith.addf %388, %389 : vector<1x128xf32>
      %391 = vector.extract_strided_slice %258 {offsets = [4, 0], sizes = [1, 128], strides = [1, 1]} : vector<8x128xf32> to vector<1x128xf32>
      %392 = arith.mulf %390, %391 : vector<1x128xf32>
      %393 = arith.addf %386, %392 : vector<1x128xf32>
      %394 = vector.extract_strided_slice %209 {offsets = [5, 0], sizes = [1, 128], strides = [1, 1]} : vector<8x128xf32> to vector<1x128xf32>
      %395 = arith.mulf %394, %370 : vector<1x128xf32>
      %396 = vector.extract_strided_slice %221 {offsets = [5, 0], sizes = [1, 128], strides = [1, 1]} : vector<8x128xf32> to vector<1x128xf32>
      %397 = arith.addf %395, %396 : vector<1x128xf32>
      %398 = vector.extract_strided_slice %237 {offsets = [5, 0], sizes = [1, 128], strides = [1, 1]} : vector<8x128xf32> to vector<1x128xf32>
      %399 = arith.mulf %397, %398 : vector<1x128xf32>
      %400 = vector.extract_strided_slice %212 {offsets = [5, 0], sizes = [1, 128], strides = [1, 1]} : vector<8x128xf32> to vector<1x128xf32>
      %401 = arith.mulf %400, %376 : vector<1x128xf32>
      %402 = vector.extract_strided_slice %224 {offsets = [5, 0], sizes = [1, 128], strides = [1, 1]} : vector<8x128xf32> to vector<1x128xf32>
      %403 = arith.addf %401, %402 : vector<1x128xf32>
      %404 = vector.extract_strided_slice %244 {offsets = [5, 0], sizes = [1, 128], strides = [1, 1]} : vector<8x128xf32> to vector<1x128xf32>
      %405 = arith.mulf %403, %404 : vector<1x128xf32>
      %406 = arith.addf %399, %405 : vector<1x128xf32>
      %407 = vector.extract_strided_slice %215 {offsets = [5, 0], sizes = [1, 128], strides = [1, 1]} : vector<8x128xf32> to vector<1x128xf32>
      %408 = arith.mulf %407, %383 : vector<1x128xf32>
      %409 = vector.extract_strided_slice %227 {offsets = [5, 0], sizes = [1, 128], strides = [1, 1]} : vector<8x128xf32> to vector<1x128xf32>
      %410 = arith.addf %408, %409 : vector<1x128xf32>
      %411 = vector.extract_strided_slice %251 {offsets = [5, 0], sizes = [1, 128], strides = [1, 1]} : vector<8x128xf32> to vector<1x128xf32>
      %412 = arith.mulf %410, %411 : vector<1x128xf32>
      %413 = arith.addf %406, %412 : vector<1x128xf32>
      %414 = vector.extract_strided_slice %218 {offsets = [5, 0], sizes = [1, 128], strides = [1, 1]} : vector<8x128xf32> to vector<1x128xf32>
      %415 = arith.mulf %414, %390 : vector<1x128xf32>
      %416 = vector.extract_strided_slice %230 {offsets = [5, 0], sizes = [1, 128], strides = [1, 1]} : vector<8x128xf32> to vector<1x128xf32>
      %417 = arith.addf %415, %416 : vector<1x128xf32>
      %418 = vector.extract_strided_slice %258 {offsets = [5, 0], sizes = [1, 128], strides = [1, 1]} : vector<8x128xf32> to vector<1x128xf32>
      %419 = arith.mulf %417, %418 : vector<1x128xf32>
      %420 = arith.addf %413, %419 : vector<1x128xf32>
      %421 = vector.extract_strided_slice %209 {offsets = [6, 0], sizes = [1, 128], strides = [1, 1]} : vector<8x128xf32> to vector<1x128xf32>
      %422 = arith.mulf %421, %397 : vector<1x128xf32>
      %423 = vector.extract_strided_slice %221 {offsets = [6, 0], sizes = [1, 128], strides = [1, 1]} : vector<8x128xf32> to vector<1x128xf32>
      %424 = arith.addf %422, %423 : vector<1x128xf32>
      %425 = vector.extract_strided_slice %237 {offsets = [6, 0], sizes = [1, 128], strides = [1, 1]} : vector<8x128xf32> to vector<1x128xf32>
      %426 = arith.mulf %424, %425 : vector<1x128xf32>
      %427 = vector.extract_strided_slice %212 {offsets = [6, 0], sizes = [1, 128], strides = [1, 1]} : vector<8x128xf32> to vector<1x128xf32>
      %428 = arith.mulf %427, %403 : vector<1x128xf32>
      %429 = vector.extract_strided_slice %224 {offsets = [6, 0], sizes = [1, 128], strides = [1, 1]} : vector<8x128xf32> to vector<1x128xf32>
      %430 = arith.addf %428, %429 : vector<1x128xf32>
      %431 = vector.extract_strided_slice %244 {offsets = [6, 0], sizes = [1, 128], strides = [1, 1]} : vector<8x128xf32> to vector<1x128xf32>
      %432 = arith.mulf %430, %431 : vector<1x128xf32>
      %433 = arith.addf %426, %432 : vector<1x128xf32>
      %434 = vector.extract_strided_slice %215 {offsets = [6, 0], sizes = [1, 128], strides = [1, 1]} : vector<8x128xf32> to vector<1x128xf32>
      %435 = arith.mulf %434, %410 : vector<1x128xf32>
      %436 = vector.extract_strided_slice %227 {offsets = [6, 0], sizes = [1, 128], strides = [1, 1]} : vector<8x128xf32> to vector<1x128xf32>
      %437 = arith.addf %435, %436 : vector<1x128xf32>
      %438 = vector.extract_strided_slice %251 {offsets = [6, 0], sizes = [1, 128], strides = [1, 1]} : vector<8x128xf32> to vector<1x128xf32>
      %439 = arith.mulf %437, %438 : vector<1x128xf32>
      %440 = arith.addf %433, %439 : vector<1x128xf32>
      %441 = vector.extract_strided_slice %218 {offsets = [6, 0], sizes = [1, 128], strides = [1, 1]} : vector<8x128xf32> to vector<1x128xf32>
      %442 = arith.mulf %441, %417 : vector<1x128xf32>
      %443 = vector.extract_strided_slice %230 {offsets = [6, 0], sizes = [1, 128], strides = [1, 1]} : vector<8x128xf32> to vector<1x128xf32>
      %444 = arith.addf %442, %443 : vector<1x128xf32>
      %445 = vector.extract_strided_slice %258 {offsets = [6, 0], sizes = [1, 128], strides = [1, 1]} : vector<8x128xf32> to vector<1x128xf32>
      %446 = arith.mulf %444, %445 : vector<1x128xf32>
      %447 = arith.addf %440, %446 : vector<1x128xf32>
      %448 = vector.extract_strided_slice %209 {offsets = [7, 0], sizes = [1, 128], strides = [1, 1]} : vector<8x128xf32> to vector<1x128xf32>
      %449 = arith.mulf %448, %424 : vector<1x128xf32>
      %450 = vector.extract_strided_slice %221 {offsets = [7, 0], sizes = [1, 128], strides = [1, 1]} : vector<8x128xf32> to vector<1x128xf32>
      %451 = arith.addf %449, %450 : vector<1x128xf32>
      %452 = vector.extract_strided_slice %237 {offsets = [7, 0], sizes = [1, 128], strides = [1, 1]} : vector<8x128xf32> to vector<1x128xf32>
      %453 = arith.mulf %451, %452 : vector<1x128xf32>
      %454 = vector.extract_strided_slice %212 {offsets = [7, 0], sizes = [1, 128], strides = [1, 1]} : vector<8x128xf32> to vector<1x128xf32>
      %455 = arith.mulf %454, %430 : vector<1x128xf32>
      %456 = vector.extract_strided_slice %224 {offsets = [7, 0], sizes = [1, 128], strides = [1, 1]} : vector<8x128xf32> to vector<1x128xf32>
      %457 = arith.addf %455, %456 : vector<1x128xf32>
      %458 = vector.extract_strided_slice %244 {offsets = [7, 0], sizes = [1, 128], strides = [1, 1]} : vector<8x128xf32> to vector<1x128xf32>
      %459 = arith.mulf %457, %458 : vector<1x128xf32>
      %460 = arith.addf %453, %459 : vector<1x128xf32>
      %461 = vector.extract_strided_slice %215 {offsets = [7, 0], sizes = [1, 128], strides = [1, 1]} : vector<8x128xf32> to vector<1x128xf32>
      %462 = arith.mulf %461, %437 : vector<1x128xf32>
      %463 = vector.extract_strided_slice %227 {offsets = [7, 0], sizes = [1, 128], strides = [1, 1]} : vector<8x128xf32> to vector<1x128xf32>
      %464 = arith.addf %462, %463 : vector<1x128xf32>
      %465 = vector.extract_strided_slice %251 {offsets = [7, 0], sizes = [1, 128], strides = [1, 1]} : vector<8x128xf32> to vector<1x128xf32>
      %466 = arith.mulf %464, %465 : vector<1x128xf32>
      %467 = arith.addf %460, %466 : vector<1x128xf32>
      %468 = vector.extract_strided_slice %218 {offsets = [7, 0], sizes = [1, 128], strides = [1, 1]} : vector<8x128xf32> to vector<1x128xf32>
      %469 = arith.mulf %468, %444 : vector<1x128xf32>
      %470 = vector.extract_strided_slice %230 {offsets = [7, 0], sizes = [1, 128], strides = [1, 1]} : vector<8x128xf32> to vector<1x128xf32>
      %471 = arith.addf %469, %470 : vector<1x128xf32>
      %472 = vector.extract_strided_slice %258 {offsets = [7, 0], sizes = [1, 128], strides = [1, 1]} : vector<8x128xf32> to vector<1x128xf32>
      %473 = arith.mulf %471, %472 : vector<1x128xf32>
      %474 = arith.addf %467, %473 : vector<1x128xf32>
      %475 = tpu.concatenate %285, %312, %339, %366, %393, %420, %447, %474 in 0 : vector<1x128xf32>, vector<1x128xf32>, vector<1x128xf32>, vector<1x128xf32>, vector<1x128xf32>, vector<1x128xf32>, vector<1x128xf32>, vector<1x128xf32> -> vector<8x128xf32>
      %476 = arith.index_cast %204 : i32 to index
      %c0_114 = arith.constant 0 : index
      %477 = vector.load %arg18[%476, %c0_114] : memref<64x128xf32, #tpu.memory_space<vmem>>, vector<8x128xf32>
      tpu.vector_store %arg18[%476, %c0_114], %475 {strides = array<i32>} : memref<64x128xf32, #tpu.memory_space<vmem>>, vector<8x128xf32>,
      scf.yield %451, %457, %464, %471 : vector<1x128xf32>, vector<1x128xf32>, vector<1x128xf32>, vector<1x128xf32>
    }
    %c8_i32_79 = arith.constant 8 : i32
    %c0_80 = arith.constant 0 : index
    %c0_81 = arith.constant 0 : index
    %175 = vector.load %arg18[%c0_80, %c0_81] : memref<64x128xf32, #tpu.memory_space<vmem>>, vector<64x128xf32>
    %176 = vector.extract_strided_slice %175 {offsets = [0, 0], sizes = [64, 64], strides = [1, 1]} : vector<64x128xf32> to vector<64x64xf32>
    %177 = vector.extract_strided_slice %175 {offsets = [0, 64], sizes = [64, 64], strides = [1, 1]} : vector<64x128xf32> to vector<64x64xf32>
    %178 = arith.addf %176, %177 : vector<64x64xf32>
    %c0_82 = arith.constant 0 : index
    %c0_83 = arith.constant 0 : index
    %179 = vector.load %arg12[%c0_82, %c0_83] : memref<1x64xf32, #tpu.memory_space<vmem>>, vector<1x64xf32>
    %180 = vector.broadcast %179 : vector<1x64xf32> to vector<64x64xf32>
    %181 = arith.mulf %180, %73 : vector<64x64xf32>
    %182 = arith.addf %178, %181 : vector<64x64xf32>
    %cst_84 = arith.constant 5.000000e-01 : f32
    %183 = vector.broadcast %cst_84 : f32 to vector<64x64xf32>
    %184 = arith.mulf %183, %38 : vector<64x64xf32>
    %185 = math.tanh %184 : vector<64x64xf32>
    %cst_85 = arith.constant 1.000000e+00 : f32
    %186 = vector.broadcast %cst_85 : f32 to vector<64x64xf32>
    %187 = arith.addf %185, %186 : vector<64x64xf32>
    %cst_86 = arith.constant 5.000000e-01 : f32
    %188 = vector.broadcast %cst_86 : f32 to vector<64x64xf32>
    %189 = arith.mulf %188, %187 : vector<64x64xf32>
    %190 = arith.mulf %38, %189 : vector<64x64xf32>
    %191 = arith.mulf %182, %190 : vector<64x64xf32>
    %192 = arith.truncf %191 : vector<64x64xf32> to vector<64x64xbf16>
    %c0_87 = arith.constant 0 : index
    %c0_88 = arith.constant 0 : index
    %193 = vector.load %arg14[%c0_87, %c0_88] : memref<64x32xbf16, #tpu.memory_space<vmem>>, vector<64x32xbf16>
    %cst_89 = arith.constant dense<0.000000e+00> : vector<64x32xf32>
    %194 = tpu.matmul %192, %193, %cst_89 {dimension_numbers = #tpu.dot_dimension_numbers<[1], [0], [0], [1], [0, 0, 1, 1], [], []>} : vector<64x64xbf16>, vector<64x32xbf16>, vector<64x32xf32> -> vector<64x32xf32>
    %c0_90 = arith.constant 0 : index
    %c0_91 = arith.constant 0 : index
    %c0_92 = arith.constant 0 : index
    %195 = vector.load %arg4[%c0_90, %c0_91, %c0_92] : memref<1x1x32xf32, #tpu.memory_space<vmem>>, vector<1x1x32xf32>
    %196 = vector.shape_cast %195 : vector<1x1x32xf32> to vector<1x32xf32>
    %197 = vector.broadcast %196 : vector<1x32xf32> to vector<64x32xf32>
    %198 = arith.mulf %197, %194 : vector<64x32xf32>
    %199 = arith.addf %1, %198 : vector<64x32xf32>
    %c0_93 = arith.constant 0 : index
    %c0_94 = arith.constant 0 : index
    %c0_95 = arith.constant 0 : index
    %200 = vector.load %arg15[%c0_93, %c0_94, %c0_95] : memref<1x64x32xf32, #tpu.memory_space<vmem>>, vector<1x64x32xf32>
    %201 = vector.shape_cast %200 : vector<1x64x32xf32> to vector<64x32xf32>
    %202 = vector.shape_cast %199 : vector<64x32xf32> to vector<1x64x32xf32>
    tpu.vector_store %arg15[%c0_93, %c0_94, %c0_95], %202 {strides = array<i32>} : memref<1x64x32xf32, #tpu.memory_space<vmem>>, vector<1x64x32xf32>,
    return
  }
  func.func @transform_0(%arg0: i32) -> (i32, i32, i32) {
    %c0_i32 = arith.constant 0 : i32
    %c0_i32_0 = arith.constant 0 : i32
    %c0_i32_1 = arith.constant 0 : i32
    return %arg0, %c0_i32, %c0_i32_0 : i32, i32, i32
  }
  func.func @transform_1(%arg0: i32) -> (i32, i32, i32) {
    %c0_i32 = arith.constant 0 : i32
    %c0_i32_0 = arith.constant 0 : i32
    %c0_i32_1 = arith.constant 0 : i32
    return %arg0, %c0_i32, %c0_i32_0 : i32, i32, i32
  }
  func.func @transform_2(%arg0: i32) -> (i32, i32, i32) {
    %c0_i32 = arith.constant 0 : i32
    %c0_i32_0 = arith.constant 0 : i32
    %c0_i32_1 = arith.constant 0 : i32
    return %arg0, %c0_i32, %c0_i32_0 : i32, i32, i32
  }
  func.func @transform_3(%arg0: i32) -> (i32, i32, i32) {
    %c0_i32 = arith.constant 0 : i32
    %c0_i32_0 = arith.constant 0 : i32
    %c0_i32_1 = arith.constant 0 : i32
    return %arg0, %c0_i32, %c0_i32_0 : i32, i32, i32
  }
  func.func @transform_4(%arg0: i32) -> (i32, i32) {
    %c0_i32 = arith.constant 0 : i32
    %c0_i32_0 = arith.constant 0 : i32
    %c0_i32_1 = arith.constant 0 : i32
    return %c0_i32, %c0_i32_0 : i32, i32
  }
  func.func @transform_5(%arg0: i32) -> (i32, i32) {
    %c0_i32 = arith.constant 0 : i32
    %c0_i32_0 = arith.constant 0 : i32
    %c0_i32_1 = arith.constant 0 : i32
    return %c0_i32, %c0_i32_0 : i32, i32
  }
  func.func @transform_6(%arg0: i32) -> (i32, i32) {
    %c0_i32 = arith.constant 0 : i32
    %c0_i32_0 = arith.constant 0 : i32
    %c0_i32_1 = arith.constant 0 : i32
    return %c0_i32, %c0_i32_0 : i32, i32
  }
  func.func @transform_7(%arg0: i32) -> (i32, i32) {
    %c0_i32 = arith.constant 0 : i32
    %c0_i32_0 = arith.constant 0 : i32
    %c0_i32_1 = arith.constant 0 : i32
    return %c0_i32, %c0_i32_0 : i32, i32
  }
  func.func @transform_8(%arg0: i32) -> (i32, i32) {
    %c0_i32 = arith.constant 0 : i32
    %c0_i32_0 = arith.constant 0 : i32
    %c0_i32_1 = arith.constant 0 : i32
    return %c0_i32, %c0_i32_0 : i32, i32
  }
  func.func @transform_9(%arg0: i32) -> (i32, i32) {
    %c0_i32 = arith.constant 0 : i32
    %c0_i32_0 = arith.constant 0 : i32
    %c0_i32_1 = arith.constant 0 : i32
    return %c0_i32, %c0_i32_0 : i32, i32
  }
  func.func @transform_10(%arg0: i32) -> (i32, i32) {
    %c0_i32 = arith.constant 0 : i32
    %c0_i32_0 = arith.constant 0 : i32
    %c0_i32_1 = arith.constant 0 : i32
    return %c0_i32, %c0_i32_0 : i32, i32
  }
  func.func @transform_11(%arg0: i32) -> (i32, i32) {
    %c0_i32 = arith.constant 0 : i32
    %c0_i32_0 = arith.constant 0 : i32
    %c0_i32_1 = arith.constant 0 : i32
    return %c0_i32, %c0_i32_0 : i32, i32
  }
  func.func @transform_12(%arg0: i32) -> (i32, i32) {
    %c0_i32 = arith.constant 0 : i32
    %c0_i32_0 = arith.constant 0 : i32
    %c0_i32_1 = arith.constant 0 : i32
    return %c0_i32, %c0_i32_0 : i32, i32
  }
  func.func @transform_13(%arg0: i32) -> (i32, i32) {
    %c0_i32 = arith.constant 0 : i32
    %c0_i32_0 = arith.constant 0 : i32
    %c0_i32_1 = arith.constant 0 : i32
    return %c0_i32, %c0_i32_0 : i32, i32
  }
  func.func @transform_14(%arg0: i32) -> (i32, i32, i32) {
    %c0_i32 = arith.constant 0 : i32
    %c0_i32_0 = arith.constant 0 : i32
    %c0_i32_1 = arith.constant 0 : i32
    return %arg0, %c0_i32, %c0_i32_0 : i32, i32, i32
  }
}

</mosaic_0001>

<bundles_post_ra>
// kernel: tpu_custom_call.1
= control target key start
LH: loop header
LB: loop body
LE: loop exit
PB: predicated region body
PF: predicated region fallthrough
CT: control target
= control target key end

     0   :  { %s3012_s29 = smov 0   ;;  %s4288_s0 = inlined_call_operand.vmem [shape: f32[2,64,32], index: 0, kind: input, shape index: {}]   ;;  %s4289_s1 = inlined_call_operand.vmem [shape: f32[2,1,32], index: 1, kind: input, shape index: {}]   ;;  %s4290_s2 = inlined_call_operand.vmem [shape: f32[2,1,32], index: 2, kind: input, shape index: {}]   ;;  %s4291_s3 = inlined_call_operand.vmem [shape: f32[2,1,32], index: 3, kind: input, shape index: {}]   ;;  %s4292_s4 = inlined_call_operand.vmem [shape: f32[1,32], index: 4, kind: input, shape index: {}]   ;;  %s4293_s5 = inlined_call_operand.vmem [shape: f32[1,32], index: 5, kind: input, shape index: {}]   ;;  %s4294_s6 = inlined_call_operand.vmem [shape: bf16[32,128], index: 6, kind: input, shape index: {}]   ;;  %s4295_s7 = inlined_call_operand.vmem [shape: f32[4,64], index: 7, kind: input, shape index: {}]   ;;  %s4296_s8 = inlined_call_operand.vmem [shape: f32[1,64], index: 8, kind: input, shape index: {}]   ;;  %s4297_s9 = inlined_call_operand.vmem [shape: bf16[64,128], index: 9, kind: input, shape index: {}]   ;;  %s4298_s10 = inlined_call_operand.vmem [shape: f32[4,128], index: 10, kind: input, shape index: {}]   ;;  %s4299_s11 = inlined_call_operand.vmem [shape: f32[1,64], index: 11, kind: input, shape index: {}]   ;;  %s4300_s12 = inlined_call_operand.vmem [shape: f32[1,64], index: 12, kind: input, shape index: {}]   ;;  %s4301_s13 = inlined_call_operand.vmem [shape: bf16[64,32], index: 13, kind: input, shape index: {}]   ;;  %s4302_s14 = inlined_call_operand.vmem [shape: f32[2,64,32], index: 14, kind: output, shape index: {}]  }
   0x1 LB: > { %s2473_s30 = sadd.s32 4294967295, %s2896_s29   ;;  %p2477_p0 = scmp.ge.s32.totalorder %s2896_s29, 1  ;;  %s2896_s29 = sphi %s3012_s29, %s24_s29  }
   0x2   : > { %p436_p1 = scmp.lt.s32.totalorder %s2896_s29, 3 }
   0x4   : > { %p437_p2 = pnand %p2477_p0, %p436_p1 }
   0x6   : > { %440 = sbr.rel (%p437_p2) target bundleno = 1450 (0x5aa), region = 76 }
   0xb   : > { %p491_p3 = scmp.lt.s32.totalorder %s2473_s30, 1  ;;  %vm519_vm0 = vcmask 261120   ;;  %v2918_v14 = vmov 32.0   ;;  %v2552_v61 = vld [vmem:[%s4294_s6 + $0x8] sm:$0xff]  ;;  %v2551_v63 = vld [vmem:[%s4294_s6] sm:$0xff]  ;;  %s2927_s25 = smov 56  }
   0xc   : > { %2713 = vrcp.f32 %v2918_v14  ;;  %790 = vmatpush.bf16.msra.mxu0 %v2552_v61  ;;  %s2928_s26 = smov 64   ;;  %s3959_s22 = smov 0  }
   0xd   : > { %s4396_s30 = smov (!%p491_p3, %s2473_s30), 1 }
   0xe   : > { %s2549_s15 = sshll.u32 %s4396_s30, 6  ;;  %s498_s18 = scalar_lea.vmem %s4289_s1, %s4396_s30 }
   0xf   : > { %s3030_s21 = scalar_lea.vmem %s4288_s0, %s2549_s15  ;;  %s504_s24 = scalar_lea.vmem %s4291_s3, %s4396_s30 }
  0x10   : > { %s3039_s27 = scalar_lea.vmem %s4302_s14, %s2549_s15  ;;  %v3042_v0 = vld [vmem:[%s3030_s21 + $0x20] sm:$0xff]  ;;  %v3045_v1 = vld [vmem:[%s3030_s21 + $0x10] sm:$0xff]  ;;  %v3057_v6 = vld [vmem:[%s3030_s21 + $0x28] sm:$0xff]  ;;  %791 = vmatpush.bf16.msra.mxu0 %v2551_v63 }
  0x11   : > { %4343 = vst [vmem:[#allocation6_spill] sm:$0xff] %v3042_v0  ;;  %v532_v2 = vsel %vm519_vm0, %v3042_v0, 0.0  ;;  %v526_v3 = vsel %vm519_vm0, %v3045_v1, 0.0  ;;  %v3052_v4 = vld [vmem:[%s3030_s21] sm:$0xff]  ;;  %v3060_v7 = vld [vmem:[%s3030_s21 + $0x18] sm:$0xff]  ;;  %v3063_v8 = vld [vmem:[%s3030_s21 + $0x8] sm:$0xff] }
  0x12   : > { %4344 = vst [vmem:[#allocation7_spill] sm:$0xff] %v3045_v1  ;;  %533 = vadd.xlane.f32.xlu2 %v532_v2  ;;  %527 = vadd.xlane.f32.xlu1 %v526_v3  ;;  %v520_v5 = vsel %vm519_vm0, %v3052_v4, 0.0  ;;  %v535_v9 = vsel %vm519_vm0, %v3057_v6, 0.0  ;;  %v529_v10 = vsel %vm519_vm0, %v3060_v7, 0.0  ;;  %v523_v11 = vsel %vm519_vm0, %v3063_v8, 0.0  ;;  %v3072_v12 = vld [vmem:[%s3030_s21 + $0x30] sm:$0xff]  ;;  %v2714_v15 = vpop.eup %2713 }
  0x13   : > { %4345 = vst [vmem:[#allocation8_spill] sm:$0xff] %v3052_v4  ;;  %521 = vadd.xlane.f32.xlu0 %v520_v5  ;;  %v538_v13 = vsel %vm519_vm0, %v3072_v12, 0.0  ;;  %v545_v16 = vmul.f32 32.0, %v2714_v15  ;;  %vm549_vm1 = vweird.f32 %v2714_v15  ;;  %v3093_v36 = vld [vmem:[%s3030_s21 + $0x38] sm:$0xff]  ;;  %s501_s21 = scalar_lea.vmem %s4290_s2, %s4396_s30 }
  0x14   : > { %4346 = vst [vmem:[#allocation9_spill] sm:$0xff] %v3057_v6  ;;  %v541_v41 = vsel %vm519_vm0, %v3093_v36, 0.0 }
  0x15   : > { %4347 = vst [vmem:[#allocation10_spill] sm:$0xff] %v3060_v7  ;;  %v546_v17 = vsub.f32 1.0, %v545_v16 }
  0x16   : > { %4348 = vst [vmem:[#allocation11_spill] sm:$0xff] %v3063_v8 }
  0x17   : > { %4349 = vst [vmem:[#allocation12_spill] sm:$0xff] %v3072_v12  ;;  %v547_v18 = vmul.f32 %v2714_v15, %v546_v17 }
  0x18   : > { %4350 = vst [vmem:[#allocation13_spill] sm:$0xff] %v3093_v36 }
  0x19   : > { %v548_v19 = vadd.f32 %v2714_v15, %v547_v18 }
  0x1a   : > { %536 = vadd.xlane.f32.xlu2 %v535_v9  ;;  %530 = vadd.xlane.f32.xlu1 %v529_v10 }
  0x1b   : > { %524 = vadd.xlane.f32.xlu0 %v523_v11  ;;  %v3076_v20 = vsel %vm549_vm1, %v2714_v15, %v548_v19 }
  0x22   : > { %539 = vadd.xlane.f32.xlu2 %v538_v13 }
  0x85   : > { %v534_v21 = vpop.xlane.xlu2 %533  ;;  %v528_v22 = vpop.xlane.xlu1 %527 }
  0x86   : > { %v522_v23 = vpop.xlane.xlu0 %521  ;;  %v555_v32 = vmul.f32 %v3076_v20, %v534_v21  ;;  %v553_v33 = vmul.f32 %v3076_v20, %v528_v22 }
  0x87   : > { %v551_v24 = vmul.f32 %v3076_v20, %v522_v23 }
  0x88   : > { %v3101_v39 = vsub.f32 %v3042_v0, %v555_v32  ;;  %v3104_v40 = vsub.f32 %v3045_v1, %v553_v33 }
  0x89   : > { %v3080_v25 = vsub.f32 %v3052_v4, %v551_v24 }
  0x8a   : > { %v571_v48 = vmul.f32 %v3101_v39, %v3101_v39  ;;  %v569_v49 = vmul.f32 %v3104_v40, %v3104_v40 }
  0x8b   : > { %v567_v26 = vmul.f32 %v3080_v25, %v3080_v25 }
  0x8c   : > { %v587_v53 = vsel %vm519_vm0, %v571_v48, 0.0  ;;  %v581_v54 = vsel %vm519_vm0, %v569_v49, 0.0 }
  0x8d   : > { %v537_v27 = vpop.xlane.xlu2 %536  ;;  %v531_v28 = vpop.xlane.xlu1 %530  ;;  %v575_v29 = vsel %vm519_vm0, %v567_v26, 0.0 }
  0x8e   : > { %v554_v30 = vmul.f32 %v3076_v20, %v531_v28  ;;  %576 = vadd.xlane.f32.xlu0 %v575_v29  ;;  %v525_v31 = vpop.xlane.xlu0 %524  ;;  %v556_v47 = vmul.f32 %v3076_v20, %v537_v27 }
  0x8f   : > { %v552_v34 = vmul.f32 %v3076_v20, %v525_v31 }
  0x90   : > { %v3090_v35 = vsub.f32 %v3060_v7, %v554_v30  ;;  %v3124_v52 = vsub.f32 %v3057_v6, %v556_v47 }
  0x91   : > { %v3096_v37 = vsub.f32 %v3063_v8, %v552_v34 }
  0x92   : > { %v570_v38 = vmul.f32 %v3090_v35, %v3090_v35  ;;  %v572_v56 = vmul.f32 %v3124_v52, %v3124_v52 }
  0x93   : > { %v568_v42 = vmul.f32 %v3096_v37, %v3096_v37 }
  0x94   : > { %v584_v43 = vsel %vm519_vm0, %v570_v38, 0.0  ;;  %v590_v57 = vsel %vm519_vm0, %v572_v56, 0.0 }
  0x95   : > { %v540_v44 = vpop.xlane.xlu2 %539  ;;  %585 = vadd.xlane.f32.xlu2 %v584_v43  ;;  %v578_v45 = vsel %vm519_vm0, %v568_v42, 0.0  ;;  %v727_v43 = vld [vmem:[%s501_s21] sm:$0x1] }
  0x96   : > { %v557_v46 = vmul.f32 %v3076_v20, %v540_v44  ;;  %542 = vadd.xlane.f32.xlu0 %v541_v41  ;;  %579 = vadd.xlane.f32.xlu1 %v578_v45  ;;  %v3167_v44 = vld [vmem:[%s4292_s4] ss:$0 sm:$0xff] }
  0x98   : > { %v3119_v50 = vsub.f32 %v3072_v12, %v557_v46 }
  0x9a   : > { %v573_v51 = vmul.f32 %v3119_v50, %v3119_v50 }
  0x9c   : > { %v593_v55 = vsel %vm519_vm0, %v573_v51, 0.0 }
  0x9d   : > { %594 = vadd.xlane.f32.xlu2 %v593_v55 }
  0x9e   : > { %588 = vadd.xlane.f32.xlu0 %v587_v53  ;;  %582 = vadd.xlane.f32.xlu1 %v581_v54  ;;  %v728_v54 = vadd.f32 1.0, %v727_v43 }
  0xa6   : > { %591 = vadd.xlane.f32.xlu1 %v590_v57 }
 0x101   : > { %v577_v58 = vpop.xlane.xlu0 %576 }
 0x102   : > { %v599_v59 = vmul.f32 %v577_v58, %v3076_v20 }
 0x104   : > { %v607_v60 = vadd.f32 1e-05, %v599_v59 }
 0x106   : > { %2715 = vrsqrt.f32 %v607_v60  ;;  %vm621_vm3 = vweird.f32 %v607_v60 }
 0x108   : > { %v586_v62 = vpop.xlane.xlu2 %585 }
 0x109   : > { %v602_v2 = vmul.f32 %v586_v62, %v3076_v20  ;;  %v580_v3 = vpop.xlane.xlu1 %579  ;;  %v543_v5 = vpop.xlane.xlu0 %542 }
 0x10a   : > { %v600_v9 = vmul.f32 %v580_v3, %v3076_v20  ;;  %v558_v10 = vmul.f32 %v3076_v20, %v543_v5 }
 0x10b   : > { %v3142_v11 = vadd.f32 1e-05, %v602_v2  ;;  %v3181_v2 = vperm.slane %v728_v54, 0 }
 0x10c   : > { %v2716_v13 = vpop.eup %2715  ;;  %v608_v14 = vadd.f32 1e-05, %v600_v9  ;;  %v3145_v15 = vsub.f32 %v3093_v36, %v558_v10  ;;  %v4365_v36 = vmov 71  }
 0x10d   : > { %v616_v16 = vmul.f32 %v2716_v13, %v607_v60  ;;  %2717 = vrsqrt.f32 %v3142_v11  ;;  %vm622_vm2 = vweird.f32 %v2716_v13  ;;  %vm651_vm8 = vweird.f32 %v3142_v11 }
 0x10e   : > { %2719 = vrsqrt.f32 %v608_v14  ;;  %v574_v17 = vmul.f32 %v3145_v15, %v3145_v15  ;;  %vm623_vm4 = vmor %vm621_vm3, %vm622_vm2  ;;  %vm631_vm6 = vweird.f32 %v608_v14 }
 0x10f   : > { %v617_v18 = vmul.f32 %v2716_v13, %v616_v16 }
 0x110   : > { %v596_v19 = vsel %vm519_vm0, %v574_v17, 0.0  ;;  %v3197_v17 = vld [vmem:[%s498_s18] ss:$0 sm:$0xff] }
 0x111   : > { %v618_v21 = vmul.f32 0.5, %v617_v18  ;;  %v583_v22 = vpop.xlane.xlu1 %582  ;;  %597 = vadd.xlane.f32.xlu0 %v596_v19  ;;  %v589_v23 = vpop.xlane.xlu0 %588 }
 0x112   : > { %v601_v24 = vmul.f32 %v583_v22, %v3076_v20  ;;  %v603_v26 = vmul.f32 %v589_v23, %v3076_v20 }
 0x113   : > { %v3153_v27 = vpop.eup %2717  ;;  %v619_v28 = vsub.f32 1.5, %v618_v21 }
 0x114   : > { %v2720_v29 = vpop.eup %2719  ;;  %v646_v30 = vmul.f32 %v3153_v27, %v3142_v11  ;;  %v609_v31 = vadd.f32 1e-05, %v601_v24  ;;  %v3157_v34 = vadd.f32 1e-05, %v603_v26  ;;  %vm652_vm9 = vweird.f32 %v3153_v27 }
 0x115   : > { %v620_v32 = vmul.f32 %v2716_v13, %v619_v28  ;;  %v626_v33 = vmul.f32 %v2720_v29, %v608_v14  ;;  %vm632_vm5 = vweird.f32 %v2720_v29  ;;  %vm3187_vm10 = vmor %vm651_vm8, %vm652_vm9 }
 0x116   : > { %v647_v38 = vmul.f32 %v3153_v27, %v646_v30  ;;  %2721 = vrsqrt.f32 %v609_v31  ;;  %vm633_vm7 = vmor %vm631_vm6, %vm632_vm5  ;;  %vm641_vm12 = vweird.f32 %v609_v31  ;;  %vm661_vm1 = vweird.f32 %v3157_v34 }
 0x117   : > { %v624_v41 = vsel %vm623_vm4, %v2716_v13, %v620_v32  ;;  %v627_v42 = vmul.f32 %v2720_v29, %v626_v33  ;;  %2723 = vrsqrt.f32 %v3157_v34 }
 0x118   : > { %v695_v45 = vmul.f32 %v624_v41, %v3080_v25  ;;  %v648_v48 = vmul.f32 0.5, %v647_v38  ;;  %v3176_v25 = vld [vmem:[%s4293_s5] ss:$0 sm:$0xff] }
 0x119   : > { %v628_v46 = vmul.f32 0.5, %v627_v42  ;;  %v592_v47 = vpop.xlane.xlu1 %591 }
 0x11a   : > { %v604_v49 = vmul.f32 %v592_v47, %v3076_v20  ;;  %v707_v56 = vmul.f32 %v3167_v44, %v695_v45  ;;  %v649_v59 = vsub.f32 1.5, %v648_v48 }
 0x11b   : > { %v629_v51 = vsub.f32 1.5, %v628_v46 }
 0x11c   : > { %v2722_v53 = vpop.eup %2721  ;;  %v612_v55 = vadd.f32 1e-05, %v604_v49  ;;  %v719_v5 = vadd.f32 %v3176_v25, %v707_v56  ;;  %v650_v9 = vmul.f32 %v3153_v27, %v649_v59 }
 0x11d   : > { %v630_v57 = vmul.f32 %v2720_v29, %v629_v51  ;;  %v636_v58 = vmul.f32 %v2722_v53, %v609_v31  ;;  %v2724_v60 = vpop.eup %2723  ;;  %vm642_vm11 = vweird.f32 %v2722_v53 }
 0x11e   : > { %2725 = vrsqrt.f32 %v612_v55  ;;  %v656_v13 = vmul.f32 %v2724_v60, %v3157_v34  ;;  %v732_v19 = vmul.f32 %v3181_v2, %v719_v5  ;;  %v654_v21 = vsel %vm3187_vm10, %v3153_v27, %v650_v9  ;;  %vm643_vm13 = vmor %vm641_vm12, %vm642_vm11  ;;  %v595_v5 = vpop.xlane.xlu2 %594 }
 0x11f   : > { %v634_v61 = vsel %vm633_vm7, %v2720_v29, %v630_v57  ;;  %v637_v62 = vmul.f32 %v2722_v53, %v636_v58  ;;  %v698_v30 = vmul.f32 %v654_v21, %v3090_v35  ;;  %vm671_vm14 = vweird.f32 %v612_v55 }
 0x120   : > { %v696_v63 = vmul.f32 %v634_v61, %v3096_v37  ;;  %v657_v22 = vmul.f32 %v2724_v60, %v656_v13  ;;  %v744_v32 = vadd.f32 %v3197_v17, %v732_v19  ;;  %vm662_vm2 = vweird.f32 %v2724_v60 }
 0x121   : > { %v638_v3 = vmul.f32 0.5, %v637_v62  ;;  %v710_v43 = vmul.f32 %v3167_v44, %v698_v30  ;;  %vm663_vm4 = vmor %vm661_vm1, %vm662_vm2  ;;  %v605_v9 = vmul.f32 %v595_v5, %v3076_v20  ;;  %vm831_vm11 = vcmask 1040384  }
 0x122   : > { %v708_v10 = vmul.f32 %v3167_v44, %v696_v63  ;;  %v658_v33 = vmul.f32 0.5, %v657_v22  ;;  %vm874_vm12 = vcmask 1041408  }
 0x123   : > { %v639_v11 = vsub.f32 1.5, %v638_v3  ;;  %v722_v46 = vadd.f32 %v3176_v25, %v710_v43 }
 0x124   : > { %v720_v16 = vadd.f32 %v3176_v25, %v708_v10  ;;  %v2726_v37 = vpop.eup %2725  ;;  %v659_v45 = vsub.f32 1.5, %v658_v33  ;;  %v613_v10 = vadd.f32 1e-05, %v605_v9 }
 0x125   : > { %v640_v18 = vmul.f32 %v2722_v53, %v639_v11  ;;  %v666_v23 = vmul.f32 %v2726_v37, %v612_v55  ;;  %vm672_vm15 = vweird.f32 %v2726_v37  ;;  %v735_v51 = vmul.f32 %v3181_v2, %v722_v46  ;;  %v2554_v46 = vld [vmem:[%s4297_s9 + $0x8] sm:$0xff] }
 0x126   : > { %v733_v26 = vmul.f32 %v3181_v2, %v720_v16  ;;  %vm673_vm3 = vmor %vm671_vm14, %vm672_vm15  ;;  %v660_v47 = vmul.f32 %v2724_v60, %v659_v45  ;;  %2727 = vrsqrt.f32 %v613_v10  ;;  %vm681_vm5 = vweird.f32 %v613_v10  ;;  %v2556_v45 = vld [vmem:[%s4297_s9 + $0x18] sm:$0xff] }
 0x127   : > { %v644_v24 = vsel %vm643_vm13, %v2722_v53, %v640_v18  ;;  %v667_v29 = vmul.f32 %v2726_v37, %v666_v23  ;;  %v747_v34 = vadd.f32 %v3197_v17, %v735_v51  ;;  %1065 = vmatpush.bf16.msra.mxu1 %v2556_v45  ;;  %2561 = vmatpush.bf16.msra.mxu3 %v2556_v45  ;;  %v3270_v51 = vld [vmem:[%s4295_s7 + $0x1] ss:$0 sm:$0xff]  ;;  %vm917_vm13 = vcmask 1042432  }
 0x128   : > { %v697_v28 = vmul.f32 %v644_v24, %v3104_v40  ;;  %v745_v31 = vadd.f32 %v3197_v17, %v733_v26  ;;  %v664_v53 = vsel %vm663_vm4, %v2724_v60, %v660_v47  ;;  %vm1048_vm14 = vcmask 523264  }
 0x129   : > { %v668_v38 = vmul.f32 0.5, %v667_v29  ;;  %v699_v56 = vmul.f32 %v664_v53, %v3101_v39  ;;  %vm1788_vm15 = vcmask 64512  }
 0x12a   : > { %v709_v41 = vmul.f32 %v3167_v44, %v697_v28  ;;  %v752_v27 = vpack.c.bf16 %v745_v31, %v744_v32 }
 0x12b   : > { %v669_v42 = vsub.f32 1.5, %v668_v38  ;;  %v711_v59 = vmul.f32 %v3167_v44, %v699_v56 }
 0x12c   : > { %2490 = vmatmul.msk.bf16.vlgmr.msra.gmra.mxu0 %vm519_vm0, %v752_v27  ;;  %v721_v40 = vadd.f32 %v3176_v25, %v709_v41  ;;  %v2728_v13 = vpop.eup %2727 }
 0x12d   : > { %v670_v35 = vmul.f32 %v2726_v37, %v669_v42  ;;  %v723_v62 = vadd.f32 %v3176_v25, %v711_v59  ;;  %v676_v14 = vmul.f32 %v2728_v13, %v613_v10  ;;  %vm682_vm6 = vweird.f32 %v2728_v13 }
 0x12e   : > { %v734_v48 = vmul.f32 %v3181_v2, %v721_v40  ;;  %vm683_vm7 = vmor %vm681_vm5, %vm682_vm6 }
 0x12f   : > { %v674_v49 = vsel %vm673_vm3, %v2726_v37, %v670_v35  ;;  %v677_v11 = vmul.f32 %v2728_v13, %v676_v14 }
 0x130   : > { %v700_v54 = vmul.f32 %v674_v49, %v3124_v52  ;;  %v746_v55 = vadd.f32 %v3197_v17, %v734_v48  ;;  %v736_v52 = vmul.f32 %v3181_v2, %v723_v62 }
 0x131   : > { %v678_v16 = vmul.f32 0.5, %v677_v11 }
 0x132   : > { %v712_v57 = vmul.f32 %v3167_v44, %v700_v54  ;;  %v753_v58 = vpack.c.bf16 %v747_v34, %v746_v55  ;;  %v748_v39 = vadd.f32 %v3197_v17, %v736_v52  ;;  %v3280_v34 = vld [vmem:[%s4295_s7] ss:$0 sm:$0xff] }
 0x133   : > { %v679_v21 = vsub.f32 1.5, %v678_v16 }
 0x134   : > { %v724_v61 = vadd.f32 %v3176_v25, %v712_v57  ;;  %v2553_v57 = vld [vmem:[%s4297_s9] sm:$0xff] }
 0x135   : > { %v680_v22 = vmul.f32 %v2728_v13, %v679_v21 }
 0x136   : > { %v737_v60 = vmul.f32 %v3181_v2, %v724_v61 }
 0x137   : > { %v684_v24 = vsel %vm683_vm7, %v2728_v13, %v680_v22 }
 0x138   : > { %v749_v63 = vadd.f32 %v3197_v17, %v737_v60  ;;  %v701_v29 = vmul.f32 %v684_v24, %v3119_v50 }
 0x13a   : > { %v754_v3 = vpack.c.bf16 %v749_v63, %v748_v39  ;;  %v713_v31 = vmul.f32 %v3167_v44, %v701_v29  ;;  %v3293_v63 = vld [vmem:[%s4296_s8] ss:$0 sm:$0xff] }
 0x13c   : > { %2491 = vmatmul.msk.bf16.gmra.mxu0 %vm519_vm0, %v753_v58  ;;  %v725_v41 = vadd.f32 %v3176_v25, %v713_v31 }
 0x13e   : > { %v738_v43 = vmul.f32 %v3181_v2, %v725_v41 }
 0x140   : > { %v750_v40 = vadd.f32 %v3197_v17, %v738_v43 }
 0x14c   : > { %2492 = vmatmul.msk.bf16.gmra.mxu0 %vm519_vm0, %v754_v3 }
 0x184   : > { %v598_v37 = vpop.xlane.xlu0 %597 }
 0x185   : > { %v606_v18 = vmul.f32 %v598_v37, %v3076_v20 }
 0x187   : > { %v614_v19 = vadd.f32 1e-05, %v606_v18 }
 0x189   : > { %2729 = vrsqrt.f32 %v614_v19  ;;  %vm691_vm8 = vweird.f32 %v614_v19 }
 0x18f   : > { %v2730_v23 = vpop.eup %2729 }
 0x190   : > { %v686_v26 = vmul.f32 %v2730_v23, %v614_v19  ;;  %vm692_vm9 = vweird.f32 %v2730_v23 }
 0x191   : > { %vm693_vm10 = vmor %vm691_vm8, %vm692_vm9 }
 0x192   : > { %v687_v28 = vmul.f32 %v2730_v23, %v686_v26 }
 0x194   : > { %v688_v30 = vmul.f32 0.5, %v687_v28 }
 0x196   : > { %v689_v32 = vsub.f32 1.5, %v688_v30 }
 0x198   : > { %v690_v20 = vmul.f32 %v2730_v23, %v689_v32 }
 0x19a   : > { %v694_v33 = vsel %vm693_vm10, %v2730_v23, %v690_v20 }
 0x19b   : > { %v702_v38 = vmul.f32 %v694_v33, %v3145_v15 }
 0x19d   : > { %v714_v27 = vmul.f32 %v3167_v44, %v702_v38  ;;  %v2555_v44 = vld [vmem:[%s4297_s9 + $0x10] sm:$0xff] }
 0x19e   : > { %1066 = vmatpush.bf16.msra.mxu1 %v2555_v44  ;;  %2562 = vmatpush.bf16.msra.mxu3 %v2555_v44 }
 0x19f   : > { %v726_v42 = vadd.f32 %v3176_v25, %v714_v27  ;;  %v3252_v25 = vld [vmem:[%s4295_s7 + $0x3] ss:$0 sm:$0xff] }
 0x1a1   : > { %v739_v50 = vmul.f32 %v3181_v2, %v726_v42 }
 0x1a2   : > { %1067 = vmatpush.bf16.msra.mxu1 %v2554_v46  ;;  %2563 = vmatpush.bf16.msra.mxu3 %v2554_v46 }
 0x1a3   : > { %v751_v35 = vadd.f32 %v3197_v17, %v739_v50  ;;  %v3259_v17 = vld [vmem:[%s4295_s7 + $0x2] ss:$0 sm:$0xff] }
 0x1a5   : > { %v755_v15 = vpack.c.bf16 %v751_v35, %v750_v40 }
 0x1a6   : > { %1068 = vmatpush.bf16.msra.mxu1 %v2553_v57  ;;  %2564 = vmatpush.bf16.msra.mxu3 %v2553_v57 }
 0x1a7   : > { %2493 = vmatmul.msk.bf16.gmra.mxu0 %vm519_vm0, %v755_v15 }
 0x1a9   : > { %v3254_v2 = vpop.f32.mrf.mxu0 }
 0x1aa   : > { %4353 = vst [vmem:[#allocation14_spill] sm:$0xff] %v3254_v2  ;;  %v832_v47 = vrot.slane %v3254_v2, 7  ;;  %v875_v48 = vrot.slane %v3254_v2, 6  ;;  %v918_v49 = vrot.slane %v3254_v2, 5  ;;  %v815_v55 = vmul.f32 %v3252_v25, %v3254_v2 }
 0x1ac   : > { %v855_v53 = vsel %vm831_vm11, 0.0, %v832_v47  ;;  %v898_v54 = vsel %vm874_vm12, 0.0, %v875_v48  ;;  %v941_v58 = vsel %vm917_vm13, 0.0, %v918_v49 }
 0x1ad   : > { %v858_v56 = vmul.f32 %v3259_v17, %v855_v53  ;;  %v901_v61 = vmul.f32 %v3270_v51, %v898_v54  ;;  %v944_v60 = vmul.f32 %v3280_v34, %v941_v58 }
 0x1af   : > { %v866_v59 = vadd.f32 %v858_v56, %v815_v55 }
 0x1b1   : > { %v909_v62 = vadd.f32 %v901_v61, %v866_v59  ;;  %v3288_v52 = vpop.f32.mrf.mxu0 }
 0x1b2   : > { %4354 = vst [vmem:[#allocation15_spill] sm:$0xff] %v3288_v52  ;;  %v833_v39 = vrot.slane %v3288_v52, 7  ;;  %v876_v3 = vrot.slane %v3288_v52, 6  ;;  %v919_v5 = vrot.slane %v3288_v52, 5  ;;  %v816_v14 = vmul.f32 %v3252_v25, %v3288_v52 }
 0x1b3   : > { %v952_v9 = vadd.f32 %v944_v60, %v909_v62 }
 0x1b4   : > { %v834_v10 = vsel %vm831_vm11, %v832_v47, %v833_v39  ;;  %v877_v13 = vsel %vm874_vm12, %v875_v48, %v876_v3  ;;  %v920_v37 = vsel %vm917_vm13, %v918_v49, %v919_v5 }
 0x1b5   : > { %v859_v11 = vmul.f32 %v3259_v17, %v834_v10  ;;  %v964_v16 = vadd.f32 %v3293_v63, %v952_v9  ;;  %v902_v19 = vmul.f32 %v3270_v51, %v877_v13  ;;  %v945_v23 = vmul.f32 %v3280_v34, %v920_v37 }
 0x1b7   : > { %v867_v18 = vadd.f32 %v859_v11, %v816_v14  ;;  %v972_v21 = vmul.f32 0.5, %v964_v16 }
 0x1b9   : > { %v910_v22 = vadd.f32 %v902_v19, %v867_v18  ;;  %v3307_v24 = vpop.f32.mrf.mxu0  ;;  %2731 = vtanh.f32 %v972_v21 }
 0x1ba   : > { %4355 = vst [vmem:[#allocation16_spill] sm:$0xff] %v3307_v24  ;;  %v835_v26 = vrot.slane %v3307_v24, 7  ;;  %v878_v28 = vrot.slane %v3307_v24, 6  ;;  %v921_v29 = vrot.slane %v3307_v24, 5  ;;  %v817_v20 = vmul.f32 %v3252_v25, %v3307_v24 }
 0x1bb   : > { %v953_v30 = vadd.f32 %v945_v23, %v910_v22 }
 0x1bc   : > { %v836_v32 = vsel %vm831_vm11, %v833_v39, %v835_v26  ;;  %v879_v31 = vsel %vm874_vm12, %v876_v3, %v878_v28  ;;  %v922_v41 = vsel %vm917_vm13, %v919_v5, %v921_v29 }
 0x1bd   : > { %v860_v33 = vmul.f32 %v3259_v17, %v836_v32  ;;  %v965_v38 = vadd.f32 %v3293_v63, %v953_v30  ;;  %v903_v42 = vmul.f32 %v3270_v51, %v879_v31  ;;  %v946_v40 = vmul.f32 %v3280_v34, %v922_v41 }
 0x1bf   : > { %v868_v27 = vadd.f32 %v860_v33, %v817_v20  ;;  %v973_v43 = vmul.f32 0.5, %v965_v38  ;;  %v2732_v50 = vpop.eup %2731 }
 0x1c0   : > { %v988_v53 = vadd.f32 1.0, %v2732_v50 }
 0x1c1   : > { %v911_v45 = vadd.f32 %v903_v42, %v868_v27  ;;  %v3321_v35 = vpop.f32.mrf.mxu0  ;;  %2733 = vtanh.f32 %v973_v43 }
 0x1c2   : > { %4356 = vst [vmem:[#allocation17_spill] sm:$0xff] %v3321_v35  ;;  %v837_v15 = vrot.slane %v3321_v35, 7  ;;  %v880_v44 = vrot.slane %v3321_v35, 6  ;;  %v923_v46 = vrot.slane %v3321_v35, 5  ;;  %v818_v54 = vmul.f32 %v3252_v25, %v3321_v35 }
 0x1c3   : > { %v954_v47 = vadd.f32 %v946_v40, %v911_v45  ;;  %v996_v60 = vmul.f32 0.5, %v988_v53 }
 0x1c4   : > { %v838_v48 = vsel %vm831_vm11, %v835_v26, %v837_v15  ;;  %v881_v49 = vsel %vm874_vm12, %v878_v28, %v880_v44  ;;  %v924_v56 = vsel %vm917_vm13, %v921_v29, %v923_v46 }
 0x1c5   : > { %v861_v55 = vmul.f32 %v3259_v17, %v838_v48  ;;  %v966_v57 = vadd.f32 %v3293_v63, %v954_v47  ;;  %v904_v61 = vmul.f32 %v3270_v51, %v881_v49  ;;  %v947_v3 = vmul.f32 %v3280_v34, %v924_v56 }
 0x1c6   : > { %v3342_v21 = vmul.f32 %v996_v60, %v964_v16 }
 0x1c7   : > { %v2734_v58 = vpop.eup %2733  ;;  %v869_v59 = vadd.f32 %v861_v55, %v818_v54  ;;  %v974_v9 = vmul.f32 0.5, %v966_v57 }
 0x1c8   : > { %v989_v62 = vadd.f32 1.0, %v2734_v58  ;;  %4358 = vst [vmem:[#allocation19_spill] sm:$0xff] %v3342_v21 }
 0x1c9   : > { %v912_v39 = vadd.f32 %v904_v61, %v869_v59  ;;  %v3335_v5 = vpop.f32.mrf.mxu0  ;;  %2735 = vtanh.f32 %v974_v9 }
 0x1ca   : > { %4357 = vst [vmem:[#allocation18_spill] sm:$0xff] %v3335_v5  ;;  %v839_v10 = vrot.slane %v3335_v5, 7  ;;  %v882_v13 = vrot.slane %v3335_v5, 6  ;;  %v925_v14 = vrot.slane %v3335_v5, 5  ;;  %v997_v11 = vmul.f32 0.5, %v989_v62 }
 0x1cb   : > { %v955_v37 = vadd.f32 %v947_v3, %v912_v39  ;;  %v819_v22 = vmul.f32 %v3252_v25, %v3335_v5 }
 0x1cc   : > { %v840_v18 = vsel %vm831_vm11, %v837_v15, %v839_v10  ;;  %v883_v19 = vsel %vm874_vm12, %v880_v44, %v882_v13  ;;  %v3347_v26 = vmul.f32 %v997_v11, %v965_v38  ;;  %v926_v28 = vsel %vm917_vm13, %v923_v46, %v925_v14 }
 0x1cd   : > { %v862_v23 = vmul.f32 %v3259_v17, %v840_v18  ;;  %v967_v29 = vadd.f32 %v3293_v63, %v955_v37  ;;  %v905_v32 = vmul.f32 %v3270_v51, %v883_v19  ;;  %v948_v33 = vmul.f32 %v3280_v34, %v926_v28 }
 0x1ce   : > { %4359 = vst [vmem:[#allocation20_spill] sm:$0xff] %v3347_v26  ;;  %v1012_v16 = vpack.c.bf16 %v3347_v26, %v3342_v21 }
 0x1cf   : > { %v870_v30 = vadd.f32 %v862_v23, %v819_v22  ;;  %v975_v31 = vmul.f32 0.5, %v967_v29  ;;  %v2736_v43 = vpop.eup %2735 }
 0x1d0   : > { %2510 = vmatmul.msk.bf16.vlgmr.msra.gmra.mxu1 %vm1048_vm14, %v1012_v16  ;;  %v990_v47 = vadd.f32 1.0, %v2736_v43 }
 0x1d1   : > { %v913_v20 = vadd.f32 %v905_v32, %v870_v30  ;;  %v3356_v38 = vpop.f32.mrf.mxu0  ;;  %2737 = vtanh.f32 %v975_v31 }
 0x1d2   : > { %4360 = vst [vmem:[#allocation21_spill] sm:$0xff] %v3356_v38  ;;  %v841_v41 = vrot.slane %v3356_v38, 7  ;;  %v884_v27 = vrot.slane %v3356_v38, 6  ;;  %v927_v42 = vrot.slane %v3356_v38, 5  ;;  %v820_v15 = vmul.f32 %v3252_v25, %v3356_v38 }
 0x1d3   : > { %v956_v50 = vadd.f32 %v948_v33, %v913_v20  ;;  %v998_v61 = vmul.f32 0.5, %v990_v47  ;;  %v4306_v47 = vmov 64  }
 0x1d4   : > { %v842_v45 = vsel %vm831_vm11, %v839_v10, %v841_v41  ;;  %v885_v40 = vsel %vm874_vm12, %v882_v13, %v884_v27  ;;  %v928_v46 = vsel %vm917_vm13, %v925_v14, %v927_v42  ;;  %2636 = vset.pattern.permute.xlu1 %v4306_v47  ;;  %2644 = vset.pattern.permute.xlu0 %v4306_v47 }
 0x1d5   : > { %v863_v44 = vmul.f32 %v3259_v17, %v842_v45  ;;  %v968_v48 = vadd.f32 %v3293_v63, %v956_v50  ;;  %v906_v53 = vmul.f32 %v3270_v51, %v885_v40  ;;  %v949_v58 = vmul.f32 %v3280_v34, %v928_v46  ;;  %2652 = vset.pattern.permute.xlu2 %v4306_v47 }
 0x1d6   : > { %v3371_v3 = vmul.f32 %v998_v61, %v966_v57 }
 0x1d7   : > { %v871_v49 = vadd.f32 %v863_v44, %v820_v15  ;;  %v976_v54 = vmul.f32 0.5, %v968_v48  ;;  %v2738_v55 = vpop.eup %2737 }
 0x1d8   : > { %v991_v59 = vadd.f32 1.0, %v2738_v55 }
 0x1d9   : > { %v914_v56 = vadd.f32 %v906_v53, %v871_v49  ;;  %2739 = vtanh.f32 %v976_v54 }
 0x1da   : > { %v999_v60 = vmul.f32 0.5, %v991_v59 }
 0x1db   : > { %v957_v62 = vadd.f32 %v949_v58, %v914_v56 }
 0x1dc   : > { %v3373_v9 = vmul.f32 %v999_v60, %v967_v29 }
 0x1dd   : > { %v969_v39 = vadd.f32 %v3293_v63, %v957_v62 }
 0x1de   : > { %4361 = vst [vmem:[#allocation22_spill] sm:$0xff] %v3373_v9  ;;  %v1013_v13 = vpack.c.bf16 %v3373_v9, %v3371_v3 }
 0x1df   : > { %v977_v10 = vmul.f32 0.5, %v969_v39  ;;  %v2740_v14 = vpop.eup %2739 }
 0x1e0   : > { %2511 = vmatmul.msk.bf16.vlgmr.msra.gmra.mxu3 %vm1048_vm14, %v1013_v13  ;;  %v992_v11 = vadd.f32 1.0, %v2740_v14 }
 0x1e1   : > { %2741 = vtanh.f32 %v977_v10 }
 0x1e2   : > { %v1000_v19 = vmul.f32 0.5, %v992_v11 }
 0x1e4   : > { %v3378_v23 = vmul.f32 %v1000_v19, %v968_v48 }
 0x1e7   : > { %v2742_v37 = vpop.eup %2741 }
 0x1e8   : > { %v993_v18 = vadd.f32 1.0, %v2742_v37 }
 0x1ea   : > { %v1001_v22 = vmul.f32 0.5, %v993_v18 }
 0x1ec   : > { %v3380_v28 = vmul.f32 %v1001_v22, %v969_v39 }
 0x1ee   : > { %v1014_v57 = vpack.c.bf16 %v3380_v28, %v3378_v23 }
 0x1f0   : > { %2512 = vmatmul.msk.bf16.gmra.mxu3 %vm1048_vm14, %v1014_v57 }
 0x224   : > { %v3385_v29 = vpop.f32.mrf.mxu0 }
 0x225   : > { %4362 = vst [vmem:[#allocation23_spill] sm:$0xff] %v3385_v29  ;;  %v843_v30 = vrot.slane %v3385_v29, 7  ;;  %v886_v32 = vrot.slane %v3385_v29, 6  ;;  %v929_v16 = vrot.slane %v3385_v29, 5  ;;  %v821_v33 = vmul.f32 %v3252_v25, %v3385_v29 }
 0x227   : > { %v844_v31 = vsel %vm831_vm11, %v841_v41, %v843_v30  ;;  %v887_v20 = vsel %vm874_vm12, %v884_v27, %v886_v32  ;;  %v930_v50 = vsel %vm917_vm13, %v927_v42, %v929_v16 }
 0x228   : > { %v864_v43 = vmul.f32 %v3259_v17, %v844_v31  ;;  %v907_v40 = vmul.f32 %v3270_v51, %v887_v20  ;;  %v950_v44 = vmul.f32 %v3280_v34, %v930_v50  ;;  %v4307_v31 = vmov 67   ;;  %v3446_v20 = vld [vmem:[%s4300_s12] ss:$0 sm:$0xff] }
 0x22a   : > { %v872_v45 = vadd.f32 %v864_v43, %v821_v33  ;;  %v4303_v33 = vmov 68  }
 0x22c   : > { %v915_v15 = vadd.f32 %v907_v40, %v872_v45  ;;  %v3398_v46 = vpop.f32.mrf.mxu0  ;;  %v4311_v40 = vmov 69  }
 0x22d   : > { %4363 = vst [vmem:[#allocation24_spill] sm:$0xff] %v3398_v46  ;;  %v845_v41 = vrot.slane %v3398_v46, 7  ;;  %v888_v27 = vrot.slane %v3398_v46, 6  ;;  %v931_v48 = vrot.slane %v3398_v46, 5  ;;  %v822_v54 = vmul.f32 %v3252_v25, %v3398_v46 }
 0x22e   : > { %v958_v42 = vadd.f32 %v950_v44, %v915_v15 }
 0x22f   : > { %v846_v49 = vsel %vm831_vm11, %v843_v30, %v845_v41  ;;  %v889_v53 = vsel %vm874_vm12, %v886_v32, %v888_v27  ;;  %v932_v58 = vsel %vm917_vm13, %v929_v16, %v931_v48  ;;  %v4305_v30 = vmov 65  }
 0x230   : > { %v865_v55 = vmul.f32 %v3259_v17, %v846_v49  ;;  %v970_v56 = vadd.f32 %v3293_v63, %v958_v42  ;;  %v908_v61 = vmul.f32 %v3270_v51, %v889_v53  ;;  %v951_v39 = vmul.f32 %v3280_v34, %v932_v58 }
 0x231   : > { %v4316_v32 = vmov 66   ;;  %v4313_v41 = vmov 70  }
 0x232   : > { %v873_v59 = vadd.f32 %v865_v55, %v822_v54  ;;  %v978_v62 = vmul.f32 0.5, %v970_v56  ;;  %v4309_v54 = vmov 71  }
 0x234   : > { %v916_v60 = vadd.f32 %v908_v61, %v873_v59  ;;  %2743 = vtanh.f32 %v978_v62 }
 0x236   : > { %v959_v10 = vadd.f32 %v951_v39, %v916_v60 }
 0x238   : > { %v971_v13 = vadd.f32 %v3293_v63, %v959_v10 }
 0x23a   : > { %v979_v14 = vmul.f32 0.5, %v971_v13  ;;  %v2744_v11 = vpop.eup %2743 }
 0x23b   : > { %v994_v25 = vadd.f32 1.0, %v2744_v11 }
 0x23c   : > { %2745 = vtanh.f32 %v979_v14 }
 0x23d   : > { %v1002_v18 = vmul.f32 0.5, %v994_v25 }
 0x23f   : > { %v3416_v22 = vmul.f32 %v1002_v18, %v970_v56 }
 0x242   : > { %v2746_v17 = vpop.eup %2745 }
 0x243   : > { %v995_v37 = vadd.f32 1.0, %v2746_v17 }
 0x245   : > { %v1003_v19 = vmul.f32 0.5, %v995_v37 }
 0x247   : > { %v3418_v57 = vmul.f32 %v1003_v19, %v971_v13 }
 0x249   : > { %v1015_v51 = vpack.c.bf16 %v3418_v57, %v3416_v22 }
 0x24b   : > { %2513 = vmatmul.msk.bf16.gmra.mxu3 %vm1048_vm14, %v1015_v51 }
 0x24d   : > { %v3423_v34 = vpop.f32.mrf.mxu1 }
 0x24e   : > { %1298 = vperm.xlu1 %2636, %v3423_v34   ;;  %v1094_v43 = vadd.f32 %v3446_v20, %v3423_v34 }
 0x250   : > { %v1110_v50 = vand.u32 2147483647, %v1094_v43  ;;  %v1102_v39 = vmax.f32 %v1094_v43, 0.0 }
 0x252   : > { %v1118_v45 = vsub.f32 0.0, %v1110_v50 }
 0x254   : > { %v1126_v15 = vmul.f32 1.442695, %v1118_v45 }
 0x255   : > { %v3426_v63 = vpop.f32.mrf.mxu1 }
 0x256   : > { %2637 = vset.pattern.permute.xlu1 %v4305_v30  ;;  %1303 = vperm.xlu0 %2644, %v3426_v63   ;;  %2747 = vpow2.f32 %v1126_v15  ;;  %v1095_v42 = vadd.f32 %v3446_v20, %v3426_v63 }
 0x257   : > { %1337 = vperm.xlu1 %2637, %v3423_v34  }
 0x258   : > { %v1111_v55 = vand.u32 2147483647, %v1095_v42  ;;  %v1103_v43 = vmax.f32 %v1095_v42, 0.0 }
 0x25a   : > { %v1119_v58 = vsub.f32 0.0, %v1111_v55 }
 0x25c   : > { %v2748_v48 = vpop.eup %2747  ;;  %v1128_v61 = vmul.f32 1.442695, %v1119_v58 }
 0x25d   : > { %v1142_v53 = vadd.f32 1.0, %v2748_v48 }
 0x25e   : > { %2645 = vset.pattern.permute.xlu0 %v4305_v30 }
 0x25f   : > { %2638 = vset.pattern.permute.xlu1 %v4316_v32  ;;  %1341 = vperm.xlu0 %2645, %v3426_v63   ;;  %2749 = vlog2.f32 %v1142_v53 }
 0x260   : > { %1428 = vperm.xlu1 %2638, %v3423_v34  }
 0x263   : > { %v3435_v16 = vpop.f32.mrf.mxu3 }
 0x264   : > { %1308 = vperm.xlu2 %2652, %v3435_v16   ;;  %v1096_v44 = vadd.f32 %v3446_v20, %v3435_v16 }
 0x265   : > { %v2750_v59 = vpop.eup %2749 }
 0x266   : > { %v1112_v27 = vand.u32 2147483647, %v1096_v44  ;;  %v1151_v60 = vmul.f32 0.6931472, %v2750_v59  ;;  %v1104_v19 = vmax.f32 %v1096_v44, 0.0 }
 0x267   : > { %2646 = vset.pattern.permute.xlu0 %v4316_v32 }
 0x268   : > { %2639 = vset.pattern.permute.xlu1 %v4307_v31  ;;  %1432 = vperm.xlu0 %2646, %v3426_v63   ;;  %v1120_v49 = vsub.f32 0.0, %v1112_v27  ;;  %v3486_v13 = vadd.f32 %v1151_v60, %v1102_v39 }
 0x269   : > { %1460 = vperm.xlu1 %2639, %v3423_v34  }
 0x26a   : > { %v1130_v56 = vmul.f32 1.442695, %v1120_v49  ;;  %v3496_v25 = vmul.f32 %v3486_v13, %v3342_v21 }
 0x26b   : > { %v3498_v37 = vpop.f32.mrf.mxu3 }
 0x26c   : > { %2653 = vset.pattern.permute.xlu2 %v4305_v30  ;;  %2751 = vpow2.f32 %v1130_v56 }
 0x26d   : > { %1345 = vperm.xlu2 %2653, %v3435_v16   ;;  %2753 = vpow2.f32 %v1128_v61 }
 0x270   : > { %2647 = vset.pattern.permute.xlu0 %v4307_v31 }
 0x271   : > { %2640 = vset.pattern.permute.xlu1 %v4303_v33  ;;  %1464 = vperm.xlu0 %2647, %v3426_v63  }
 0x272   : > { %1552 = vperm.xlu1 %2640, %v3423_v34   ;;  %v2752_v62 = vpop.eup %2751 }
 0x273   : > { %v1144_v10 = vadd.f32 1.0, %v2752_v62  ;;  %v2754_v14 = vpop.eup %2753 }
 0x274   : > { %v1143_v11 = vadd.f32 1.0, %v2754_v14 }
 0x275   : > { %2654 = vset.pattern.permute.xlu2 %v4316_v32  ;;  %2755 = vlog2.f32 %v1144_v10 }
 0x276   : > { %1436 = vperm.xlu2 %2654, %v3435_v16   ;;  %2757 = vlog2.f32 %v1143_v11  ;;  %v3571_v11 = vadd.f32 %v3446_v20, %v3498_v37 }
 0x279   : > { %2648 = vset.pattern.permute.xlu0 %v4303_v33 }
 0x27a   : > { %2641 = vset.pattern.permute.xlu1 %v4311_v40  ;;  %1556 = vperm.xlu0 %2648, %v3426_v63  }
 0x27b   : > { %1584 = vperm.xlu1 %2641, %v3423_v34   ;;  %v2756_v17 = vpop.eup %2755 }
 0x27c   : > { %v1155_v18 = vmul.f32 0.6931472, %v2756_v17  ;;  %v2758_v51 = vpop.eup %2757 }
 0x27e   : > { %2655 = vset.pattern.permute.xlu2 %v4307_v31 }
 0x27f   : > { %1468 = vperm.xlu2 %2655, %v3435_v16  }
 0x282   : > { %2649 = vset.pattern.permute.xlu0 %v4311_v40 }
 0x283   : > { %2642 = vset.pattern.permute.xlu1 %v4313_v41  ;;  %1588 = vperm.xlu0 %2649, %v3426_v63  }
 0x284   : > { %1676 = vperm.xlu1 %2642, %v3423_v34  }
 0x287   : > { %2656 = vset.pattern.permute.xlu2 %v4303_v33 }
 0x288   : > { %1560 = vperm.xlu2 %2656, %v3435_v16  }
 0x28b   : > { %2650 = vset.pattern.permute.xlu0 %v4313_v41 }
 0x28c   : > { %2643 = vset.pattern.permute.xlu1 %v4309_v54  ;;  %1680 = vperm.xlu0 %2650, %v3426_v63  }
 0x28d   : > { %1708 = vperm.xlu1 %2643, %v3423_v34  }
 0x290   : > { %2657 = vset.pattern.permute.xlu2 %v4311_v40 }
 0x291   : > { %1592 = vperm.xlu2 %2657, %v3435_v16  }
 0x294   : > { %2651 = vset.pattern.permute.xlu0 %v4309_v54 }
 0x295   : > { %1764 = vrot.lane.b32.xlu1 %v3423_v34, %s2927_s25  ;;  %1712 = vperm.xlu0 %2651, %v3426_v63   ;;  %v3504_v34 = vadd.f32 %v1155_v18, %v1104_v19  ;;  %v1113_v19 = vand.u32 2147483647, %v3571_v11 }
 0x296   : > { %2660 = vset.pattern.permute.xlu1 %v4306_v47 }
 0x299   : > { %2658 = vset.pattern.permute.xlu2 %v4313_v41 }
 0x29a   : > { %1684 = vperm.xlu2 %2658, %v3435_v16  }
 0x29d   : > { %1190 = vrot.lane.b32.xlu1 %v3486_v13, %s2928_s26  ;;  %1766 = vrot.lane.b32.xlu0 %v3426_v63, %s2927_s25  ;;  %v1153_v63 = vmul.f32 0.6931472, %v2758_v51 }
 0x29e   : > { %2684 = vset.pattern.permute.xlu0 %v4306_v47 }
 0x29f   : > { %v3513_v50 = vadd.f32 %v1153_v63, %v1103_v43  ;;  %v1121_v63 = vsub.f32 0.0, %v1113_v19 }
 0x2a1   : > { %v3523_v45 = vmul.f32 %v3513_v50, %v3347_v26  ;;  %v1132_v43 = vmul.f32 1.442695, %v1121_v63 }
 0x2a2   : > { %2659 = vset.pattern.permute.xlu2 %v4309_v54 }
 0x2a3   : > { %1716 = vperm.xlu2 %2659, %v3435_v16   ;;  %2759 = vpow2.f32 %v1132_v43 }
 0x2a5   : > { %1313 = vperm.xlu1 %2660, %v3498_v37   ;;  %1230 = vrot.lane.b32.xlu0 %v3496_v25, %s2928_s26 }
 0x2ab   : > { %1768 = vrot.lane.b32.xlu2 %v3435_v16, %s2927_s25  ;;  %v3519_v16 = vpop.f32.mrf.mxu3 }
 0x2ac   : > { %2668 = vset.pattern.permute.xlu2 %v4306_v47 }
 0x2ad   : > { %2661 = vset.pattern.permute.xlu1 %v4305_v30  ;;  %1194 = vrot.lane.b32.xlu0 %v3504_v34, %s2928_s26 }
 0x2ae   : > { %1349 = vperm.xlu1 %2661, %v3498_v37  }
 0x2b3   : > { %1192 = vrot.lane.b32.xlu2 %v3513_v50, %s2928_s26  ;;  %v3529_v27 = vpop.f32.mrf.mxu3 }
 0x2b6   : > { %2662 = vset.pattern.permute.xlu1 %v4316_v32 }
 0x2b7   : > { %1440 = vperm.xlu1 %2662, %v3498_v37  }
 0x2bb   : > { %1232 = vrot.lane.b32.xlu2 %v3523_v45, %s2928_s26 }
 0x2be   : > { %v1309_v15 = vpop.permute.xlu2 %1308 }
 0x2bf   : > { %2663 = vset.pattern.permute.xlu1 %v4307_v31 }
 0x2c0   : > { %v1299_v44 = vpop.permute.xlu1 %1298  ;;  %1472 = vperm.xlu1 %2663, %v3498_v37  }
 0x2c3   : > { %1318 = vperm.xlu2 %2668, %v3519_v16  }
 0x2c7   : > { %v1346_v48 = vpop.permute.xlu2 %1345 }
 0x2c8   : > { %2664 = vset.pattern.permute.xlu1 %v4303_v33  ;;  %v3533_v42 = vpop.permute.xlu0 %1303  ;;  %v3536_v49 = vsel %vm1048_vm14, %v1309_v15, %v1346_v48 }
 0x2c9   : > { %v1338_v53 = vpop.permute.xlu1 %1337  ;;  %1564 = vperm.xlu1 %2664, %v3498_v37  }
 0x2ca   : > { %v3540_v55 = vsel %vm1048_vm14, %v1299_v44, %v1338_v53 }
 0x2cb   : > { %2669 = vset.pattern.permute.xlu2 %v4305_v30 }
 0x2cc   : > { %1353 = vperm.xlu2 %2669, %v3519_v16  }
 0x2ce   : > { %v3543_v56 = vpop.f32.mrf.mxu3 }
 0x2cf   : > { %1328 = vperm.xlu0 %2684, %v3543_v56  }
 0x2d0   : > { %v1437_v58 = vpop.permute.xlu2 %1436 }
 0x2d1   : > { %2665 = vset.pattern.permute.xlu1 %v4311_v40  ;;  %v3548_v59 = vpop.permute.xlu0 %1341 }
 0x2d2   : > { %v1429_v61 = vpop.permute.xlu1 %1428  ;;  %1596 = vperm.xlu1 %2665, %v3498_v37   ;;  %v1369_v24 = vsel %vm1048_vm14, %v3533_v42, %v3548_v59 }
 0x2d4   : > { %2670 = vset.pattern.permute.xlu2 %v4316_v32 }
 0x2d5   : > { %1444 = vperm.xlu2 %2670, %v3519_v16  }
 0x2d6   : > { %v3683_v52 = vpop.f32.mrf.mxu3 }
 0x2d7   : > { %2685 = vset.pattern.permute.xlu0 %v4305_v30 }
 0x2d8   : > { %1361 = vperm.xlu0 %2685, %v3543_v56  }
 0x2d9   : > { %v1469_v62 = vpop.permute.xlu2 %1468 }
 0x2da   : > { %2666 = vset.pattern.permute.xlu1 %v4313_v41  ;;  %v3556_v60 = vpop.permute.xlu0 %1432  ;;  %v3559_v39 = vsel %vm1048_vm14, %v1437_v58, %v1469_v62  ;;  %v3597_v58 = vadd.f32 %v3446_v20, %v3529_v27  ;;  %v3604_v62 = vadd.f32 %v3446_v20, %v3543_v56 }
 0x2db   : > { %v1461_v10 = vpop.permute.xlu1 %1460  ;;  %1688 = vperm.xlu1 %2666, %v3498_v37  }
 0x2dc   : > { %v3563_v14 = vsel %vm1048_vm14, %v1429_v61, %v1461_v10  ;;  %v1115_v61 = vand.u32 2147483647, %v3597_v58  ;;  %v2760_v10 = vpop.eup %2759 }
 0x2dd   : > { %2671 = vset.pattern.permute.xlu2 %v4307_v31  ;;  %v1145_v43 = vadd.f32 1.0, %v2760_v10 }
 0x2de   : > { %1476 = vperm.xlu2 %2671, %v3519_v16  }
 0x2df   : > { %2761 = vlog2.f32 %v1145_v43  ;;  %v4366_v43 = vmov 70  }
 0x2e0   : > { %2686 = vset.pattern.permute.xlu0 %v4316_v32 }
 0x2e1   : > { %1452 = vperm.xlu0 %2686, %v3543_v56  }
 0x2e2   : > { %v1561_v17 = vpop.permute.xlu2 %1560 }
 0x2e3   : > { %2667 = vset.pattern.permute.xlu1 %v4309_v54  ;;  %v3574_v18 = vpop.permute.xlu0 %1464 }
 0x2e4   : > { %v3577_v51 = vpop.permute.xlu1 %1552  ;;  %1720 = vperm.xlu1 %2667, %v3498_v37  }
 0x2e6   : > { %2672 = vset.pattern.permute.xlu2 %v4303_v33 }
 0x2e7   : > { %1568 = vperm.xlu2 %2672, %v3519_v16  }
 0x2e9   : > { %2687 = vset.pattern.permute.xlu0 %v4307_v31 }
 0x2ea   : > { %1484 = vperm.xlu0 %2687, %v3543_v56  }
 0x2eb   : > { %v1593_v15 = vpop.permute.xlu2 %1592 }
 0x2ec   : > { %2676 = vset.pattern.permute.xlu1 %v4306_v47  ;;  %v3585_v44 = vpop.permute.xlu0 %1556  ;;  %v3588_v48 = vsel %vm1048_vm14, %v1561_v17, %v1593_v15  ;;  %v1123_v15 = vsub.f32 0.0, %v1115_v61 }
 0x2ed   : > { %v3590_v53 = vpop.permute.xlu1 %1584  ;;  %1323 = vperm.xlu1 %2676, %v3529_v27  }
 0x2ef   : > { %2673 = vset.pattern.permute.xlu2 %v4311_v40 }
 0x2f0   : > { %1600 = vperm.xlu2 %2673, %v3519_v16  }
 0x2f2   : > { %2688 = vset.pattern.permute.xlu0 %v4303_v33  ;;  %v1116_v33 = vand.u32 2147483647, %v3604_v62 }
 0x2f3   : > { %1576 = vperm.xlu0 %2688, %v3543_v56  }
 0x2f4   : > { %v1685_v17 = vpop.permute.xlu2 %1684  ;;  %v1124_v47 = vsub.f32 0.0, %v1116_v33 }
 0x2f5   : > { %2677 = vset.pattern.permute.xlu1 %v4305_v30  ;;  %v3607_v19 = vpop.permute.xlu0 %1588  ;;  %v1136_v30 = vmul.f32 1.442695, %v1123_v15 }
 0x2f6   : > { %v3609_v63 = vpop.permute.xlu1 %1676  ;;  %1357 = vperm.xlu1 %2677, %v3529_v27  }
 0x2f7   : > { %2763 = vpow2.f32 %v1136_v30  ;;  %v1105_v30 = vmax.f32 %v3571_v11, 0.0  ;;  %v3650_v11 = vld [vmem:[%s4298_s10 + $0x1] ss:$0 sm:$0xff] }
 0x2f8   : > { %2674 = vset.pattern.permute.xlu2 %v4313_v41  ;;  %v2762_v41 = vpop.eup %2761 }
 0x2f9   : > { %1692 = vperm.xlu2 %2674, %v3519_v16   ;;  %v1157_v33 = vmul.f32 0.6931472, %v2762_v41  ;;  %v3644_v41 = vld [vmem:[%s4298_s10] ss:$0 sm:$0xff] }
 0x2fb   : > { %2689 = vset.pattern.permute.xlu0 %v4311_v40  ;;  %v1138_v40 = vmul.f32 1.442695, %v1124_v47  ;;  %v3637_v12 = vadd.f32 %v1157_v33, %v1105_v30  ;;  %v3655_v33 = vld [vmem:[%s4298_s10 + $0x2] ss:$0 sm:$0xff]  ;;  %v3666_v30 = vadd.f32 %v3446_v20, %v3519_v16 }
 0x2fc   : > { %1608 = vperm.xlu0 %2689, %v3543_v56  }
 0x2fd   : > { %v1717_v31 = vpop.permute.xlu2 %1716  ;;  %2765 = vpow2.f32 %v1138_v40 }
 0x2fe   : > { %2678 = vset.pattern.permute.xlu1 %v4316_v32  ;;  %v3618_v54 = vpop.permute.xlu0 %1680  ;;  %v3621_v61 = vsel %vm1048_vm14, %v1685_v17, %v1717_v31  ;;  %v2764_v31 = vpop.eup %2763  ;;  %v4367_v32 = vmov 67  }
 0x2ff   : > { %4364 = vst [vmem:[#allocation25_spill] sm:$0xff] %v3621_v61  ;;  %v3623_v10 = vpop.permute.xlu1 %1708  ;;  %1448 = vperm.xlu1 %2678, %v3529_v27   ;;  %v1147_v8 = vadd.f32 1.0, %v2764_v31  ;;  %v3660_v31 = vld [vmem:[%s4298_s10 + $0x3] ss:$0 sm:$0xff] }
 0x301   : > { %2675 = vset.pattern.permute.xlu2 %v4365_v36  ;;  %2767 = vlog2.f32 %v1147_v8 }
 0x302   : > { %1724 = vperm.xlu2 %2675, %v3519_v16  }
 0x303   : > { %v2766_v40 = vpop.eup %2765 }
 0x304   : > { %2690 = vset.pattern.permute.xlu0 %v4366_v43 }
 0x305   : > { %1700 = vperm.xlu0 %2690, %v3543_v56   ;;  %v1769_v17 = vpop.permute.xlu2 %1768 }
 0x306   : > { %1791 = vst.msk [vmem:[#allocation5 + $0x10] sm:$0xff] %vm1788_vm15, %v1769_v17  ;;  %v4368_v17 = vmov 64  }
 0x307   : > { %v1765_v15 = vpop.permute.xlu1 %1764  ;;  %2679 = vset.pattern.permute.xlu1 %v4367_v32  ;;  %v3632_v47 = vpop.permute.xlu0 %1712 }
 0x308   : > { %1789 = vst.msk [vmem:[#allocation5] sm:$0xff] %vm1788_vm15, %v1765_v15  ;;  %1480 = vperm.xlu1 %2679, %v3529_v27   ;;  %v1148_v15 = vadd.f32 1.0, %v2766_v40  ;;  %v4369_v40 = vmov 68  }
 0x30a   : > { %1196 = vrot.lane.b32.xlu2 %v3637_v12, %s2928_s26  ;;  %2769 = vlog2.f32 %v1148_v15 }
 0x30b   : > { %2692 = vset.pattern.permute.xlu2 %v4368_v17 }
 0x30d   : > { %2691 = vset.pattern.permute.xlu0 %v4365_v36  ;;  %v1193_v6 = vpop.permute.xlu2 %1192 }
 0x30e   : > { %1732 = vperm.xlu0 %2691, %v3543_v56   ;;  %v1215_v4 = vsel %vm1048_vm14, %v3513_v50, %v1193_v6  ;;  %v3680_v6 = vmul.f32 %v3637_v12, %v3373_v9  ;;  %v1114_v50 = vand.u32 2147483647, %v3666_v30 }
 0x30f   : > { %v1191_v0 = vpop.permute.xlu1 %1190  ;;  %v1767_v7 = vpop.permute.xlu0 %1766  ;;  %v1265_v1 = vmul.f32 %v3644_v41, %v1215_v4  ;;  %v1395_v26 = vmul.f32 %v3650_v11, %v1215_v4  ;;  %v1519_v21 = vmul.f32 %v3655_v33, %v1215_v4  ;;  %v1643_v17 = vmul.f32 %v3660_v31, %v1215_v4 }
 0x310   : > { %1790 = vst.msk [vmem:[#allocation5 + $0x8] sm:$0xff] %vm1788_vm15, %v1767_v7  ;;  %v1214_v8 = vsel %vm1048_vm14, %v3486_v13, %v1191_v0  ;;  %2680 = vset.pattern.permute.xlu1 %v4369_v40  ;;  %v2768_v7 = vpop.eup %2767 }
 0x311   : > { %v1274_v2 = vmul.f32 1.442695, %v1265_v1  ;;  %v1404_v46 = vmul.f32 1.442695, %v1395_v26  ;;  %v1528_v29 = vmul.f32 1.442695, %v1519_v21  ;;  %v1264_v4 = vmul.f32 %v3644_v41, %v1214_v8  ;;  %1572 = vperm.xlu1 %2680, %v3529_v27   ;;  %v2770_v35 = vpop.eup %2769 }
 0x312   : > { %v1652_v0 = vmul.f32 1.442695, %v1643_v17  ;;  %v1394_v13 = vmul.f32 %v3650_v11, %v1214_v8  ;;  %v1518_v38 = vmul.f32 %v3655_v33, %v1214_v8  ;;  %v1642_v9 = vmul.f32 %v3660_v31, %v1214_v8  ;;  %1333 = vperm.xlu2 %2692, %v3683_v52  }
 0x313   : > { %2771 = vpow2.f32 %v1274_v2  ;;  %v1272_v15 = vmul.f32 1.442695, %v1264_v4  ;;  %v1161_v5 = vmul.f32 0.6931472, %v2768_v7  ;;  %v1122_v17 = vsub.f32 0.0, %v1114_v50 }
 0x314   : > { %2773 = vpow2.f32 %v1404_v46  ;;  %v1402_v1 = vmul.f32 1.442695, %v1394_v13  ;;  %v1526_v21 = vmul.f32 1.442695, %v1518_v38  ;;  %v1650_v8 = vmul.f32 1.442695, %v1642_v9 }
 0x315   : > { %2775 = vpow2.f32 %v1528_v29  ;;  %v1233_v26 = vpop.permute.xlu2 %1232  ;;  %v1107_v29 = vmax.f32 %v3597_v58, 0.0  ;;  %v4370_v50 = vmov 69   ;;  %v1163_v42 = vmul.f32 0.6931472, %v2770_v35 }
 0x316   : > { %1236 = vrot.lane.b32.xlu0 %v3680_v6, %s2928_s26  ;;  %2777 = vpow2.f32 %v1652_v0  ;;  %v1255_v2 = vsel %vm1048_vm14, %v3523_v45, %v1233_v26  ;;  %v1134_v59 = vmul.f32 1.442695, %v1122_v17  ;;  %v4371_v45 = vmov 65  }
 0x317   : > { %v1314_v4 = vpop.permute.xlu1 %1313  ;;  %v1231_v61 = vpop.permute.xlu0 %1230  ;;  %2779 = vpow2.f32 %v1272_v15  ;;  %v1377_v46 = vmul.f32 %v1369_v24, %v1255_v2  ;;  %v3700_v7 = vadd.f32 %v1161_v5, %v1107_v29  ;;  %v1108_v58 = vmax.f32 %v3604_v62, 0.0 }
 0x318   : > { %2781 = vpow2.f32 %v1402_v1  ;;  %v1492_v0 = vsel %vm1048_vm14, %v3556_v60, %v3574_v18  ;;  %v1740_v62 = vsel %vm1048_vm14, %v3618_v54, %v3632_v47  ;;  %v1254_v17 = vsel %vm1048_vm14, %v3496_v25, %v1231_v61 }
 0x319   : > { %v2772_v38 = vpop.eup %2771  ;;  %2783 = vpow2.f32 %v1526_v21  ;;  %1385 = vst [vmem:[#allocation3 + $0x8] sm:$0xff] %v1377_v46  ;;  %2681 = vset.pattern.permute.xlu1 %v4370_v50  ;;  %v3711_v15 = vadd.f32 %v1163_v42, %v1108_v58  ;;  %v1616_v21 = vsel %vm1048_vm14, %v3585_v44, %v3607_v19  ;;  %v1500_v26 = vmul.f32 %v1492_v0, %v1255_v2 }
 0x31a   : > { %v2774_v9 = vpop.eup %2773  ;;  %1289 = vst [vmem:[#allocation2 + $0x8] sm:$0xff] %v2772_v38  ;;  %2785 = vpow2.f32 %v1650_v8  ;;  %1604 = vperm.xlu1 %2681, %v3529_v27   ;;  %2693 = vset.pattern.permute.xlu2 %v4371_v45  ;;  %v1624_v8 = vmul.f32 %v1616_v21, %v1255_v2  ;;  %v1748_v46 = vmul.f32 %v1740_v62, %v1255_v2  ;;  %v4372_v0 = vmov 66  }
 0x31b   : > { %v2776_v24 = vpop.eup %2775  ;;  %1420 = vst [vmem:[#allocation2 + $0x48] sm:$0xff] %v2774_v9  ;;  %1365 = vperm.xlu2 %2693, %v3683_v52   ;;  %2787 = vpow2.f32 %v1134_v59  ;;  %v3725_v44 = vadd.f32 %v3446_v20, %v3683_v52  ;;  %v1376_v2 = vmul.f32 %v3540_v55, %v1254_v17  ;;  %v3737_v20 = vmul.f32 %v3711_v15, %v3416_v22 }
 0x31c   : > { %v2778_v5 = vpop.eup %2777  ;;  %1544 = vst [vmem:[#allocation2 + $0x88] sm:$0xff] %v2776_v24  ;;  %v1615_v59 = vsel %vm1048_vm14, %v3577_v51, %v3590_v53  ;;  %v1499_v9 = vmul.f32 %v3563_v14, %v1254_v17  ;;  %v1739_v55 = vsel %vm1048_vm14, %v3609_v63, %v3623_v10 }
 0x31d   : > { %v2780_v35 = vpop.eup %2779  ;;  %1668 = vst [vmem:[#allocation2 + $0xc8] sm:$0xff] %v2778_v5  ;;  %v1319_v13 = vpop.permute.xlu2 %1318  ;;  %v1747_v51 = vmul.f32 %v1739_v55, %v1254_v17  ;;  %v1117_v14 = vand.u32 2147483647, %v3725_v44 }
 0x31e   : > { %1200 = vrot.lane.b32.xlu0 %v3700_v7, %s2928_s26  ;;  %v2782_v1 = vpop.eup %2781  ;;  %1288 = vst [vmem:[#allocation2] sm:$0xff] %v2780_v35 }
 0x31f   : > { %v1195_v60 = vpop.permute.xlu0 %1194  ;;  %v2784_v18 = vpop.eup %2783  ;;  %1419 = vst [vmem:[#allocation2 + $0x40] sm:$0xff] %v2782_v1  ;;  %v1125_v1 = vsub.f32 0.0, %v1117_v14 }
 0x320   : > { %v1216_v29 = vsel %vm1048_vm14, %v3504_v34, %v1195_v60  ;;  %v1350_v38 = vpop.permute.xlu1 %1349  ;;  %v2786_v19 = vpop.eup %2785  ;;  %1543 = vst [vmem:[#allocation2 + $0x80] sm:$0xff] %v2784_v18 }
 0x321   : > { %v1266_v54 = vmul.f32 %v3644_v41, %v1216_v29  ;;  %v1396_v47 = vmul.f32 %v3650_v11, %v1216_v29  ;;  %v1520_v25 = vmul.f32 %v3655_v33, %v1216_v29  ;;  %v1644_v61 = vmul.f32 %v3660_v31, %v1216_v29  ;;  %1667 = vst [vmem:[#allocation2 + $0xc0] sm:$0xff] %v2786_v19  ;;  %v2788_v58 = vpop.eup %2787 }
 0x322   : > { %v3733_v42 = vsel %vm1048_vm14, %v1314_v4, %v1350_v38  ;;  %1509 = vst [vmem:[#allocation3 + $0x48] sm:$0xff] %v1500_v26  ;;  %2682 = vset.pattern.permute.xlu1 %v4366_v43  ;;  %v1623_v4 = vmul.f32 %v1615_v59, %v1254_v17  ;;  %v1146_v21 = vadd.f32 1.0, %v2788_v58  ;;  %v1140_v60 = vmul.f32 1.442695, %v1125_v1 }
 0x323   : > { %v1276_v45 = vmul.f32 1.442695, %v1266_v54  ;;  %v1406_v24 = vmul.f32 1.442695, %v1396_v47  ;;  %1633 = vst [vmem:[#allocation3 + $0x88] sm:$0xff] %v1624_v8  ;;  %1696 = vperm.xlu1 %2682, %v3529_v27   ;;  %2694 = vset.pattern.permute.xlu2 %v4372_v0  ;;  %v3767_v29 = vmul.f32 %v3504_v34, %v3371_v3  ;;  %v1106_v54 = vmax.f32 %v3666_v30, 0.0 }
 0x324   : > { %v1530_v5 = vmul.f32 1.442695, %v1520_v25  ;;  %v1654_v35 = vmul.f32 1.442695, %v1644_v61  ;;  %1757 = vst [vmem:[#allocation3 + $0xc8] sm:$0xff] %v1748_v46  ;;  %1456 = vperm.xlu2 %2694, %v3683_v52   ;;  %v3789_v30 = vmul.f32 %v3700_v7, %v3380_v28  ;;  %v1109_v58 = vmax.f32 %v3725_v44, 0.0 }
 0x325   : > { %2789 = vpow2.f32 %v1276_v45  ;;  %1384 = vst [vmem:[#allocation3] sm:$0xff] %v1376_v2 }
 0x326   : > { %1242 = vrot.lane.b32.xlu0 %v3737_v20, %s2928_s26  ;;  %2791 = vpow2.f32 %v1406_v24  ;;  %1508 = vst [vmem:[#allocation3 + $0x40] sm:$0xff] %v1499_v9  ;;  %v1354_v53 = vpop.permute.xlu2 %1353 }
 0x327   : > { %2793 = vpow2.f32 %v1530_v5  ;;  %1632 = vst [vmem:[#allocation3 + $0x80] sm:$0xff] %v1623_v4  ;;  %v3754_v63 = vsel %vm1048_vm14, %v1319_v13, %v1354_v53 }
 0x328   : > { %2795 = vpow2.f32 %v1654_v35  ;;  %1756 = vst [vmem:[#allocation3 + $0xc0] sm:$0xff] %v1747_v51 }
 0x329   : > { %v1441_v10 = vpop.permute.xlu1 %1440  ;;  %2797 = vlog2.f32 %v1146_v21 }
 0x32a   : > { %2799 = vpow2.f32 %v1140_v60 }
 0x32b   : > { %v2790_v62 = vpop.eup %2789  ;;  %2683 = vset.pattern.permute.xlu1 %v4365_v36 }
 0x32c   : > { %v2792_v26 = vpop.eup %2791  ;;  %1290 = vst [vmem:[#allocation2 + $0x10] sm:$0xff] %v2790_v62  ;;  %1728 = vperm.xlu1 %2683, %v3529_v27   ;;  %2695 = vset.pattern.permute.xlu2 %v4367_v32 }
 0x32d   : > { %v2794_v17 = vpop.eup %2793  ;;  %1421 = vst [vmem:[#allocation2 + $0x50] sm:$0xff] %v2792_v26  ;;  %1488 = vperm.xlu2 %2695, %v3683_v52  }
 0x32e   : > { %v2796_v18 = vpop.eup %2795  ;;  %1545 = vst [vmem:[#allocation2 + $0x90] sm:$0xff] %v2794_v17  ;;  %1772 = vrot.lane.b32.xlu0 %v3519_v16, %s2927_s25 }
 0x32f   : > { %1669 = vst [vmem:[#allocation2 + $0xd0] sm:$0xff] %v2796_v18  ;;  %v1445_v13 = vpop.permute.xlu2 %1444  ;;  %v2798_v32 = vpop.eup %2797 }
 0x330   : > { %v2800_v16 = vpop.eup %2799  ;;  %v1159_v38 = vmul.f32 0.6931472, %v2798_v32 }
 0x331   : > { %v1149_v34 = vadd.f32 1.0, %v2800_v16 }
 0x332   : > { %v1473_v8 = vpop.permute.xlu1 %1472  ;;  %v3781_v61 = vadd.f32 %v1159_v38, %v1106_v54 }
 0x333   : > { %v3763_v46 = vsel %vm1048_vm14, %v1441_v10, %v1473_v8  ;;  %2801 = vlog2.f32 %v1149_v34 }
 0x334   : > { %1234 = vrot.lane.b32.xlu1 %v3767_v29, %s2928_s26  ;;  %v3816_v51 = vmul.f32 %v3781_v61, %v3378_v23 }
 0x335   : > { %2696 = vset.pattern.permute.xlu2 %v4369_v40 }
 0x336   : > { %1778 = vrot.lane.b32.xlu0 %v3683_v52, %s2927_s25  ;;  %1580 = vperm.xlu2 %2696, %v3683_v52  }
 0x338   : > { %v1477_v19 = vpop.permute.xlu2 %1476 }
 0x339   : > { %v3777_v47 = vsel %vm1048_vm14, %v1445_v13, %v1477_v19  ;;  %v2802_v59 = vpop.eup %2801 }
 0x33a   : > { %v1165_v45 = vmul.f32 0.6931472, %v2802_v59 }
 0x33b   : > { %v3779_v25 = vpop.permute.xlu1 %1564 }
 0x33c   : > { %1198 = vrot.lane.b32.xlu1 %v3781_v61, %s2928_s26  ;;  %v3801_v4 = vadd.f32 %v1165_v45, %v1109_v58 }
 0x33e   : > { %2697 = vset.pattern.permute.xlu2 %v4370_v50  ;;  %v3839_v60 = vmul.f32 %v3801_v4, %v3418_v57 }
 0x33f   : > { %1612 = vperm.xlu2 %2697, %v3683_v52  }
 0x341   : > { %v1329_v40 = vpop.permute.xlu0 %1328  ;;  %v1569_v2 = vpop.permute.xlu2 %1568 }
 0x344   : > { %v3791_v9 = vpop.permute.xlu1 %1596  ;;  %1240 = vrot.lane.b32.xlu1 %v3789_v30, %s2928_s26 }
 0x347   : > { %2698 = vset.pattern.permute.xlu2 %v4366_v43 }
 0x348   : > { %1704 = vperm.xlu2 %2698, %v3683_v52  }
 0x34a   : > { %v1362_v24 = vpop.permute.xlu0 %1361  ;;  %v1601_v55 = vpop.permute.xlu2 %1600 }
 0x34b   : > { %v3798_v50 = vsel %vm1048_vm14, %v1329_v40, %v1362_v24  ;;  %v3804_v5 = vsel %vm1048_vm14, %v1569_v2, %v1601_v55 }
 0x34c   : > { %1204 = vrot.lane.b32.xlu1 %v3801_v4, %s2928_s26 }
 0x34d   : > { %v1689_v35 = vpop.permute.xlu1 %1688 }
 0x350   : > { %2699 = vset.pattern.permute.xlu2 %v4365_v36 }
 0x351   : > { %1736 = vperm.xlu2 %2699, %v3683_v52  }
 0x353   : > { %v3809_v43 = vpop.permute.xlu0 %1452  ;;  %v1693_v0 = vpop.permute.xlu2 %1692 }
 0x354   : > { %1770 = vrot.lane.b32.xlu1 %v3498_v37, %s2927_s25 }
 0x356   : > { %v1721_v44 = vpop.permute.xlu1 %1720 }
 0x359   : > { %1238 = vrot.lane.b32.xlu2 %v3816_v51, %s2928_s26 }
 0x35c   : > { %v3820_v14 = vpop.permute.xlu0 %1484  ;;  %v1725_v53 = vpop.permute.xlu2 %1724  ;;  %1776 = vrot.lane.b32.xlu1 %v3543_v56, %s2927_s25 }
 0x35d   : > { %v3825_v36 = vsel %vm1048_vm14, %v1693_v0, %v1725_v53 }
 0x35f   : > { %v1324_v52 = vpop.permute.xlu1 %1323 }
 0x361   : > { %1202 = vrot.lane.b32.xlu2 %v3711_v15, %s2928_s26 }
 0x364   : > { %v1197_v10 = vpop.permute.xlu2 %1196 }
 0x365   : > { %v3829_v37 = vpop.permute.xlu0 %1576  ;;  %v1217_v1 = vsel %vm1048_vm14, %v3637_v12, %v1197_v10 }
 0x366   : > { %v1267_v21 = vmul.f32 %v3644_v41, %v1217_v1  ;;  %v1397_v62 = vmul.f32 %v3650_v11, %v1217_v1  ;;  %v1521_v26 = vmul.f32 %v3655_v33, %v1217_v1  ;;  %v1645_v56 = vmul.f32 %v3660_v31, %v1217_v1 }
 0x367   : > { %v1742_v1 = vsel %vm1048_vm14, %v1689_v35, %v1721_v44 }
 0x368   : > { %v1358_v17 = vpop.permute.xlu1 %1357  ;;  %v1278_v18 = vmul.f32 1.442695, %v1267_v21  ;;  %v1408_v13 = vmul.f32 1.442695, %v1397_v62  ;;  %v1532_v8 = vmul.f32 1.442695, %v1521_v26 }
 0x369   : > { %v3842_v32 = vsel %vm1048_vm14, %v1324_v52, %v1358_v17  ;;  %v1656_v12 = vmul.f32 1.442695, %v1645_v56  ;;  %1244 = vrot.lane.b32.xlu2 %v3839_v60, %s2928_s26 }
 0x36a   : > { %2803 = vpow2.f32 %v1278_v18 }
 0x36b   : > { %2805 = vpow2.f32 %v1408_v13 }
 0x36c   : > { %2807 = vpow2.f32 %v1532_v8  ;;  %v1334_v38 = vpop.permute.xlu2 %1333 }
 0x36d   : > { %2809 = vpow2.f32 %v1656_v12 }
 0x36e   : > { %v1609_v16 = vpop.permute.xlu0 %1608 }
 0x370   : > { %v2804_v19 = vpop.eup %2803 }
 0x371   : > { %v3846_v54 = vpop.permute.xlu1 %1448  ;;  %v2806_v34 = vpop.eup %2805  ;;  %1291 = vst [vmem:[#allocation2 + $0x18] sm:$0xff] %v2804_v19  ;;  %1774 = vrot.lane.b32.xlu2 %v3529_v27, %s2927_s25  ;;  %v1618_v27 = vsel %vm1048_vm14, %v3779_v25, %v3791_v9 }
 0x372   : > { %v2808_v40 = vpop.eup %2807  ;;  %1422 = vst [vmem:[#allocation2 + $0x58] sm:$0xff] %v2806_v34 }
 0x373   : > { %v2810_v2 = vpop.eup %2809  ;;  %1546 = vst [vmem:[#allocation2 + $0x98] sm:$0xff] %v2808_v40 }
 0x374   : > { %1670 = vst [vmem:[#allocation2 + $0xd8] sm:$0xff] %v2810_v2 }
 0x375   : > { %v1366_v45 = vpop.permute.xlu2 %1365 }
 0x376   : > { %v3851_v24 = vsel %vm1048_vm14, %v1334_v38, %v1366_v45 }
 0x377   : > { %v1701_v59 = vpop.permute.xlu0 %1700 }
 0x37a   : > { %v3853_v58 = vpop.permute.xlu1 %1480 }
 0x37e   : > { %v1457_v0 = vpop.permute.xlu2 %1456 }
 0x380   : > { %v1733_v55 = vpop.permute.xlu0 %1732 }
 0x383   : > { %v3855_v53 = vpop.permute.xlu1 %1572 }
 0x387   : > { %v1489_v21 = vpop.permute.xlu2 %1488 }
 0x388   : > { %v1237_v52 = vpop.permute.xlu0 %1236  ;;  %v3866_v17 = vsel %vm1048_vm14, %v1457_v0, %v1489_v21 }
 0x389   : > { %v1257_v10 = vsel %vm1048_vm14, %v3680_v6, %v1237_v52  ;;  %v1497_v52 = vsel %vm1048_vm14, %v3809_v43, %v3820_v14 }
 0x38a   : > { %v1379_v62 = vmul.f32 %v3733_v42, %v1257_v10  ;;  %v1502_v26 = vmul.f32 %v3763_v46, %v1257_v10  ;;  %v1626_v56 = vmul.f32 %v1618_v27, %v1257_v10  ;;  %v1750_v18 = vmul.f32 %v1742_v1, %v1257_v10 }
 0x38b   : > { %v1621_v1 = vsel %vm1048_vm14, %v3829_v37, %v1609_v16 }
 0x38c   : > { %1387 = vst [vmem:[#allocation3 + $0x18] sm:$0xff] %v1379_v62  ;;  %v3868_v25 = vpop.permute.xlu1 %1604 }
 0x38d   : > { %1511 = vst [vmem:[#allocation3 + $0x58] sm:$0xff] %v1502_v26 }
 0x38e   : > { %1635 = vst [vmem:[#allocation3 + $0x98] sm:$0xff] %v1626_v56 }
 0x38f   : > { %1759 = vst [vmem:[#allocation3 + $0xd8] sm:$0xff] %v1750_v18 }
 0x390   : > { %v1201_v9 = vpop.permute.xlu0 %1200  ;;  %v3876_v13 = vpop.permute.xlu2 %1580 }
 0x391   : > { %v1219_v6 = vsel %vm1048_vm14, %v3700_v7, %v1201_v9 }
 0x392   : > { %v1269_v35 = vmul.f32 %v3644_v41, %v1219_v6  ;;  %v1399_v42 = vmul.f32 %v3650_v11, %v1219_v6  ;;  %v1523_v46 = vmul.f32 %v3655_v33, %v1219_v6  ;;  %v1647_v44 = vmul.f32 %v3660_v31, %v1219_v6  ;;  %v4373_v6 = vld [vmem:[#allocation25_spill] sm:$0xff] }
 0x394   : > { %v1282_v8 = vmul.f32 1.442695, %v1269_v35  ;;  %v1412_v12 = vmul.f32 1.442695, %v1399_v42  ;;  %v1536_v38 = vmul.f32 1.442695, %v1523_v46 }
 0x395   : > { %v1660_v19 = vmul.f32 1.442695, %v1647_v44  ;;  %v3878_v34 = vpop.permute.xlu1 %1696 }
 0x396   : > { %2811 = vpow2.f32 %v1282_v8 }
 0x397   : > { %2813 = vpow2.f32 %v1412_v12 }
 0x398   : > { %2815 = vpow2.f32 %v1536_v38  ;;  %v1243_v7 = vpop.permute.xlu0 %1242 }
 0x399   : > { %2817 = vpow2.f32 %v1660_v19  ;;  %v1260_v40 = vsel %vm1048_vm14, %v3737_v20, %v1243_v7  ;;  %v3882_v45 = vpop.permute.xlu2 %1612  ;;  %v1745_v20 = vsel %vm1048_vm14, %v1701_v59, %v1733_v55 }
 0x39a   : > { %v1382_v27 = vmul.f32 %v3798_v50, %v1260_v40  ;;  %v1505_v21 = vmul.f32 %v1497_v52, %v1260_v40  ;;  %v1629_v26 = vmul.f32 %v1621_v1, %v1260_v40  ;;  %v1753_v56 = vmul.f32 %v1745_v20, %v1260_v40 }
 0x39c   : > { %v2812_v2 = vpop.eup %2811  ;;  %1390 = vst [vmem:[#allocation3 + $0x30] sm:$0xff] %v1382_v27 }
 0x39d   : > { %v2814_v0 = vpop.eup %2813  ;;  %1293 = vst [vmem:[#allocation2 + $0x28] sm:$0xff] %v2812_v2 }
 0x39e   : > { %v2816_v10 = vpop.eup %2815  ;;  %1424 = vst [vmem:[#allocation2 + $0x68] sm:$0xff] %v2814_v0  ;;  %v1729_v18 = vpop.permute.xlu1 %1728 }
 0x39f   : > { %v2818_v62 = vpop.eup %2817  ;;  %1548 = vst [vmem:[#allocation2 + $0xa8] sm:$0xff] %v2816_v10 }
 0x3a0   : > { %1672 = vst [vmem:[#allocation2 + $0xe8] sm:$0xff] %v2818_v62  ;;  %v1773_v43 = vpop.permute.xlu0 %1772 }
 0x3a1   : > { %1514 = vst [vmem:[#allocation3 + $0x70] sm:$0xff] %v1505_v21 }
 0x3a2   : > { %1638 = vst [vmem:[#allocation3 + $0xb0] sm:$0xff] %v1629_v26  ;;  %v3892_v50 = vpop.permute.xlu2 %1704 }
 0x3a3   : > { %1762 = vst [vmem:[#allocation3 + $0xf0] sm:$0xff] %v1753_v56 }
 0x3a4   : > { %1793 = vst.msk [vmem:[#allocation5 + $0x20] sm:$0xff] %vm1788_vm15, %v1773_v43 }
 0x3a6   : > { %v1235_v14 = vpop.permute.xlu1 %1234 }
 0x3a7   : > { %v1256_v37 = vsel %vm1048_vm14, %v3767_v29, %v1235_v14 }
 0x3a8   : > { %v1779_v16 = vpop.permute.xlu0 %1778  ;;  %v1378_v59 = vmul.f32 %v3536_v49, %v1256_v37  ;;  %v1501_v55 = vmul.f32 %v3559_v39, %v1256_v37  ;;  %v1625_v9 = vmul.f32 %v3588_v48, %v1256_v37  ;;  %v1749_v35 = vmul.f32 %v4373_v6, %v1256_v37 }
 0x3a9   : > { %1796 = vst.msk [vmem:[#allocation5 + $0x38] sm:$0xff] %vm1788_vm15, %v1779_v16 }
 0x3aa   : > { %1386 = vst [vmem:[#allocation3 + $0x10] sm:$0xff] %v1378_v59 }
 0x3ab   : > { %1510 = vst [vmem:[#allocation3 + $0x50] sm:$0xff] %v1501_v55  ;;  %v3901_v42 = vpop.permute.xlu2 %1736 }
 0x3ac   : > { %1634 = vst [vmem:[#allocation3 + $0x90] sm:$0xff] %v1625_v9 }
 0x3ad   : > { %1758 = vst [vmem:[#allocation3 + $0xd0] sm:$0xff] %v1749_v35 }
 0x3ae   : > { %v1199_v46 = vpop.permute.xlu1 %1198 }
 0x3af   : > { %v1218_v29 = vsel %vm1048_vm14, %v3781_v61, %v1199_v46 }
 0x3b0   : > { %v1268_v49 = vmul.f32 %v3644_v41, %v1218_v29  ;;  %v1398_v39 = vmul.f32 %v3650_v11, %v1218_v29  ;;  %v1522_v48 = vmul.f32 %v3655_v33, %v1218_v29  ;;  %v1646_v44 = vmul.f32 %v3660_v31, %v1218_v29 }
 0x3b2   : > { %v1280_v8 = vmul.f32 1.442695, %v1268_v49  ;;  %v1410_v12 = vmul.f32 1.442695, %v1398_v39  ;;  %v1534_v38 = vmul.f32 1.442695, %v1522_v48 }
 0x3b3   : > { %v1658_v19 = vmul.f32 1.442695, %v1646_v44  ;;  %v1239_v7 = vpop.permute.xlu2 %1238 }
 0x3b4   : > { %2819 = vpow2.f32 %v1280_v8  ;;  %v1258_v40 = vsel %vm1048_vm14, %v3816_v51, %v1239_v7 }
 0x3b5   : > { %2821 = vpow2.f32 %v1410_v12  ;;  %v1380_v61 = vmul.f32 %v3754_v63, %v1258_v40  ;;  %v1503_v2 = vmul.f32 %v3777_v47, %v1258_v40  ;;  %v1627_v0 = vmul.f32 %v3804_v5, %v1258_v40 }
 0x3b6   : > { %2823 = vpow2.f32 %v1534_v38  ;;  %v1751_v52 = vmul.f32 %v3825_v36, %v1258_v40  ;;  %v1241_v27 = vpop.permute.xlu1 %1240  ;;  %v1496_v63 = vsel %vm1048_vm14, %v3846_v54, %v3853_v58  ;;  %v1620_v47 = vsel %vm1048_vm14, %v3855_v53, %v3868_v25 }
 0x3b7   : > { %2825 = vpow2.f32 %v1658_v19  ;;  %1388 = vst [vmem:[#allocation3 + $0x20] sm:$0xff] %v1380_v61  ;;  %v1259_v10 = vsel %vm1048_vm14, %v3789_v30, %v1241_v27  ;;  %v1744_v30 = vsel %vm1048_vm14, %v3878_v34, %v1729_v18  ;;  %v1746_v38 = vsel %vm1048_vm14, %v3892_v50, %v3901_v42 }
 0x3b8   : > { %1512 = vst [vmem:[#allocation3 + $0x60] sm:$0xff] %v1503_v2  ;;  %v1381_v5 = vmul.f32 %v3842_v32, %v1259_v10  ;;  %v1504_v62 = vmul.f32 %v1496_v63, %v1259_v10  ;;  %v1628_v20 = vmul.f32 %v1620_v47, %v1259_v10  ;;  %v1752_v25 = vmul.f32 %v1744_v30, %v1259_v10 }
 0x3b9   : > { %1636 = vst [vmem:[#allocation3 + $0xa0] sm:$0xff] %v1627_v0  ;;  %v3957_v50 = vmov 0.0  }
 0x3ba   : > { %v2820_v1 = vpop.eup %2819  ;;  %1760 = vst [vmem:[#allocation3 + $0xe0] sm:$0xff] %v1751_v52 }
 0x3bb   : > { %v2822_v51 = vpop.eup %2821  ;;  %1292 = vst [vmem:[#allocation2 + $0x20] sm:$0xff] %v2820_v1  ;;  %v1203_v36 = vpop.permute.xlu2 %1202 }
 0x3bc   : > { %v2824_v21 = vpop.eup %2823  ;;  %1423 = vst [vmem:[#allocation2 + $0x60] sm:$0xff] %v2822_v51  ;;  %v1220_v26 = vsel %vm1048_vm14, %v3711_v15, %v1203_v36 }
 0x3bd   : > { %v2826_v56 = vpop.eup %2825  ;;  %1547 = vst [vmem:[#allocation2 + $0xa0] sm:$0xff] %v2824_v21  ;;  %v1270_v54 = vmul.f32 %v3644_v41, %v1220_v26  ;;  %v1400_v58 = vmul.f32 %v3650_v11, %v1220_v26  ;;  %v1524_v53 = vmul.f32 %v3655_v33, %v1220_v26  ;;  %v1648_v32 = vmul.f32 %v3660_v31, %v1220_v26 }
 0x3be   : > { %1671 = vst [vmem:[#allocation2 + $0xe0] sm:$0xff] %v2826_v56  ;;  %v1205_v43 = vpop.permute.xlu1 %1204 }
 0x3bf   : > { %1389 = vst [vmem:[#allocation3 + $0x28] sm:$0xff] %v1381_v5  ;;  %v1284_v34 = vmul.f32 1.442695, %v1270_v54  ;;  %v1414_v18 = vmul.f32 1.442695, %v1400_v58  ;;  %v1221_v14 = vsel %vm1048_vm14, %v3801_v4, %v1205_v43 }
 0x3c0   : > { %1513 = vst [vmem:[#allocation3 + $0x68] sm:$0xff] %v1504_v62  ;;  %v1538_v15 = vmul.f32 1.442695, %v1524_v53  ;;  %v1662_v37 = vmul.f32 1.442695, %v1648_v32  ;;  %v1271_v16 = vmul.f32 %v3644_v41, %v1221_v14  ;;  %v1401_v59 = vmul.f32 %v3650_v11, %v1221_v14 }
 0x3c1   : > { %1637 = vst [vmem:[#allocation3 + $0xa8] sm:$0xff] %v1628_v20  ;;  %2827 = vpow2.f32 %v1284_v34  ;;  %v1525_v55 = vmul.f32 %v3655_v33, %v1221_v14  ;;  %v1649_v9 = vmul.f32 %v3660_v31, %v1221_v14 }
 0x3c2   : > { %1761 = vst [vmem:[#allocation3 + $0xe8] sm:$0xff] %v1752_v25  ;;  %2829 = vpow2.f32 %v1414_v18  ;;  %v1286_v6 = vmul.f32 1.442695, %v1271_v16  ;;  %v1416_v35 = vmul.f32 1.442695, %v1401_v59 }
 0x3c3   : > { %2831 = vpow2.f32 %v1538_v15  ;;  %v1540_v46 = vmul.f32 1.442695, %v1525_v55  ;;  %v1245_v4 = vpop.permute.xlu2 %1244  ;;  %v1664_v29 = vmul.f32 1.442695, %v1649_v9 }
 0x3c4   : > { %2833 = vpow2.f32 %v1662_v37  ;;  %v1261_v41 = vsel %vm1048_vm14, %v3839_v60, %v1245_v4  ;;  %v1622_v60 = vsel %vm1048_vm14, %v3876_v13, %v3882_v45  ;;  %v3953_v13 = vmov 0.0  }
 0x3c5   : > { %2835 = vpow2.f32 %v1286_v6  ;;  %v1383_v11 = vmul.f32 %v3851_v24, %v1261_v41  ;;  %v1506_v24 = vmul.f32 %v3866_v17, %v1261_v41  ;;  %v1630_v19 = vmul.f32 %v1622_v60, %v1261_v41 }
 0x3c6   : > { %2837 = vpow2.f32 %v1416_v35  ;;  %v1771_v31 = vpop.permute.xlu1 %1770  ;;  %v1754_v40 = vmul.f32 %v1746_v38, %v1261_v41  ;;  %v3951_v17 = vmov 0.0   ;;  %v3955_v45 = vmov 0.0  }
 0x3c7   : > { %v2828_v49 = vpop.eup %2827  ;;  %2839 = vpow2.f32 %v1540_v46  ;;  %1391 = vst [vmem:[#allocation3 + $0x38] sm:$0xff] %v1383_v11 }
 0x3c8   : > { %v2830_v33 = vpop.eup %2829  ;;  %1294 = vst [vmem:[#allocation2 + $0x30] sm:$0xff] %v2828_v49  ;;  %2841 = vpow2.f32 %v1664_v29 }
 0x3c9   : > { %v2832_v39 = vpop.eup %2831  ;;  %1425 = vst [vmem:[#allocation2 + $0x70] sm:$0xff] %v2830_v33 }
 0x3ca   : > { %v2834_v48 = vpop.eup %2833  ;;  %1549 = vst [vmem:[#allocation2 + $0xb0] sm:$0xff] %v2832_v39 }
 0x3cb   : > { %v2836_v44 = vpop.eup %2835  ;;  %1673 = vst [vmem:[#allocation2 + $0xf0] sm:$0xff] %v2834_v48  ;;  %v1775_v61 = vpop.permute.xlu2 %1774 }
 0x3cc   : > { %v2838_v8 = vpop.eup %2837  ;;  %1295 = vst [vmem:[#allocation2 + $0x38] sm:$0xff] %v2836_v44 }
 0x3cd   : > { %v2840_v12 = vpop.eup %2839  ;;  %1426 = vst [vmem:[#allocation2 + $0x78] sm:$0xff] %v2838_v8 }
 0x3ce   : > { %v2842_v7 = vpop.eup %2841  ;;  %1550 = vst [vmem:[#allocation2 + $0xb8] sm:$0xff] %v2840_v12  ;;  %v1777_v2 = vpop.permute.xlu1 %1776 }
 0x3cf   : > { %1674 = vst [vmem:[#allocation2 + $0xf8] sm:$0xff] %v2842_v7 }
 0x3d0   : > { %1515 = vst [vmem:[#allocation3 + $0x78] sm:$0xff] %v1506_v24 }
 0x3d1   : > { %1639 = vst [vmem:[#allocation3 + $0xb8] sm:$0xff] %v1630_v19 }
 0x3d2   : > { %1763 = vst [vmem:[#allocation3 + $0xf8] sm:$0xff] %v1754_v40 }
 0x3d3   : > { %1792 = vst.msk [vmem:[#allocation5 + $0x18] sm:$0xff] %vm1788_vm15, %v1771_v31 }
 0x3d4   : > { %1794 = vst.msk [vmem:[#allocation5 + $0x28] sm:$0xff] %vm1788_vm15, %v1775_v61 }
 0x3d5   : > { %1795 = vst.msk [vmem:[#allocation5 + $0x30] sm:$0xff] %vm1788_vm15, %v1777_v2 }
 0x3d6 LB: >> { %v2929_v42 = vmov 2   ;;  %v2930_v0 = vmov 0   ;;  %s3971_s23 = sshll.u32 %s2916_s22, 3  ;;  %v2931_v52 = vmov 4   ;;  %v2932_v10 = vmov 3   ;;  %s1802_s22 = sadd.s32 1, %s2916_s22   ;;  %s2916_s22 = sphi %s3959_s22, %s1802_s22   ;;  %v2912_v50 = vphi %v3957_v50, %v4375_v50   ;;  %v2908_v45 = vphi %v3955_v45, %v4374_v45   ;;  %v2904_v13 = vphi %v3953_v13, %v4117_v13   ;;  %v2900_v17 = vphi %v3951_v17, %v2079_v17  }
 0x3d7   : >> { %2845 = vset.pattern.permute.xlu1 %v2929_v42  ;;  %2843 = vset.pattern.permute.xlu0 %v2930_v0  ;;  %s1808_s25 = scalar_lea.vmem [#allocation5], %s3971_s23  ;;  %v2933_v1 = vmov 1   ;;  %v2934_v51 = vmov 5   ;;  %v2935_v63 = vmov 6   ;;  %v2936_v47 = vmov 7   ;;  %s1810_s28 = scalar_lea.vmem [#allocation2], %s3971_s23 }
 0x3d8   : >> { %2847 = vset.pattern.permute.xlu2 %v2931_v52  ;;  %v3975_v5 = vld [vmem:[%s1810_s28 + $0x80] sm:$0xff]  ;;  %v1880_v36 = vrot.slane %v2904_v13, 7  ;;  %s1821_s15 = scalar_lea.vmem [#allocation3], %s3971_s23  ;;  %v1873_v54 = vrot.slane %v2908_v45, 7  ;;  %v1867_v53 = vrot.slane %v2912_v50, 7  ;;  %v1887_v29 = vrot.slane %v2900_v17, 7 }
 0x3d9   : >> { %v3978_v21 = vld [vmem:[%s1821_s15 + $0x80] sm:$0xff]  ;;  %vm2085_vm1 = vcmask 1043456   ;;  %vm2087_vm2 = vcmask 1044480   ;;  %vm2089_vm3 = vcmask 1045504   ;;  %vm2091_vm4 = vcmask 1046528   ;;  %s2093_s18 = scalar_lea.vmem [#allocation4], %s3971_s23 }
 0x3da   : >> { %v1882_v30 = vmul.f32 %v3975_v5, %v1880_v36  ;;  %v3984_v20 = vld [vmem:[%s1810_s28 + $0x40] sm:$0xff]  ;;  %p1799_p4 = scmp.ge.s32.totalorder %s1802_s22, 8  }
 0x3db   : >> { %v3987_v56 = vld [vmem:[%s1810_s28] sm:$0xff]  ;;  %v1875_v25 = vmul.f32 %v3984_v20, %v1873_v54 }
 0x3dc   : >> { %v1809_v27 = vld [vmem:[%s1808_s25] sm:$0xff]  ;;  %v3982_v62 = vadd.f32 %v3978_v21, %v1882_v30  ;;  %v1869_v34 = vmul.f32 %v1867_v53, %v3987_v56 }
 0x3dd   : >> { %1840 = vperm.xlu1 %2845, %v1809_v27   ;;  %1831 = vperm.xlu0 %2843, %v1809_v27   ;;  %v3989_v58 = vld [vmem:[%s1821_s15 + $0x40] sm:$0xff] }
 0x3de   : >> { %1849 = vperm.xlu2 %2847, %v1809_v27   ;;  %v1907_v26 = vrot.slane %v3982_v62, 7  ;;  %v3991_v32 = vld [vmem:[%s1821_s15] sm:$0xff]  ;;  %v3997_v18 = vadd.f32 %v3989_v58, %v1875_v25 }
 0x3df   : >> { %v4000_v14 = vadd.f32 %v1869_v34, %v3991_v32  ;;  %v4012_v6 = vld [vmem:[%s1810_s28 + $0xc0] sm:$0xff] }
 0x3e0   : >> { %v1909_v43 = vmul.f32 %v3975_v5, %v1907_v26  ;;  %v1900_v15 = vrot.slane %v3997_v18, 7  ;;  %v4020_v41 = vld [vmem:[%s1821_s15 + $0xc0] sm:$0xff]  ;;  %v1889_v49 = vmul.f32 %v4012_v6, %v1887_v29 }
 0x3e1   : >> { %v1894_v59 = vrot.slane %v4000_v14, 7 }
 0x3e2   : >> { %v4004_v37 = vadd.f32 %v3978_v21, %v1909_v43  ;;  %v1902_v16 = vmul.f32 %v3984_v20, %v1900_v15  ;;  %v4027_v39 = vadd.f32 %v4020_v41, %v1889_v49 }
 0x3e3   : >> { %v1896_v9 = vmul.f32 %v1894_v59, %v3987_v56 }
 0x3e4   : >> { %v4009_v55 = vadd.f32 %v3989_v58, %v1902_v16  ;;  %v1934_v35 = vrot.slane %v4004_v37, 7  ;;  %v1914_v44 = vrot.slane %v4027_v39, 7 }
 0x3e5   : >> { %2846 = vset.pattern.permute.xlu1 %v2932_v10  ;;  %2844 = vset.pattern.permute.xlu0 %v2933_v1  ;;  %v4017_v4 = vadd.f32 %v1896_v9, %v3991_v32 }
 0x3e6   : >> { %1844 = vperm.xlu1 %2846, %v1809_v27   ;;  %1835 = vperm.xlu0 %2844, %v1809_v27   ;;  %v1927_v46 = vrot.slane %v4009_v55, 7  ;;  %v1936_v33 = vmul.f32 %v3975_v5, %v1934_v35  ;;  %v1916_v24 = vmul.f32 %v4012_v6, %v1914_v44 }
 0x3e7   : >> { %2848 = vset.pattern.permute.xlu2 %v2934_v51  ;;  %v1921_v11 = vrot.slane %v4017_v4, 7 }
 0x3e8   : >> { %1853 = vperm.xlu2 %2848, %v1809_v27   ;;  %v1929_v31 = vmul.f32 %v3984_v20, %v1927_v46  ;;  %v4032_v8 = vadd.f32 %v3978_v21, %v1936_v33  ;;  %v4042_v38 = vadd.f32 %v4020_v41, %v1916_v24 }
 0x3e9   : >> { %v1923_v48 = vmul.f32 %v1921_v11, %v3987_v56 }
 0x3ea   : >> { %v4035_v60 = vadd.f32 %v3989_v58, %v1929_v31  ;;  %v1961_v19 = vrot.slane %v4032_v8, 7  ;;  %v1941_v40 = vrot.slane %v4042_v38, 7 }
 0x3eb   : >> { %v4039_v12 = vadd.f32 %v1923_v48, %v3991_v32 }
 0x3ec   : >> { %v1954_v7 = vrot.slane %v4035_v60, 7  ;;  %v1943_v2 = vmul.f32 %v4012_v6, %v1941_v40  ;;  %v1963_v17 = vmul.f32 %v3975_v5, %v1961_v19 }
 0x3ed   : >> { %v1948_v61 = vrot.slane %v4039_v12, 7 }
 0x3ee   : >> { %2849 = vset.pattern.permute.xlu1 %v2935_v63  ;;  %2851 = vset.pattern.permute.xlu0 %v2936_v47  ;;  %v1956_v13 = vmul.f32 %v3984_v20, %v1954_v7  ;;  %v4052_v45 = vadd.f32 %v4020_v41, %v1943_v2  ;;  %v4057_v0 = vadd.f32 %v3978_v21, %v1963_v17 }
 0x3ef   : >> { %1858 = vperm.xlu1 %2849, %v1809_v27   ;;  %v1950_v50 = vmul.f32 %v1948_v61, %v3987_v56 }
 0x3f0   : >> { %2850 = vset.pattern.permute.xlu2 %v2936_v47  ;;  %v1968_v42 = vrot.slane %v4052_v45, 7  ;;  %v1957_v52 = vadd.f32 %v3989_v58, %v1956_v13  ;;  %v1988_v1 = vrot.slane %v4057_v0, 7 }
 0x3f1   : >> { %1862 = vperm.xlu2 %2850, %v1809_v27   ;;  %v4061_v27 = vadd.f32 %v1950_v50, %v3991_v32 }
 0x3f2   : >> { %v1970_v10 = vmul.f32 %v4012_v6, %v1968_v42  ;;  %v1981_v51 = vrot.slane %v1957_v52, 7  ;;  %v1990_v36 = vmul.f32 %v3975_v5, %v1988_v1 }
 0x3f3   : >> { %v1975_v63 = vrot.slane %v4061_v27, 7 }
 0x3f4   : >> { %v4067_v47 = vadd.f32 %v4020_v41, %v1970_v10  ;;  %v1983_v30 = vmul.f32 %v3984_v20, %v1981_v51  ;;  %v4074_v53 = vadd.f32 %v3978_v21, %v1990_v36 }
 0x3f5   : >> { %v1977_v26 = vmul.f32 %v1975_v63, %v3987_v56 }
 0x3f6   : >> { %v1995_v54 = vrot.slane %v4067_v47, 7  ;;  %v1984_v25 = vadd.f32 %v3989_v58, %v1983_v30  ;;  %v2015_v15 = vrot.slane %v4074_v53, 7 }
 0x3f7   : >> { %v1978_v43 = vadd.f32 %v1977_v26, %v3991_v32 }
 0x3f8   : >> { %v1997_v34 = vmul.f32 %v4012_v6, %v1995_v54  ;;  %v2008_v16 = vrot.slane %v1984_v25, 7  ;;  %v2017_v35 = vmul.f32 %v3975_v5, %v2015_v15 }
 0x3f9   : >> { %v2002_v59 = vrot.slane %v1978_v43, 7 }
 0x3fa   : >> { %v4081_v9 = vadd.f32 %v4020_v41, %v1997_v34  ;;  %v2010_v46 = vmul.f32 %v3984_v20, %v2008_v16  ;;  %v4088_v49 = vadd.f32 %v3978_v21, %v2017_v35 }
 0x3fb   : >> { %v2004_v29 = vmul.f32 %v2002_v59, %v3987_v56 }
 0x3fc   : >> { %v2022_v11 = vrot.slane %v4081_v9, 7  ;;  %v2011_v33 = vadd.f32 %v3989_v58, %v2010_v46  ;;  %v2042_v44 = vrot.slane %v4088_v49, 7 }
 0x3fd   : >> { %v2005_v31 = vadd.f32 %v2004_v29, %v3991_v32 }
 0x3fe   : >> { %v2024_v48 = vmul.f32 %v4012_v6, %v2022_v11  ;;  %v2035_v24 = vrot.slane %v2011_v33, 7  ;;  %v2044_v40 = vmul.f32 %v3975_v5, %v2042_v44 }
 0x3ff   : >> { %v2029_v19 = vrot.slane %v2005_v31, 7 }
 0x400   : >> { %v4095_v7 = vadd.f32 %v4020_v41, %v2024_v48  ;;  %v2037_v61 = vmul.f32 %v3984_v20, %v2035_v24  ;;  %v4102_v50 = vadd.f32 %v3978_v21, %v2044_v40 }
 0x401   : >> { %v2031_v17 = vmul.f32 %v2029_v19, %v3987_v56 }
 0x402   : >> { %v2049_v13 = vrot.slane %v4095_v7, 7  ;;  %v2038_v42 = vadd.f32 %v3989_v58, %v2037_v61  ;;  %v2069_v36 = vrot.slane %v4102_v50, 7 }
 0x403   : >> { %v2032_v51 = vadd.f32 %v2031_v17, %v3991_v32 }
 0x404   : >> { %v2051_v63 = vmul.f32 %v4012_v6, %v2049_v13  ;;  %v2062_v30 = vrot.slane %v2038_v42, 7  ;;  %v2071_v15 = vmul.f32 %v3975_v5, %v2069_v36 }
 0x405   : >> { %v2056_v26 = vrot.slane %v2032_v51, 7 }
 0x406   : >> { %v4109_v54 = vadd.f32 %v4020_v41, %v2051_v63  ;;  %v2064_v16 = vmul.f32 %v3984_v20, %v2062_v30  ;;  %v4117_v13 = vadd.f32 %v3978_v21, %v2071_v15  }
 0x407   : >> { %v2058_v59 = vmul.f32 %v2056_v26, %v3987_v56 }
 0x408   : >> { %v2076_v35 = vrot.slane %v4109_v54, 7  ;;  %v4125_v56 = vadd.f32 %v3989_v58, %v2064_v16  }
 0x409   : >> { %v4129_v61 = vadd.f32 %v2058_v59, %v3991_v32  }
 0x40a   : >> { %v2078_v21 = vmul.f32 %v4012_v6, %v2076_v35 }
 0x438   : >> { %v1850_v2 = vpop.permute.xlu2 %1849 }
 0x442   : >> { %v1854_v34 = vpop.permute.xlu2 %1853 }
 0x443   : >> { %v1856_v46 = vsel %vm1048_vm14, %v1850_v2, %v1854_v34 }
 0x444   : >> { %v1884_v19 = vmul.f32 %v3982_v62, %v1856_v46  ;;  %v1911_v62 = vmul.f32 %v4004_v37, %v1856_v46  ;;  %v1938_v36 = vmul.f32 %v4032_v8, %v1856_v46  ;;  %v1965_v6 = vmul.f32 %v4057_v0, %v1856_v46 }
 0x445   : >> { %v2019_v37 = vmul.f32 %v4088_v49, %v1856_v46 }
 0x44b   : >> { %v1863_v30 = vpop.permute.xlu2 %1862 }
 0x44f   : >> { %v1841_v10 = vpop.permute.xlu1 %1840  ;;  %v1832_v1 = vpop.permute.xlu0 %1831 }
 0x458   : >> { %v1845_v29 = vpop.permute.xlu1 %1844  ;;  %v1836_v11 = vpop.permute.xlu0 %1835 }
 0x459   : >> { %v1847_v48 = vsel %vm1048_vm14, %v1841_v10, %v1845_v29  ;;  %v1838_v44 = vsel %vm1048_vm14, %v1832_v1, %v1836_v11 }
 0x45a   : >> { %v1877_v24 = vmul.f32 %v3997_v18, %v1847_v48  ;;  %v1904_v5 = vmul.f32 %v4009_v55, %v1847_v48  ;;  %v1931_v20 = vmul.f32 %v4035_v60, %v1847_v48  ;;  %v1958_v40 = vmul.f32 %v1957_v52, %v1847_v48 }
 0x45b   : >> { %v1871_v2 = vmul.f32 %v4000_v14, %v1838_v44  ;;  %v1898_v17 = vmul.f32 %v4017_v4, %v1838_v44  ;;  %v1925_v18 = vmul.f32 %v4039_v12, %v1838_v44  ;;  %v1952_v55 = vmul.f32 %v4061_v27, %v1838_v44 }
 0x45c   : >> { %v1985_v60 = vmul.f32 %v1984_v25, %v1847_v48  ;;  %v2012_v10 = vmul.f32 %v2011_v33, %v1847_v48  ;;  %v1979_v58 = vmul.f32 %v1978_v43, %v1838_v44  ;;  %v2006_v1 = vmul.f32 %v2005_v31, %v1838_v44 }
 0x45d   : >> { %v1878_v52 = vadd.f32 %v1877_v24, %v1871_v2  ;;  %v1905_v63 = vadd.f32 %v1904_v5, %v1898_v17  ;;  %v1932_v32 = vadd.f32 %v1931_v20, %v1925_v18  ;;  %v1992_v14 = vmul.f32 %v4074_v53, %v1856_v46 }
 0x45e   : >> { %v2039_v4 = vmul.f32 %v2038_v42, %v1847_v48  ;;  %v2066_v12 = vmul.f32 %v4125_v56, %v1847_v48  ;;  %v1959_v27 = vadd.f32 %v1958_v40, %v1952_v55  ;;  %v2033_v25 = vmul.f32 %v2032_v51, %v1838_v44 }
 0x45f   : >> { %v2060_v43 = vmul.f32 %v4129_v61, %v1838_v44  ;;  %v1986_v33 = vadd.f32 %v1985_v60, %v1979_v58  ;;  %v2013_v31 = vadd.f32 %v2012_v10, %v2006_v1  ;;  %v2079_v17 = vadd.f32 %v4020_v41, %v2078_v21   ;;  %v4376_v1 = vld [vmem:[#allocation16_spill] sm:$0xff] (%p1799_p4) }
 0x460   : >> { %v1885_v0 = vadd.f32 %v1884_v19, %v1878_v52  ;;  %v1912_v53 = vadd.f32 %v1911_v62, %v1905_v63  ;;  %v1939_v42 = vadd.f32 %v1938_v36, %v1932_v32  ;;  %v2040_v59 = vadd.f32 %v2039_v4, %v2033_v25  ;;  %v4377_v52 = vld [vmem:[#allocation17_spill] sm:$0xff] (%p1799_p4)  ;;  %v4378_v32 = vld [vmem:[#allocation18_spill] sm:$0xff] (%p1799_p4) }
 0x461   : >> { %v1859_v26 = vpop.permute.xlu1 %1858  ;;  %v2067_v49 = vadd.f32 %v2066_v12, %v2060_v43  ;;  %v1966_v35 = vadd.f32 %v1965_v6, %v1959_v27  ;;  %v2046_v24 = vmul.f32 %v4102_v50, %v1856_v46  ;;  %v1993_v5 = vadd.f32 %v1992_v14, %v1986_v33  ;;  %v4380_v33 = vld [vmem:[#allocation23_spill] sm:$0xff] (%p1799_p4) }
 0x462   : >> { %v1865_v8 = vsel %vm1048_vm14, %v1859_v26, %v1863_v30  ;;  %v2020_v20 = vadd.f32 %v2019_v37, %v2013_v31  ;;  %v2165_v62 = vmul.f32 (%p1799_p4), 0.5, %v4376_v1  ;;  %v2166_v63 = vmul.f32 (%p1799_p4), 0.5, %v4377_v52 }
 0x463   : >> { %v1891_v34 = vmul.f32 %v4027_v39, %v1865_v8  ;;  %v1918_v15 = vmul.f32 %v4042_v38, %v1865_v8  ;;  %v1945_v51 = vmul.f32 %v4052_v45, %v1865_v8  ;;  %v1972_v16 = vmul.f32 %v4067_v47, %v1865_v8 }
 0x464   : >> { %v1999_v29 = vmul.f32 %v4081_v9, %v1865_v8  ;;  %v2026_v44 = vmul.f32 %v4095_v7, %v1865_v8  ;;  %v2073_v39 = vmul.f32 %v4117_v13, %v1856_v46  ;;  %v2053_v38 = vmul.f32 %v4109_v54, %v1865_v8 }
 0x465   : >> { %v1892_v11 = vadd.f32 %v1891_v34, %v1885_v0  ;;  %v1919_v41 = vadd.f32 %v1918_v15, %v1912_v53  ;;  %v1946_v48 = vadd.f32 %v1945_v51, %v1939_v42  ;;  %v1973_v45 = vadd.f32 %v1972_v16, %v1966_v35  ;;  %v4381_v53 = vld [vmem:[#allocation24_spill] sm:$0xff] (%p1799_p4)  ;;  %v4382_v34 = vld [vmem:[#allocation14_spill] sm:$0xff] (%p1799_p4)  ;;  %v4383_v16 = vld [vmem:[#allocation15_spill] sm:$0xff] (%p1799_p4) }
 0x466   : >> { %v2080_v47 = vmul.f32 %v2079_v17, %v1865_v8  ;;  %v2000_v9 = vadd.f32 %v1999_v29, %v1993_v5  ;;  %v2047_v40 = vadd.f32 %v2046_v24, %v2040_v59  ;;  %v2027_v7 = vadd.f32 %v2026_v44, %v2020_v20 }
 0x467   : >> { %v2082_v19 = vsel %vm831_vm11, %v1892_v11, %v1919_v41  ;;  %v2074_v2 = vadd.f32 %v2073_v39, %v2067_v49  ;;  %v2167_v36 = vmul.f32 (%p1799_p4), 0.5, %v4378_v32  ;;  %2854 = vtanh.f32 (%p1799_p4), %v2165_v62 }
 0x468   : >> { %v2083_v21 = vsel %vm874_vm12, %v2082_v19, %v1946_v48  ;;  %v2054_v46 = vadd.f32 %v2053_v38, %v2047_v40  ;;  %2856 = vtanh.f32 (%p1799_p4), %v2166_v63  ;;  %v2169_v31 = vmul.f32 (%p1799_p4), 0.5, %v4380_v33 }
 0x469   : >> { %v2084_v50 = vsel %vm917_vm13, %v2083_v21, %v1973_v45  ;;  %v2081_v18 = vadd.f32 %v2080_v47, %v2074_v2  ;;  %v4374_v45 = vmov %v4125_v56  ;;  %2858 = vtanh.f32 (%p1799_p4), %v2167_v36 }
 0x46a   : >> { %v2086_v54 = vsel %vm2085_vm1, %v2084_v50, %v2000_v9  ;;  %v4375_v50 = vmov %v4129_v61  ;;  %1801 = sbr.rel (!%p1799_p4) target bundleno = 982 (0x3d6), region = 138  ;;  %v4379_v61 = vld [vmem:[#allocation21_spill] sm:$0xff] (%p1799_p4)  ;;  %v2170_v42 = vmul.f32 (%p1799_p4), 0.5, %v4381_v53  ;;  %v2163_v15 = vmul.f32 (%p1799_p4), 0.5, %v4382_v34 }
 0x46b   : >> { %v2088_v55 = vsel %vm2087_vm2, %v2086_v54, %v2027_v7  ;;  %v2168_v6 = vmul.f32 (%p1799_p4), 0.5, %v4379_v61  ;;  %v2164_v59 = vmul.f32 (%p1799_p4), 0.5, %v4383_v16 }
 0x46c   : >> { %v2090_v60 = vsel %vm2089_vm3, %v2088_v55, %v2054_v46  ;;  %v2560_v55 = vld [vmem:[%s4301_s13 + $0x18] sm:$0xff] (%p1799_p4) }
 0x46d   : >> { %v2092_v10 = vsel %vm2091_vm4, %v2090_v60, %v2081_v18  ;;  %v2855_v13 = vpop.eup (%p1799_p4), %2854  ;;  %2860 = vtanh.f32 (%p1799_p4), %v2168_v6  ;;  %2565 = vmatpush.bf16.msra.mxu2 (%p1799_p4), %v2560_v55  ;;  %2295 = vmatpush.bf16.msrb.mxu1 (%p1799_p4), %v2560_v55  ;;  %v2559_v60 = vld [vmem:[%s4301_s13 + $0x10] sm:$0xff] (%p1799_p4) }
 0x46e   : >> { %2094 = vst [vmem:[%s2093_s18] sm:$0xff] %v2092_v10  ;;  %v2857_v17 = vpop.eup (%p1799_p4), %2856  ;;  %v2181_v4 = vadd.f32 (%p1799_p4), 1.0, %v2855_v13  ;;  %2862 = vtanh.f32 (%p1799_p4), %v2170_v42  ;;  %v2558_v10 = vld [vmem:[%s4301_s13 + $0x8] sm:$0xff] (%p1799_p4) }
 0x46f   : > { %v2859_v30 = vpop.eup %2858  ;;  %v2182_v27 = vadd.f32 1.0, %v2857_v17  ;;  %2864 = vtanh.f32 %v2169_v31  ;;  %v4384_v17 = vld [vmem:[#allocation22_spill] sm:$0xff] }
 0x470   : > { %v2189_v12 = vmul.f32 0.5, %v2181_v4  ;;  %v2183_v25 = vadd.f32 1.0, %v2859_v30  ;;  %2866 = vtanh.f32 %v2163_v15 }
 0x471   : > { %v2190_v26 = vmul.f32 0.5, %v2182_v27  ;;  %2868 = vtanh.f32 %v2164_v59  ;;  %2566 = vmatpush.bf16.msra.mxu2 %v2559_v60  ;;  %2296 = vmatpush.bf16.msrb.mxu1 %v2559_v60 }
 0x472   : > { %v2197_v43 = vmul.f32 %v2189_v12, %v4376_v1  ;;  %v2191_v37 = vmul.f32 0.5, %v2183_v25  ;;  %v2557_v1 = vld [vmem:[%s4301_s13] sm:$0xff] }
 0x473   : > { %v2861_v51 = vpop.eup %2860  ;;  %v2198_v49 = vmul.f32 %v2190_v26, %v4377_v52 }
 0x474   : > { %2215 = vrot.lane.b32.xlu1 %v2197_v43, %s2928_s26  ;;  %v2199_v8 = vmul.f32 %v2191_v37, %v4378_v32  ;;  %v2184_v35 = vadd.f32 1.0, %v2861_v51  ;;  %v2863_v41 = vpop.eup %2862  ;;  %v2852_v32 = vld [vmem:[%s4299_s11] ss:$0 sm:$0xff] }
 0x475   : > { %v4173_v58 = vld [vmem:[#allocation4 + $0x10] sm:$0xff]  ;;  %v4180_v56 = vld [vmem:[#allocation4 + $0x18] sm:$0xff]  ;;  %v4183_v14 = vld [vmem:[#allocation4 + $0x20] sm:$0xff]  ;;  %v2865_v44 = vpop.eup %2864  ;;  %v2186_v24 = vadd.f32 1.0, %v2863_v41  ;;  %2567 = vmatpush.bf16.msra.mxu2 %v2558_v10  ;;  %2297 = vmatpush.bf16.msrb.mxu1 %v2558_v10  ;;  %v2149_v6 = vmul.f32 %v2852_v32, %v3371_v3  ;;  %v2150_v4 = vmul.f32 %v2852_v32, %v4384_v17 }
 0x476   : > { %2115 = vrot.lane.b32.xlu0 %v4173_v58, %s2928_s26  ;;  %2119 = vrot.lane.b32.xlu2 %v4183_v14, %s2928_s26  ;;  %v4193_v0 = vld [vmem:[#allocation4 + $0x28] sm:$0xff]  ;;  %v4202_v29 = vld [vmem:[#allocation4 + $0x30] sm:$0xff]  ;;  %v4204_v11 = vld [vmem:[#allocation4 + $0x38] sm:$0xff]  ;;  %v2192_v48 = vmul.f32 0.5, %v2184_v35  ;;  %v2867_v39 = vpop.eup %2866  ;;  %v2185_v20 = vadd.f32 1.0, %v2865_v44 }
 0x477   : > { %v2869_v5 = vpop.eup %2868  ;;  %v2194_v38 = vmul.f32 0.5, %v2186_v24  ;;  %v2179_v19 = vadd.f32 1.0, %v2867_v39  ;;  %v2095_v40 = vld [vmem:[#allocation4] sm:$0xff]  ;;  %v2096_v18 = vld [vmem:[#allocation4 + $0x8] sm:$0xff]  ;;  %v4390_v17 = vld [vmem:[#allocation8_spill] sm:$0xff] }
 0x478   : > { %v2200_v45 = vmul.f32 %v2192_v48, %v4379_v61  ;;  %v2180_v9 = vadd.f32 1.0, %v2869_v5  ;;  %v2193_v21 = vmul.f32 0.5, %v2185_v20  ;;  %v4385_v44 = vld [vmem:[#allocation19_spill] sm:$0xff]  ;;  %v4386_v5 = vld [vmem:[#allocation20_spill] sm:$0xff] }
 0x479   : > { %v2202_v47 = vmul.f32 %v2194_v38, %v4381_v53  ;;  %v2187_v7 = vmul.f32 0.5, %v2179_v19  ;;  %2568 = vmatpush.bf16.msra.mxu2 %v2557_v1  ;;  %2298 = vmatpush.bf16.msrb.mxu1 %v2557_v1  ;;  %v2152_v53 = vmul.f32 %v2852_v32, %v3380_v28  ;;  %v2147_v24 = vmul.f32 %v2852_v32, %v4385_v44  ;;  %v4388_v1 = vld [vmem:[#allocation10_spill] sm:$0xff] }
 0x47a   : > { %v2188_v2 = vmul.f32 0.5, %v2180_v9  ;;  %v2201_v50 = vmul.f32 %v2193_v21, %v4380_v33  ;;  %v2148_v38 = vmul.f32 %v2852_v32, %v4386_v5 }
 0x47b   : > { %v2195_v46 = vmul.f32 %v2187_v7, %v4382_v34 }
 0x47c   : > { %2217 = vrot.lane.b32.xlu1 %v2198_v49, %s2928_s26  ;;  %v2196_v54 = vmul.f32 %v2188_v2, %v4383_v16 }
 0x47e   : > { %2117 = vrot.lane.b32.xlu0 %v4180_v56, %s2928_s26  ;;  %2121 = vrot.lane.b32.xlu2 %v4193_v0, %s2928_s26 }
 0x484   : > { %2221 = vrot.lane.b32.xlu1 %v2200_v45, %s2928_s26 }
 0x486   : > { %2219 = vrot.lane.b32.xlu0 %v2199_v8, %s2928_s26  ;;  %2123 = vrot.lane.b32.xlu2 %v4202_v29, %s2928_s26 }
 0x48c   : > { %2223 = vrot.lane.b32.xlu1 %v2201_v50, %s2928_s26  ;;  %v2853_v50 = vld [vmem:[%s504_s24] ss:$0 sm:$0xff] }
 0x48e   : > { %2125 = vrot.lane.b32.xlu0 %v4204_v11, %s2928_s26  ;;  %2225 = vrot.lane.b32.xlu2 %v2202_v47, %s2928_s26 }
 0x494   : > { %2113 = vrot.lane.b32.xlu1 %v2096_v18, %s2928_s26 }
 0x496   : > { %2111 = vrot.lane.b32.xlu0 %v2095_v40, %s2928_s26  ;;  %2211 = vrot.lane.b32.xlu2 %v2195_v46, %s2928_s26 }
 0x49e   : > { %2213 = vrot.lane.b32.xlu0 %v2196_v54, %s2928_s26 }
 0x4d0   : > { %v2120_v52 = vpop.permute.xlu2 %2119 }
 0x4d8   : > { %v2122_v30 = vpop.permute.xlu2 %2121 }
 0x4d9   : > { %v2140_v3 = vadd.f32 %v2122_v30, %v4193_v0  ;;  %v2154_v0 = vmul.f32 %v2852_v32, %v3418_v57 }
 0x4db   : > { %v2160_v15 = vadd.f32 %v2152_v53, %v2140_v3  ;;  %v4394_v53 = vld [vmem:[#allocation13_spill] sm:$0xff] }
 0x4e0   : > { %v2124_v26 = vpop.permute.xlu2 %2123 }
 0x4e6   : > { %v2216_v36 = vpop.permute.xlu1 %2215 }
 0x4e8   : > { %v2116_v62 = vpop.permute.xlu0 %2115  ;;  %v2226_v51 = vpop.permute.xlu2 %2225 }
 0x4e9   : > { %v2137_v61 = vadd.f32 %v2116_v62, %v4173_v58  ;;  %v2139_v58 = vadd.f32 %v2120_v52, %v4183_v14  ;;  %v2141_v14 = vadd.f32 %v2124_v26, %v4202_v29 }
 0x4eb   : > { %v2157_v27 = vadd.f32 %v2149_v6, %v2137_v61 }
 0x4ed   : > { %v2237_v37 = vmul.f32 %v2216_v36, %v2157_v27 }
 0x4ee   : > { %v2218_v43 = vpop.permute.xlu1 %2217 }
 0x4f0   : > { %v2118_v63 = vpop.permute.xlu0 %2117  ;;  %v2212_v20 = vpop.permute.xlu2 %2211 }
 0x4f1   : > { %v2138_v13 = vadd.f32 %v2118_v63, %v4180_v56  ;;  %v2151_v56 = vmul.f32 %v2852_v32, %v3378_v23  ;;  %v2153_v23 = vmul.f32 %v2852_v32, %v3416_v22  ;;  %v4389_v32 = vld [vmem:[#allocation6_spill] sm:$0xff] }
 0x4f3   : > { %v2158_v25 = vadd.f32 %v2150_v4, %v2138_v13  ;;  %v2159_v34 = vadd.f32 %v2151_v56, %v2139_v58  ;;  %v2161_v9 = vadd.f32 %v2153_v23, %v2141_v14 }
 0x4f5   : > { %v2238_v33 = vmul.f32 %v2218_v43, %v2158_v25 }
 0x4f6   : > { %v2222_v42 = vpop.permute.xlu1 %2221 }
 0x4f7   : > { %v2244_v31 = vpack.c.bf16 %v2238_v33, %v2237_v37  ;;  %v2240_v59 = vmul.f32 %v2222_v42, %v2160_v15  ;;  %v4392_v33 = vld [vmem:[#allocation11_spill] sm:$0xff] }
 0x4f8   : > { %v2220_v12 = vpop.permute.xlu0 %2219 }
 0x4f9   : > { %2544 = vmatmul.msk.bf16.vlgmr.msra.gmra.mxu2 %vm1048_vm14, %v2244_v31  ;;  %v2239_v16 = vmul.f32 %v2220_v12, %v2159_v34  ;;  %v4391_v12 = vld [vmem:[#allocation9_spill] sm:$0xff] }
 0x4fb   : > { %v2245_v48 = vpack.c.bf16 %v2240_v59, %v2239_v16 }
 0x4fe   : > { %v2224_v49 = vpop.permute.xlu1 %2223 }
 0x4ff   : > { %v2241_v22 = vmul.f32 %v2224_v49, %v2161_v9 }
 0x500   : > { %v2126_v8 = vpop.permute.xlu0 %2125 }
 0x501   : > { %v2142_v28 = vadd.f32 %v2126_v8, %v4204_v11  ;;  %v4393_v8 = vld [vmem:[#allocation12_spill] sm:$0xff] }
 0x506   : > { %v2114_v45 = vpop.permute.xlu1 %2113 }
 0x507   : > { %v2136_v47 = vadd.f32 %v2114_v45, %v2096_v18  ;;  %v4387_v18 = vld [vmem:[#allocation7_spill] sm:$0xff] }
 0x508   : > { %v2112_v35 = vpop.permute.xlu0 %2111 }
 0x509   : > { %v2135_v41 = vadd.f32 %v2112_v35, %v2095_v40  ;;  %2545 = vmatmul.msk.bf16.gmra.mxu2 %vm1048_vm14, %v2245_v48  ;;  %v2162_v40 = vadd.f32 %v2154_v0, %v2142_v28  ;;  %v2156_v7 = vadd.f32 %v2148_v38, %v2136_v47 }
 0x50b   : > { %v2155_v39 = vadd.f32 %v2147_v24, %v2135_v41  ;;  %v2242_v2 = vmul.f32 %v2226_v51, %v2162_v40 }
 0x50d   : > { %v2235_v21 = vmul.f32 %v2212_v20, %v2155_v39  ;;  %v2246_v57 = vpack.c.bf16 %v2242_v2, %v2241_v22 }
 0x510   : > { %v2214_v19 = vpop.permute.xlu0 %2213 }
 0x511   : > { %v2236_v29 = vmul.f32 %v2214_v19, %v2156_v7 }
 0x513   : > { %v2243_v11 = vpack.c.bf16 %v2236_v29, %v2235_v21 }
 0x515   : > { %2543 = vmatmul.msk.bf16.vlgmr.msrb.gmra.mxu1 %vm1048_vm14, %v2243_v11 }
 0x519   : > { %2546 = vmatmul.msk.bf16.gmra.mxu2 %vm1048_vm14, %v2246_v57 }
 0x57c   : > { %v2305_v46 = vpop.f32.mrf.mxu2 }
 0x57d   : > { %v2326_v54 = vmul.f32 %v2853_v50, %v2305_v46 }
 0x57f   : > { %v2334_v55 = vadd.f32 %v2326_v54, %v4387_v18 }
 0x581   : > { %2342 = vst.msk [vmem:[%s3039_s27 + $0x10] sm:$0xff] %vm519_vm0, %v2334_v55 }
 0x584   : > { %v2307_v60 = vpop.f32.mrf.mxu2 }
 0x585   : > { %v2327_v10 = vmul.f32 %v2853_v50, %v2307_v60 }
 0x587   : > { %v2335_v62 = vadd.f32 %v2327_v10, %v4388_v1 }
 0x589   : > { %2343 = vst.msk [vmem:[%s3039_s27 + $0x18] sm:$0xff] %vm519_vm0, %v2335_v62 }
 0x58c   : > { %v2310_v52 = vpop.f32.mrf.mxu2 }
 0x58d   : > { %v2328_v63 = vmul.f32 %v2853_v50, %v2310_v52 }
 0x58f   : > { %v2336_v36 = vadd.f32 %v2328_v63, %v4389_v32 }
 0x591   : > { %2344 = vst.msk [vmem:[%s3039_s27 + $0x20] sm:$0xff] %vm519_vm0, %v2336_v36 }
 0x592   : > { %v2300_v61 = vpop.f32.mrf.mxu1 }
 0x593   : > { %v2324_v6 = vmul.f32 %v2853_v50, %v2300_v61 }
 0x594   : > { %v2312_v13 = vpop.f32.mrf.mxu2 }
 0x595   : > { %v2332_v4 = vadd.f32 %v2324_v6, %v4390_v17  ;;  %v2329_v30 = vmul.f32 %v2853_v50, %v2312_v13 }
 0x597   : > { %2340 = vst.msk [vmem:[%s3039_s27] sm:$0xff] %vm519_vm0, %v2332_v4  ;;  %v2337_v27 = vadd.f32 %v2329_v30, %v4391_v12 }
 0x599   : > { %2345 = vst.msk [vmem:[%s3039_s27 + $0x28] sm:$0xff] %vm519_vm0, %v2337_v27 }
 0x59a   : > { %v2302_v25 = vpop.f32.mrf.mxu1 }
 0x59b   : > { %v2325_v43 = vmul.f32 %v2853_v50, %v2302_v25 }
 0x59c   : > { %v2315_v37 = vpop.f32.mrf.mxu2 }
 0x59d   : > { %v2333_v31 = vadd.f32 %v2325_v43, %v4392_v33  ;;  %v2330_v26 = vmul.f32 %v2853_v50, %v2315_v37 }
 0x59f   : > { %2341 = vst.msk [vmem:[%s3039_s27 + $0x8] sm:$0xff] %vm519_vm0, %v2333_v31  ;;  %v2338_v58 = vadd.f32 %v2330_v26, %v4393_v8 }
 0x5a1   : > { %2346 = vst.msk [vmem:[%s3039_s27 + $0x30] sm:$0xff] %vm519_vm0, %v2338_v58 }
 0x5a4   : > { %v2317_v3 = vpop.f32.mrf.mxu2 }
 0x5a5   : > { %v2331_v56 = vmul.f32 %v2853_v50, %v2317_v3 }
 0x5a7   : > { %v2339_v42 = vadd.f32 %v2331_v56, %v4394_v53 }
 0x5a9   : > { %2347 = vst.msk [vmem:[%s3039_s27 + $0x38] sm:$0xff] %vm519_vm0, %v2339_v42 }
 0x5aa PF: > { %s24_s29 = sadd.s32 1, %s2896_s29  }
 0x5ab   : > { %p21_p5 = scmp.ge.s32.totalorder %s24_s29, 4  }
 0x5ad   :  { %23 = sbr.rel (!%p21_p5) target bundleno = 1 (0x1), region = 149 }

</bundles_post_ra>
